<compile_context>
chip_gen: v6e
topology: v6e:2x2x1
jax: 0.10.0
libtpu: 0.0.40
codegen_flags: <defaults>
</compile_context>

<pallas_src>
import functools

import jax
import jax.numpy as jnp
import numpy as np
from jax.experimental import pallas as pl
from jax.experimental.pallas import tpu as pltpu

# ---------------------------------------------------------------------------
# Model hyper-parameters (module defines input=13, classes=8, layers=2,
# hidden=128; we keep hidden small for the example run).
# ---------------------------------------------------------------------------
INPUT_SIZE = 13
HIDDEN_SIZE = 32
NUM_LAYERS = 2
NUM_CLASSES = 8
FC1_SIZE = 256


# ---------------------------------------------------------------------------
# In-kernel helpers (traced; Python loops unroll at trace time)
# ---------------------------------------------------------------------------
def _lstm_cell(gates, c, hidden):
    """LSTM nonlinearities. gates: (B, 4H) pre-activations in PyTorch order
    (i, f, g, o); c: (B, H). Activations run over the full register and are
    blended with a lane mask (no per-gate sliced activations)."""
    H = hidden
    lane = jax.lax.broadcasted_iota(jnp.int32, gates.shape, dimension=1)
    use_tanh = (lane >= 2 * H) & (lane < 3 * H)          # the 'g' gate block
    act = jnp.where(use_tanh, jnp.tanh(gates), jax.nn.sigmoid(gates))
    i_g = act[:, 0 * H:1 * H]
    f_g = act[:, 1 * H:2 * H]
    g_g = act[:, 2 * H:3 * H]
    o_g = act[:, 3 * H:4 * H]
    c_new = f_g * c + i_g * g_g
    h_new = o_g * jnp.tanh(c_new)
    return h_new, c_new


def _run_direction(xp_steps, w_hh, b, hidden, reverse):
    """One LSTM direction, recurrence only (input projections precomputed).

    xp_steps : list of T arrays (B, 4H) = x_t @ W_ih, indexed by ORIGINAL time.
    Returns (per-step h in original time order, final h of the pass).
    """
    T = len(xp_steps)
    B = xp_steps[0].shape[0]
    H = hidden
    h = jnp.zeros((B, H), jnp.float32)
    c = jnp.zeros((B, H), jnp.float32)
    hs = [None] * T
    order = range(T - 1, -1, -1) if reverse else range(T)
    for t in order:                      # static unroll: T is small and known
        gates = (xp_steps[t]
                 + jnp.dot(h, w_hh, preferred_element_type=jnp.float32)
                 + b)
        h, c = _lstm_cell(gates, c, H)
        hs[t] = h
    return hs, h


# ---------------------------------------------------------------------------
# The fused kernel
# ---------------------------------------------------------------------------
def speech_rnn_kernel(x_ref,
                      w_ih_1f_ref, w_hh_1f_ref, b_1f_ref,
                      w_ih_1b_ref, w_hh_1b_ref, b_1b_ref,
                      w_ih_2f_ref, w_hh_2f_ref, b_2f_ref,
                      w_ih_2b_ref, b_2b_ref,
                      fc1_w_ref, fc1_b_ref, fc2_w_ref, fc2_b_ref,
                      out_ref, *, hidden, seq_len):
    H = hidden
    T = seq_len
    x = x_ref[...]                               # (B, T, F), batch-first
    B, _, Fdim = x.shape

    # ---- layer 1: batch the input projections over all timesteps -----------
    x2d = x.reshape(B * T, Fdim)                 # row index = b*T + t
    xp_1f = jnp.dot(x2d, w_ih_1f_ref[...],
                    preferred_element_type=jnp.float32).reshape(B, T, 4 * H)
    xp_1b = jnp.dot(x2d, w_ih_1b_ref[...],
                    preferred_element_type=jnp.float32).reshape(B, T, 4 * H)

    hs_1f, _ = _run_direction([xp_1f[:, t, :] for t in range(T)],
                              w_hh_1f_ref[...], b_1f_ref[...], H, reverse=False)
    hs_1b, _ = _run_direction([xp_1b[:, t, :] for t in range(T)],
                              w_hh_1b_ref[...], b_1b_ref[...], H, reverse=True)

    # ---- layer 2 forward: one batched input-projection matmul per half -----
    h1f_2d = jnp.concatenate(hs_1f, axis=0)      # (T*B, H), row = t*B + b
    h1b_2d = jnp.concatenate(hs_1b, axis=0)      # (T*B, H)
    w_ih_2f = w_ih_2f_ref[...]                   # (2H, 4H)
    xp_2f = (jnp.dot(h1f_2d, w_ih_2f[:H, :], preferred_element_type=jnp.float32)
             + jnp.dot(h1b_2d, w_ih_2f[H:, :], preferred_element_type=jnp.float32))
    _, h_2f = _run_direction([xp_2f[t * B:(t + 1) * B, :] for t in range(T)],
                             w_hh_2f_ref[...], b_2f_ref[...], H, reverse=False)

    # ---- layer 2 backward, pruned: out[:, -1, :] only sees the FIRST step of
    # the reversed pass (zero initial state), so the remaining T-1 steps and
    # its W_hh term (h0 @ W_hh = 0) are skipped entirely — bit-identical.
    w_ih_2b = w_ih_2b_ref[...]                   # (2H, 4H)
    gates_2b = (jnp.dot(hs_1f[T - 1], w_ih_2b[:H, :],
                        preferred_element_type=jnp.float32)
                + jnp.dot(hs_1b[T - 1], w_ih_2b[H:, :],
                          preferred_element_type=jnp.float32)
                + b_2b_ref[...])
    h_2b, _ = _lstm_cell(gates_2b, jnp.zeros((B, H), jnp.float32), H)

    # ---- MLP head ------------------------------------------------------------
    # TODO(synk): dropout is identity here (eval-mode semantics, no RNG mask).
    feat = jnp.concatenate([h_2f, h_2b], axis=-1)            # (B, 2H)
    hid = (jnp.dot(feat, fc1_w_ref[...], preferred_element_type=jnp.float32)
           + fc1_b_ref[...])
    hid = jnp.maximum(hid, 0.0)
    out_ref[...] = (jnp.dot(hid, fc2_w_ref[...], preferred_element_type=jnp.float32)
                    + fc2_b_ref[...])


# ---------------------------------------------------------------------------
# Wrapper: one pallas_call, everything VMEM-resident, no grid
# ---------------------------------------------------------------------------
def speech_rnn_forward(params, x_btf):
    """x_btf: (B, T, input_size) float32 -> logits (B, num_classes)."""
    B, T, _ = x_btf.shape
    assert len(params["lstm"]) == 2, "kernel is specialized to num_layers=2"
    (w1f_ih, w1f_hh, b1f), (w1b_ih, w1b_hh, b1b) = params["lstm"][0]
    (w2f_ih, w2f_hh, b2f), (w2b_ih, _w2b_hh, b2b) = params["lstm"][1]
    H = w1f_hh.shape[0]

    vmem = pl.BlockSpec(memory_space=pltpu.MemorySpace.VMEM)
    kernel = functools.partial(speech_rnn_kernel, hidden=H, seq_len=T)
    return pl.pallas_call(
        kernel,
        out_shape=jax.ShapeDtypeStruct((B, NUM_CLASSES), jnp.float32),
        in_specs=[vmem] * 16,
        out_specs=vmem,
    )(x_btf,
      w1f_ih, w1f_hh, b1f,
      w1b_ih, w1b_hh, b1b,
      w2f_ih, w2f_hh, b2f,
      w2b_ih, b2b,              # layer-2 backward W_hh is unused (pruned path)
      params["fc1_w"], params["fc1_b"], params["fc2_w"], params["fc2_b"])


# ---------------------------------------------------------------------------
# Parameter construction (deterministic, PyTorch-style uniform init)
# ---------------------------------------------------------------------------
def init_params(key, input_size, hidden, num_layers, num_classes, fc1_size):
    k = 1.0 / np.sqrt(hidden)
    params = {"lstm": []}
    for layer in range(num_layers):
        d_in = input_size if layer == 0 else 2 * hidden
        dirs = []
        for _ in range(2):  # forward, backward
            key, k1, k2, k3, k4 = jax.random.split(key, 5)
            w_ih = jax.random.uniform(k1, (d_in, 4 * hidden), jnp.float32, -k, k)
            w_hh = jax.random.uniform(k2, (hidden, 4 * hidden), jnp.float32, -k, k)
            b_ih = jax.random.uniform(k3, (4 * hidden,), jnp.float32, -k, k)
            b_hh = jax.random.uniform(k4, (4 * hidden,), jnp.float32, -k, k)
            dirs.append((w_ih, w_hh, (b_ih + b_hh)[None, :]))
        params["lstm"].append(dirs)

    k1_ = 1.0 / np.sqrt(2 * hidden)
    k2_ = 1.0 / np.sqrt(fc1_size)
    key, a, b, c, d = jax.random.split(key, 5)
    params["fc1_w"] = jax.random.uniform(a, (2 * hidden, fc1_size), jnp.float32, -k1_, k1_)
    params["fc1_b"] = jax.random.uniform(b, (1, fc1_size), jnp.float32, -k1_, k1_)
    params["fc2_w"] = jax.random.uniform(c, (fc1_size, num_classes), jnp.float32, -k2_, k2_)
    params["fc2_b"] = jax.random.uniform(d, (1, num_classes), jnp.float32, -k2_, k2_)
    return params


# ---------------------------------------------------------------------------
# Pure-JAX reference (full, unpruned bidirectional LSTM)
# ---------------------------------------------------------------------------
def _lstm_dir_ref(x_tbf, w_ih, w_hh, b, reverse):
    T, B, _ = x_tbf.shape
    H = w_hh.shape[0]
    xs = x_tbf[::-1] if reverse else x_tbf

    def step(carry, x_t):
        h, c = carry
        gates = x_t @ w_ih + h @ w_hh + b
        i = jax.nn.sigmoid(gates[:, :H])
        f = jax.nn.sigmoid(gates[:, H:2 * H])
        g = jnp.tanh(gates[:, 2 * H:3 * H])
        o = jax.nn.sigmoid(gates[:, 3 * H:])
        c = f * c + i * g
        h = o * jnp.tanh(c)
        return (h, c), h

    init = (jnp.zeros((B, H), jnp.float32), jnp.zeros((B, H), jnp.float32))
    _, hs = jax.lax.scan(step, init, xs)
    return hs[::-1] if reverse else hs


def speech_rnn_ref(params, x_btf):
    x = jnp.transpose(x_btf, (1, 0, 2))
    for layer_params in params["lstm"]:
        (wf_ih, wf_hh, bf), (wb_ih, wb_hh, bb) = layer_params
        h_fwd = _lstm_dir_ref(x, wf_ih, wf_hh, bf, reverse=False)
        h_bwd = _lstm_dir_ref(x, wb_ih, wb_hh, bb, reverse=True)
        x = jnp.concatenate([h_fwd, h_bwd], axis=-1)
    feat = x[-1]
    h = jnp.maximum(feat @ params["fc1_w"] + params["fc1_b"], 0.0)
    return h @ params["fc2_w"] + params["fc2_b"]


# ---------------------------------------------------------------------------
if __name__ == "__main__":
    B, T = 2, 8
    key = jax.random.PRNGKey(0)
    key, pkey, xkey = jax.random.split(key, 3)

    params = init_params(pkey, INPUT_SIZE, HIDDEN_SIZE, NUM_LAYERS,
                         NUM_CLASSES, FC1_SIZE)
    x = jax.random.normal(xkey, (B, T, INPUT_SIZE), jnp.float32)

    logits = jax.block_until_ready(jax.jit(speech_rnn_forward)(params, x))

    ref = jax.block_until_ready(speech_rnn_ref(params, x))
    np.testing.assert_allclose(np.asarray(logits), np.asarray(ref),
                               rtol=2e-3, atol=2e-3)

    assert logits.shape == (B, NUM_CLASSES)
    print("KERNEL_OK")
</pallas_src>

<mosaic_0001>
module attributes {stable_mosaic.version = 11 : i64} {
  func.func @speech_rnn_kernel(%arg0: memref<2x8x13xf32, #tpu.memory_space<vmem>>, %arg1: memref<13x128xf32, #tpu.memory_space<vmem>>, %arg2: memref<32x128xf32, #tpu.memory_space<vmem>>, %arg3: memref<1x128xf32, #tpu.memory_space<vmem>>, %arg4: memref<13x128xf32, #tpu.memory_space<vmem>>, %arg5: memref<32x128xf32, #tpu.memory_space<vmem>>, %arg6: memref<1x128xf32, #tpu.memory_space<vmem>>, %arg7: memref<64x128xf32, #tpu.memory_space<vmem>>, %arg8: memref<32x128xf32, #tpu.memory_space<vmem>>, %arg9: memref<1x128xf32, #tpu.memory_space<vmem>>, %arg10: memref<64x128xf32, #tpu.memory_space<vmem>>, %arg11: memref<1x128xf32, #tpu.memory_space<vmem>>, %arg12: memref<64x256xf32, #tpu.memory_space<vmem>>, %arg13: memref<1x256xf32, #tpu.memory_space<vmem>>, %arg14: memref<256x8xf32, #tpu.memory_space<vmem>>, %arg15: memref<1x8xf32, #tpu.memory_space<vmem>>, %arg16: memref<2x8xf32, #tpu.memory_space<vmem>>) attributes {dimension_semantics = [], scalar_prefetch = 0 : i64, scratch_operands = 0 : i64, tpu.core_type = #tpu.core_type<tc>} {
    %c0 = arith.constant 0 : index
    %c0_0 = arith.constant 0 : index
    %c0_1 = arith.constant 0 : index
    %0 = vector.load %arg0[%c0, %c0_0, %c0_1] : memref<2x8x13xf32, #tpu.memory_space<vmem>>, vector<2x8x13xf32>
    %1 = vector.shape_cast %0 : vector<2x8x13xf32> to vector<16x13xf32>
    %c0_2 = arith.constant 0 : index
    %c0_3 = arith.constant 0 : index
    %2 = vector.load %arg1[%c0_2, %c0_3] : memref<13x128xf32, #tpu.memory_space<vmem>>, vector<13x128xf32>
    %cst = arith.constant dense<0.000000e+00> : vector<16x128xf32>
    %3 = tpu.matmul %1, %2, %cst {dimension_numbers = #tpu.dot_dimension_numbers<[1], [0], [0], [1], [0, 0, 1, 1], [], []>} : vector<16x13xf32>, vector<13x128xf32>, vector<16x128xf32> -> vector<16x128xf32>
    %4 = vector.shape_cast %3 : vector<16x128xf32> to vector<2x8x128xf32>
    %c0_4 = arith.constant 0 : index
    %c0_5 = arith.constant 0 : index
    %5 = vector.load %arg4[%c0_4, %c0_5] : memref<13x128xf32, #tpu.memory_space<vmem>>, vector<13x128xf32>
    %cst_6 = arith.constant dense<0.000000e+00> : vector<16x128xf32>
    %6 = tpu.matmul %1, %5, %cst_6 {dimension_numbers = #tpu.dot_dimension_numbers<[1], [0], [0], [1], [0, 0, 1, 1], [], []>} : vector<16x13xf32>, vector<13x128xf32>, vector<16x128xf32> -> vector<16x128xf32>
    %7 = vector.shape_cast %6 : vector<16x128xf32> to vector<2x8x128xf32>
    %8 = vector.extract_strided_slice %4 {offsets = [0, 0, 0], sizes = [2, 1, 128], strides = [1, 1, 1]} : vector<2x8x128xf32> to vector<2x1x128xf32>
    %9 = vector.shape_cast %8 : vector<2x1x128xf32> to vector<2x128xf32>
    %10 = vector.extract_strided_slice %4 {offsets = [0, 1, 0], sizes = [2, 1, 128], strides = [1, 1, 1]} : vector<2x8x128xf32> to vector<2x1x128xf32>
    %11 = vector.shape_cast %10 : vector<2x1x128xf32> to vector<2x128xf32>
    %12 = vector.extract_strided_slice %4 {offsets = [0, 2, 0], sizes = [2, 1, 128], strides = [1, 1, 1]} : vector<2x8x128xf32> to vector<2x1x128xf32>
    %13 = vector.shape_cast %12 : vector<2x1x128xf32> to vector<2x128xf32>
    %14 = vector.extract_strided_slice %4 {offsets = [0, 3, 0], sizes = [2, 1, 128], strides = [1, 1, 1]} : vector<2x8x128xf32> to vector<2x1x128xf32>
    %15 = vector.shape_cast %14 : vector<2x1x128xf32> to vector<2x128xf32>
    %16 = vector.extract_strided_slice %4 {offsets = [0, 4, 0], sizes = [2, 1, 128], strides = [1, 1, 1]} : vector<2x8x128xf32> to vector<2x1x128xf32>
    %17 = vector.shape_cast %16 : vector<2x1x128xf32> to vector<2x128xf32>
    %18 = vector.extract_strided_slice %4 {offsets = [0, 5, 0], sizes = [2, 1, 128], strides = [1, 1, 1]} : vector<2x8x128xf32> to vector<2x1x128xf32>
    %19 = vector.shape_cast %18 : vector<2x1x128xf32> to vector<2x128xf32>
    %20 = vector.extract_strided_slice %4 {offsets = [0, 6, 0], sizes = [2, 1, 128], strides = [1, 1, 1]} : vector<2x8x128xf32> to vector<2x1x128xf32>
    %21 = vector.shape_cast %20 : vector<2x1x128xf32> to vector<2x128xf32>
    %22 = vector.extract_strided_slice %4 {offsets = [0, 7, 0], sizes = [2, 1, 128], strides = [1, 1, 1]} : vector<2x8x128xf32> to vector<2x1x128xf32>
    %23 = vector.shape_cast %22 : vector<2x1x128xf32> to vector<2x128xf32>
    %c0_7 = arith.constant 0 : index
    %c0_8 = arith.constant 0 : index
    %24 = vector.load %arg2[%c0_7, %c0_8] : memref<32x128xf32, #tpu.memory_space<vmem>>, vector<32x128xf32>
    %c0_9 = arith.constant 0 : index
    %c0_10 = arith.constant 0 : index
    %25 = vector.load %arg3[%c0_9, %c0_10] : memref<1x128xf32, #tpu.memory_space<vmem>>, vector<1x128xf32>
    %cst_11 = arith.constant 0.000000e+00 : f32
    %26 = vector.broadcast %cst_11 : f32 to vector<2x32xf32>
    %cst_12 = arith.constant 0.000000e+00 : f32
    %27 = vector.broadcast %cst_12 : f32 to vector<2x32xf32>
    %cst_13 = arith.constant dense<0.000000e+00> : vector<2x128xf32>
    %28 = tpu.matmul %26, %24, %cst_13 {dimension_numbers = #tpu.dot_dimension_numbers<[1], [0], [0], [1], [0, 0, 1, 1], [], []>} : vector<2x32xf32>, vector<32x128xf32>, vector<2x128xf32> -> vector<2x128xf32>
    %29 = arith.addf %9, %28 : vector<2x128xf32>
    %30 = vector.broadcast %25 : vector<1x128xf32> to vector<2x128xf32>
    %31 = arith.addf %29, %30 : vector<2x128xf32>
    %32 = tpu.iota {dimensions = array<i32: 1>} : vector<2x128xi32>
    %c64_i32 = arith.constant 64 : i32
    %33 = vector.broadcast %c64_i32 : i32 to vector<2x128xi32>
    %34 = arith.cmpi sge, %32, %33 : vector<2x128xi32>
    %c96_i32 = arith.constant 96 : i32
    %35 = vector.broadcast %c96_i32 : i32 to vector<2x128xi32>
    %36 = arith.cmpi slt, %32, %35 : vector<2x128xi32>
    %37 = arith.andi %34, %36 : vector<2x128xi1>
    %38 = math.tanh %31 : vector<2x128xf32>
    %39 = arith.negf %31 : vector<2x128xf32>
    %40 = math.exp %39 : vector<2x128xf32>
    %cst_14 = arith.constant 1.000000e+00 : f32
    %41 = vector.broadcast %cst_14 : f32 to vector<2x128xf32>
    %42 = arith.addf %41, %40 : vector<2x128xf32>
    %43 = arith.divf %41, %42 : vector<2x128xf32>
    %44 = arith.select %37, %38, %43 : vector<2x128xi1>, vector<2x128xf32>
    %45 = vector.extract_strided_slice %44 {offsets = [0, 0], sizes = [2, 32], strides = [1, 1]} : vector<2x128xf32> to vector<2x32xf32>
    %46 = vector.extract_strided_slice %44 {offsets = [0, 32], sizes = [2, 32], strides = [1, 1]} : vector<2x128xf32> to vector<2x32xf32>
    %47 = vector.extract_strided_slice %44 {offsets = [0, 64], sizes = [2, 32], strides = [1, 1]} : vector<2x128xf32> to vector<2x32xf32>
    %48 = vector.extract_strided_slice %44 {offsets = [0, 96], sizes = [2, 32], strides = [1, 1]} : vector<2x128xf32> to vector<2x32xf32>
    %49 = arith.mulf %46, %27 : vector<2x32xf32>
    %50 = arith.mulf %45, %47 : vector<2x32xf32>
    %51 = arith.addf %49, %50 : vector<2x32xf32>
    %52 = math.tanh %51 : vector<2x32xf32>
    %53 = arith.mulf %48, %52 : vector<2x32xf32>
    %cst_15 = arith.constant dense<0.000000e+00> : vector<2x128xf32>
    %54 = tpu.matmul %53, %24, %cst_15 {dimension_numbers = #tpu.dot_dimension_numbers<[1], [0], [0], [1], [0, 0, 1, 1], [], []>} : vector<2x32xf32>, vector<32x128xf32>, vector<2x128xf32> -> vector<2x128xf32>
    %55 = arith.addf %11, %54 : vector<2x128xf32>
    %56 = vector.broadcast %25 : vector<1x128xf32> to vector<2x128xf32>
    %57 = arith.addf %55, %56 : vector<2x128xf32>
    %58 = tpu.iota {dimensions = array<i32: 1>} : vector<2x128xi32>
    %c64_i32_16 = arith.constant 64 : i32
    %59 = vector.broadcast %c64_i32_16 : i32 to vector<2x128xi32>
    %60 = arith.cmpi sge, %58, %59 : vector<2x128xi32>
    %c96_i32_17 = arith.constant 96 : i32
    %61 = vector.broadcast %c96_i32_17 : i32 to vector<2x128xi32>
    %62 = arith.cmpi slt, %58, %61 : vector<2x128xi32>
    %63 = arith.andi %60, %62 : vector<2x128xi1>
    %64 = math.tanh %57 : vector<2x128xf32>
    %65 = arith.negf %57 : vector<2x128xf32>
    %66 = math.exp %65 : vector<2x128xf32>
    %cst_18 = arith.constant 1.000000e+00 : f32
    %67 = vector.broadcast %cst_18 : f32 to vector<2x128xf32>
    %68 = arith.addf %67, %66 : vector<2x128xf32>
    %69 = arith.divf %67, %68 : vector<2x128xf32>
    %70 = arith.select %63, %64, %69 : vector<2x128xi1>, vector<2x128xf32>
    %71 = vector.extract_strided_slice %70 {offsets = [0, 0], sizes = [2, 32], strides = [1, 1]} : vector<2x128xf32> to vector<2x32xf32>
    %72 = vector.extract_strided_slice %70 {offsets = [0, 32], sizes = [2, 32], strides = [1, 1]} : vector<2x128xf32> to vector<2x32xf32>
    %73 = vector.extract_strided_slice %70 {offsets = [0, 64], sizes = [2, 32], strides = [1, 1]} : vector<2x128xf32> to vector<2x32xf32>
    %74 = vector.extract_strided_slice %70 {offsets = [0, 96], sizes = [2, 32], strides = [1, 1]} : vector<2x128xf32> to vector<2x32xf32>
    %75 = arith.mulf %72, %51 : vector<2x32xf32>
    %76 = arith.mulf %71, %73 : vector<2x32xf32>
    %77 = arith.addf %75, %76 : vector<2x32xf32>
    %78 = math.tanh %77 : vector<2x32xf32>
    %79 = arith.mulf %74, %78 : vector<2x32xf32>
    %cst_19 = arith.constant dense<0.000000e+00> : vector<2x128xf32>
    %80 = tpu.matmul %79, %24, %cst_19 {dimension_numbers = #tpu.dot_dimension_numbers<[1], [0], [0], [1], [0, 0, 1, 1], [], []>} : vector<2x32xf32>, vector<32x128xf32>, vector<2x128xf32> -> vector<2x128xf32>
    %81 = arith.addf %13, %80 : vector<2x128xf32>
    %82 = vector.broadcast %25 : vector<1x128xf32> to vector<2x128xf32>
    %83 = arith.addf %81, %82 : vector<2x128xf32>
    %84 = tpu.iota {dimensions = array<i32: 1>} : vector<2x128xi32>
    %c64_i32_20 = arith.constant 64 : i32
    %85 = vector.broadcast %c64_i32_20 : i32 to vector<2x128xi32>
    %86 = arith.cmpi sge, %84, %85 : vector<2x128xi32>
    %c96_i32_21 = arith.constant 96 : i32
    %87 = vector.broadcast %c96_i32_21 : i32 to vector<2x128xi32>
    %88 = arith.cmpi slt, %84, %87 : vector<2x128xi32>
    %89 = arith.andi %86, %88 : vector<2x128xi1>
    %90 = math.tanh %83 : vector<2x128xf32>
    %91 = arith.negf %83 : vector<2x128xf32>
    %92 = math.exp %91 : vector<2x128xf32>
    %cst_22 = arith.constant 1.000000e+00 : f32
    %93 = vector.broadcast %cst_22 : f32 to vector<2x128xf32>
    %94 = arith.addf %93, %92 : vector<2x128xf32>
    %95 = arith.divf %93, %94 : vector<2x128xf32>
    %96 = arith.select %89, %90, %95 : vector<2x128xi1>, vector<2x128xf32>
    %97 = vector.extract_strided_slice %96 {offsets = [0, 0], sizes = [2, 32], strides = [1, 1]} : vector<2x128xf32> to vector<2x32xf32>
    %98 = vector.extract_strided_slice %96 {offsets = [0, 32], sizes = [2, 32], strides = [1, 1]} : vector<2x128xf32> to vector<2x32xf32>
    %99 = vector.extract_strided_slice %96 {offsets = [0, 64], sizes = [2, 32], strides = [1, 1]} : vector<2x128xf32> to vector<2x32xf32>
    %100 = vector.extract_strided_slice %96 {offsets = [0, 96], sizes = [2, 32], strides = [1, 1]} : vector<2x128xf32> to vector<2x32xf32>
    %101 = arith.mulf %98, %77 : vector<2x32xf32>
    %102 = arith.mulf %97, %99 : vector<2x32xf32>
    %103 = arith.addf %101, %102 : vector<2x32xf32>
    %104 = math.tanh %103 : vector<2x32xf32>
    %105 = arith.mulf %100, %104 : vector<2x32xf32>
    %cst_23 = arith.constant dense<0.000000e+00> : vector<2x128xf32>
    %106 = tpu.matmul %105, %24, %cst_23 {dimension_numbers = #tpu.dot_dimension_numbers<[1], [0], [0], [1], [0, 0, 1, 1], [], []>} : vector<2x32xf32>, vector<32x128xf32>, vector<2x128xf32> -> vector<2x128xf32>
    %107 = arith.addf %15, %106 : vector<2x128xf32>
    %108 = vector.broadcast %25 : vector<1x128xf32> to vector<2x128xf32>
    %109 = arith.addf %107, %108 : vector<2x128xf32>
    %110 = tpu.iota {dimensions = array<i32: 1>} : vector<2x128xi32>
    %c64_i32_24 = arith.constant 64 : i32
    %111 = vector.broadcast %c64_i32_24 : i32 to vector<2x128xi32>
    %112 = arith.cmpi sge, %110, %111 : vector<2x128xi32>
    %c96_i32_25 = arith.constant 96 : i32
    %113 = vector.broadcast %c96_i32_25 : i32 to vector<2x128xi32>
    %114 = arith.cmpi slt, %110, %113 : vector<2x128xi32>
    %115 = arith.andi %112, %114 : vector<2x128xi1>
    %116 = math.tanh %109 : vector<2x128xf32>
    %117 = arith.negf %109 : vector<2x128xf32>
    %118 = math.exp %117 : vector<2x128xf32>
    %cst_26 = arith.constant 1.000000e+00 : f32
    %119 = vector.broadcast %cst_26 : f32 to vector<2x128xf32>
    %120 = arith.addf %119, %118 : vector<2x128xf32>
    %121 = arith.divf %119, %120 : vector<2x128xf32>
    %122 = arith.select %115, %116, %121 : vector<2x128xi1>, vector<2x128xf32>
    %123 = vector.extract_strided_slice %122 {offsets = [0, 0], sizes = [2, 32], strides = [1, 1]} : vector<2x128xf32> to vector<2x32xf32>
    %124 = vector.extract_strided_slice %122 {offsets = [0, 32], sizes = [2, 32], strides = [1, 1]} : vector<2x128xf32> to vector<2x32xf32>
    %125 = vector.extract_strided_slice %122 {offsets = [0, 64], sizes = [2, 32], strides = [1, 1]} : vector<2x128xf32> to vector<2x32xf32>
    %126 = vector.extract_strided_slice %122 {offsets = [0, 96], sizes = [2, 32], strides = [1, 1]} : vector<2x128xf32> to vector<2x32xf32>
    %127 = arith.mulf %124, %103 : vector<2x32xf32>
    %128 = arith.mulf %123, %125 : vector<2x32xf32>
    %129 = arith.addf %127, %128 : vector<2x32xf32>
    %130 = math.tanh %129 : vector<2x32xf32>
    %131 = arith.mulf %126, %130 : vector<2x32xf32>
    %cst_27 = arith.constant dense<0.000000e+00> : vector<2x128xf32>
    %132 = tpu.matmul %131, %24, %cst_27 {dimension_numbers = #tpu.dot_dimension_numbers<[1], [0], [0], [1], [0, 0, 1, 1], [], []>} : vector<2x32xf32>, vector<32x128xf32>, vector<2x128xf32> -> vector<2x128xf32>
    %133 = arith.addf %17, %132 : vector<2x128xf32>
    %134 = vector.broadcast %25 : vector<1x128xf32> to vector<2x128xf32>
    %135 = arith.addf %133, %134 : vector<2x128xf32>
    %136 = tpu.iota {dimensions = array<i32: 1>} : vector<2x128xi32>
    %c64_i32_28 = arith.constant 64 : i32
    %137 = vector.broadcast %c64_i32_28 : i32 to vector<2x128xi32>
    %138 = arith.cmpi sge, %136, %137 : vector<2x128xi32>
    %c96_i32_29 = arith.constant 96 : i32
    %139 = vector.broadcast %c96_i32_29 : i32 to vector<2x128xi32>
    %140 = arith.cmpi slt, %136, %139 : vector<2x128xi32>
    %141 = arith.andi %138, %140 : vector<2x128xi1>
    %142 = math.tanh %135 : vector<2x128xf32>
    %143 = arith.negf %135 : vector<2x128xf32>
    %144 = math.exp %143 : vector<2x128xf32>
    %cst_30 = arith.constant 1.000000e+00 : f32
    %145 = vector.broadcast %cst_30 : f32 to vector<2x128xf32>
    %146 = arith.addf %145, %144 : vector<2x128xf32>
    %147 = arith.divf %145, %146 : vector<2x128xf32>
    %148 = arith.select %141, %142, %147 : vector<2x128xi1>, vector<2x128xf32>
    %149 = vector.extract_strided_slice %148 {offsets = [0, 0], sizes = [2, 32], strides = [1, 1]} : vector<2x128xf32> to vector<2x32xf32>
    %150 = vector.extract_strided_slice %148 {offsets = [0, 32], sizes = [2, 32], strides = [1, 1]} : vector<2x128xf32> to vector<2x32xf32>
    %151 = vector.extract_strided_slice %148 {offsets = [0, 64], sizes = [2, 32], strides = [1, 1]} : vector<2x128xf32> to vector<2x32xf32>
    %152 = vector.extract_strided_slice %148 {offsets = [0, 96], sizes = [2, 32], strides = [1, 1]} : vector<2x128xf32> to vector<2x32xf32>
    %153 = arith.mulf %150, %129 : vector<2x32xf32>
    %154 = arith.mulf %149, %151 : vector<2x32xf32>
    %155 = arith.addf %153, %154 : vector<2x32xf32>
    %156 = math.tanh %155 : vector<2x32xf32>
    %157 = arith.mulf %152, %156 : vector<2x32xf32>
    %cst_31 = arith.constant dense<0.000000e+00> : vector<2x128xf32>
    %158 = tpu.matmul %157, %24, %cst_31 {dimension_numbers = #tpu.dot_dimension_numbers<[1], [0], [0], [1], [0, 0, 1, 1], [], []>} : vector<2x32xf32>, vector<32x128xf32>, vector<2x128xf32> -> vector<2x128xf32>
    %159 = arith.addf %19, %158 : vector<2x128xf32>
    %160 = vector.broadcast %25 : vector<1x128xf32> to vector<2x128xf32>
    %161 = arith.addf %159, %160 : vector<2x128xf32>
    %162 = tpu.iota {dimensions = array<i32: 1>} : vector<2x128xi32>
    %c64_i32_32 = arith.constant 64 : i32
    %163 = vector.broadcast %c64_i32_32 : i32 to vector<2x128xi32>
    %164 = arith.cmpi sge, %162, %163 : vector<2x128xi32>
    %c96_i32_33 = arith.constant 96 : i32
    %165 = vector.broadcast %c96_i32_33 : i32 to vector<2x128xi32>
    %166 = arith.cmpi slt, %162, %165 : vector<2x128xi32>
    %167 = arith.andi %164, %166 : vector<2x128xi1>
    %168 = math.tanh %161 : vector<2x128xf32>
    %169 = arith.negf %161 : vector<2x128xf32>
    %170 = math.exp %169 : vector<2x128xf32>
    %cst_34 = arith.constant 1.000000e+00 : f32
    %171 = vector.broadcast %cst_34 : f32 to vector<2x128xf32>
    %172 = arith.addf %171, %170 : vector<2x128xf32>
    %173 = arith.divf %171, %172 : vector<2x128xf32>
    %174 = arith.select %167, %168, %173 : vector<2x128xi1>, vector<2x128xf32>
    %175 = vector.extract_strided_slice %174 {offsets = [0, 0], sizes = [2, 32], strides = [1, 1]} : vector<2x128xf32> to vector<2x32xf32>
    %176 = vector.extract_strided_slice %174 {offsets = [0, 32], sizes = [2, 32], strides = [1, 1]} : vector<2x128xf32> to vector<2x32xf32>
    %177 = vector.extract_strided_slice %174 {offsets = [0, 64], sizes = [2, 32], strides = [1, 1]} : vector<2x128xf32> to vector<2x32xf32>
    %178 = vector.extract_strided_slice %174 {offsets = [0, 96], sizes = [2, 32], strides = [1, 1]} : vector<2x128xf32> to vector<2x32xf32>
    %179 = arith.mulf %176, %155 : vector<2x32xf32>
    %180 = arith.mulf %175, %177 : vector<2x32xf32>
    %181 = arith.addf %179, %180 : vector<2x32xf32>
    %182 = math.tanh %181 : vector<2x32xf32>
    %183 = arith.mulf %178, %182 : vector<2x32xf32>
    %cst_35 = arith.constant dense<0.000000e+00> : vector<2x128xf32>
    %184 = tpu.matmul %183, %24, %cst_35 {dimension_numbers = #tpu.dot_dimension_numbers<[1], [0], [0], [1], [0, 0, 1, 1], [], []>} : vector<2x32xf32>, vector<32x128xf32>, vector<2x128xf32> -> vector<2x128xf32>
    %185 = arith.addf %21, %184 : vector<2x128xf32>
    %186 = vector.broadcast %25 : vector<1x128xf32> to vector<2x128xf32>
    %187 = arith.addf %185, %186 : vector<2x128xf32>
    %188 = tpu.iota {dimensions = array<i32: 1>} : vector<2x128xi32>
    %c64_i32_36 = arith.constant 64 : i32
    %189 = vector.broadcast %c64_i32_36 : i32 to vector<2x128xi32>
    %190 = arith.cmpi sge, %188, %189 : vector<2x128xi32>
    %c96_i32_37 = arith.constant 96 : i32
    %191 = vector.broadcast %c96_i32_37 : i32 to vector<2x128xi32>
    %192 = arith.cmpi slt, %188, %191 : vector<2x128xi32>
    %193 = arith.andi %190, %192 : vector<2x128xi1>
    %194 = math.tanh %187 : vector<2x128xf32>
    %195 = arith.negf %187 : vector<2x128xf32>
    %196 = math.exp %195 : vector<2x128xf32>
    %cst_38 = arith.constant 1.000000e+00 : f32
    %197 = vector.broadcast %cst_38 : f32 to vector<2x128xf32>
    %198 = arith.addf %197, %196 : vector<2x128xf32>
    %199 = arith.divf %197, %198 : vector<2x128xf32>
    %200 = arith.select %193, %194, %199 : vector<2x128xi1>, vector<2x128xf32>
    %201 = vector.extract_strided_slice %200 {offsets = [0, 0], sizes = [2, 32], strides = [1, 1]} : vector<2x128xf32> to vector<2x32xf32>
    %202 = vector.extract_strided_slice %200 {offsets = [0, 32], sizes = [2, 32], strides = [1, 1]} : vector<2x128xf32> to vector<2x32xf32>
    %203 = vector.extract_strided_slice %200 {offsets = [0, 64], sizes = [2, 32], strides = [1, 1]} : vector<2x128xf32> to vector<2x32xf32>
    %204 = vector.extract_strided_slice %200 {offsets = [0, 96], sizes = [2, 32], strides = [1, 1]} : vector<2x128xf32> to vector<2x32xf32>
    %205 = arith.mulf %202, %181 : vector<2x32xf32>
    %206 = arith.mulf %201, %203 : vector<2x32xf32>
    %207 = arith.addf %205, %206 : vector<2x32xf32>
    %208 = math.tanh %207 : vector<2x32xf32>
    %209 = arith.mulf %204, %208 : vector<2x32xf32>
    %cst_39 = arith.constant dense<0.000000e+00> : vector<2x128xf32>
    %210 = tpu.matmul %209, %24, %cst_39 {dimension_numbers = #tpu.dot_dimension_numbers<[1], [0], [0], [1], [0, 0, 1, 1], [], []>} : vector<2x32xf32>, vector<32x128xf32>, vector<2x128xf32> -> vector<2x128xf32>
    %211 = arith.addf %23, %210 : vector<2x128xf32>
    %212 = vector.broadcast %25 : vector<1x128xf32> to vector<2x128xf32>
    %213 = arith.addf %211, %212 : vector<2x128xf32>
    %214 = tpu.iota {dimensions = array<i32: 1>} : vector<2x128xi32>
    %c64_i32_40 = arith.constant 64 : i32
    %215 = vector.broadcast %c64_i32_40 : i32 to vector<2x128xi32>
    %216 = arith.cmpi sge, %214, %215 : vector<2x128xi32>
    %c96_i32_41 = arith.constant 96 : i32
    %217 = vector.broadcast %c96_i32_41 : i32 to vector<2x128xi32>
    %218 = arith.cmpi slt, %214, %217 : vector<2x128xi32>
    %219 = arith.andi %216, %218 : vector<2x128xi1>
    %220 = math.tanh %213 : vector<2x128xf32>
    %221 = arith.negf %213 : vector<2x128xf32>
    %222 = math.exp %221 : vector<2x128xf32>
    %cst_42 = arith.constant 1.000000e+00 : f32
    %223 = vector.broadcast %cst_42 : f32 to vector<2x128xf32>
    %224 = arith.addf %223, %222 : vector<2x128xf32>
    %225 = arith.divf %223, %224 : vector<2x128xf32>
    %226 = arith.select %219, %220, %225 : vector<2x128xi1>, vector<2x128xf32>
    %227 = vector.extract_strided_slice %226 {offsets = [0, 0], sizes = [2, 32], strides = [1, 1]} : vector<2x128xf32> to vector<2x32xf32>
    %228 = vector.extract_strided_slice %226 {offsets = [0, 32], sizes = [2, 32], strides = [1, 1]} : vector<2x128xf32> to vector<2x32xf32>
    %229 = vector.extract_strided_slice %226 {offsets = [0, 64], sizes = [2, 32], strides = [1, 1]} : vector<2x128xf32> to vector<2x32xf32>
    %230 = vector.extract_strided_slice %226 {offsets = [0, 96], sizes = [2, 32], strides = [1, 1]} : vector<2x128xf32> to vector<2x32xf32>
    %231 = arith.mulf %228, %207 : vector<2x32xf32>
    %232 = arith.mulf %227, %229 : vector<2x32xf32>
    %233 = arith.addf %231, %232 : vector<2x32xf32>
    %234 = math.tanh %233 : vector<2x32xf32>
    %235 = arith.mulf %230, %234 : vector<2x32xf32>
    %236 = vector.extract_strided_slice %7 {offsets = [0, 0, 0], sizes = [2, 1, 128], strides = [1, 1, 1]} : vector<2x8x128xf32> to vector<2x1x128xf32>
    %237 = vector.shape_cast %236 : vector<2x1x128xf32> to vector<2x128xf32>
    %238 = vector.extract_strided_slice %7 {offsets = [0, 1, 0], sizes = [2, 1, 128], strides = [1, 1, 1]} : vector<2x8x128xf32> to vector<2x1x128xf32>
    %239 = vector.shape_cast %238 : vector<2x1x128xf32> to vector<2x128xf32>
    %240 = vector.extract_strided_slice %7 {offsets = [0, 2, 0], sizes = [2, 1, 128], strides = [1, 1, 1]} : vector<2x8x128xf32> to vector<2x1x128xf32>
    %241 = vector.shape_cast %240 : vector<2x1x128xf32> to vector<2x128xf32>
    %242 = vector.extract_strided_slice %7 {offsets = [0, 3, 0], sizes = [2, 1, 128], strides = [1, 1, 1]} : vector<2x8x128xf32> to vector<2x1x128xf32>
    %243 = vector.shape_cast %242 : vector<2x1x128xf32> to vector<2x128xf32>
    %244 = vector.extract_strided_slice %7 {offsets = [0, 4, 0], sizes = [2, 1, 128], strides = [1, 1, 1]} : vector<2x8x128xf32> to vector<2x1x128xf32>
    %245 = vector.shape_cast %244 : vector<2x1x128xf32> to vector<2x128xf32>
    %246 = vector.extract_strided_slice %7 {offsets = [0, 5, 0], sizes = [2, 1, 128], strides = [1, 1, 1]} : vector<2x8x128xf32> to vector<2x1x128xf32>
    %247 = vector.shape_cast %246 : vector<2x1x128xf32> to vector<2x128xf32>
    %248 = vector.extract_strided_slice %7 {offsets = [0, 6, 0], sizes = [2, 1, 128], strides = [1, 1, 1]} : vector<2x8x128xf32> to vector<2x1x128xf32>
    %249 = vector.shape_cast %248 : vector<2x1x128xf32> to vector<2x128xf32>
    %250 = vector.extract_strided_slice %7 {offsets = [0, 7, 0], sizes = [2, 1, 128], strides = [1, 1, 1]} : vector<2x8x128xf32> to vector<2x1x128xf32>
    %251 = vector.shape_cast %250 : vector<2x1x128xf32> to vector<2x128xf32>
    %c0_43 = arith.constant 0 : index
    %c0_44 = arith.constant 0 : index
    %252 = vector.load %arg5[%c0_43, %c0_44] : memref<32x128xf32, #tpu.memory_space<vmem>>, vector<32x128xf32>
    %c0_45 = arith.constant 0 : index
    %c0_46 = arith.constant 0 : index
    %253 = vector.load %arg6[%c0_45, %c0_46] : memref<1x128xf32, #tpu.memory_space<vmem>>, vector<1x128xf32>
    %cst_47 = arith.constant 0.000000e+00 : f32
    %254 = vector.broadcast %cst_47 : f32 to vector<2x32xf32>
    %cst_48 = arith.constant 0.000000e+00 : f32
    %255 = vector.broadcast %cst_48 : f32 to vector<2x32xf32>
    %cst_49 = arith.constant dense<0.000000e+00> : vector<2x128xf32>
    %256 = tpu.matmul %254, %252, %cst_49 {dimension_numbers = #tpu.dot_dimension_numbers<[1], [0], [0], [1], [0, 0, 1, 1], [], []>} : vector<2x32xf32>, vector<32x128xf32>, vector<2x128xf32> -> vector<2x128xf32>
    %257 = arith.addf %251, %256 : vector<2x128xf32>
    %258 = vector.broadcast %253 : vector<1x128xf32> to vector<2x128xf32>
    %259 = arith.addf %257, %258 : vector<2x128xf32>
    %260 = tpu.iota {dimensions = array<i32: 1>} : vector<2x128xi32>
    %c64_i32_50 = arith.constant 64 : i32
    %261 = vector.broadcast %c64_i32_50 : i32 to vector<2x128xi32>
    %262 = arith.cmpi sge, %260, %261 : vector<2x128xi32>
    %c96_i32_51 = arith.constant 96 : i32
    %263 = vector.broadcast %c96_i32_51 : i32 to vector<2x128xi32>
    %264 = arith.cmpi slt, %260, %263 : vector<2x128xi32>
    %265 = arith.andi %262, %264 : vector<2x128xi1>
    %266 = math.tanh %259 : vector<2x128xf32>
    %267 = arith.negf %259 : vector<2x128xf32>
    %268 = math.exp %267 : vector<2x128xf32>
    %cst_52 = arith.constant 1.000000e+00 : f32
    %269 = vector.broadcast %cst_52 : f32 to vector<2x128xf32>
    %270 = arith.addf %269, %268 : vector<2x128xf32>
    %271 = arith.divf %269, %270 : vector<2x128xf32>
    %272 = arith.select %265, %266, %271 : vector<2x128xi1>, vector<2x128xf32>
    %273 = vector.extract_strided_slice %272 {offsets = [0, 0], sizes = [2, 32], strides = [1, 1]} : vector<2x128xf32> to vector<2x32xf32>
    %274 = vector.extract_strided_slice %272 {offsets = [0, 32], sizes = [2, 32], strides = [1, 1]} : vector<2x128xf32> to vector<2x32xf32>
    %275 = vector.extract_strided_slice %272 {offsets = [0, 64], sizes = [2, 32], strides = [1, 1]} : vector<2x128xf32> to vector<2x32xf32>
    %276 = vector.extract_strided_slice %272 {offsets = [0, 96], sizes = [2, 32], strides = [1, 1]} : vector<2x128xf32> to vector<2x32xf32>
    %277 = arith.mulf %274, %255 : vector<2x32xf32>
    %278 = arith.mulf %273, %275 : vector<2x32xf32>
    %279 = arith.addf %277, %278 : vector<2x32xf32>
    %280 = math.tanh %279 : vector<2x32xf32>
    %281 = arith.mulf %276, %280 : vector<2x32xf32>
    %cst_53 = arith.constant dense<0.000000e+00> : vector<2x128xf32>
    %282 = tpu.matmul %281, %252, %cst_53 {dimension_numbers = #tpu.dot_dimension_numbers<[1], [0], [0], [1], [0, 0, 1, 1], [], []>} : vector<2x32xf32>, vector<32x128xf32>, vector<2x128xf32> -> vector<2x128xf32>
    %283 = arith.addf %249, %282 : vector<2x128xf32>
    %284 = vector.broadcast %253 : vector<1x128xf32> to vector<2x128xf32>
    %285 = arith.addf %283, %284 : vector<2x128xf32>
    %286 = tpu.iota {dimensions = array<i32: 1>} : vector<2x128xi32>
    %c64_i32_54 = arith.constant 64 : i32
    %287 = vector.broadcast %c64_i32_54 : i32 to vector<2x128xi32>
    %288 = arith.cmpi sge, %286, %287 : vector<2x128xi32>
    %c96_i32_55 = arith.constant 96 : i32
    %289 = vector.broadcast %c96_i32_55 : i32 to vector<2x128xi32>
    %290 = arith.cmpi slt, %286, %289 : vector<2x128xi32>
    %291 = arith.andi %288, %290 : vector<2x128xi1>
    %292 = math.tanh %285 : vector<2x128xf32>
    %293 = arith.negf %285 : vector<2x128xf32>
    %294 = math.exp %293 : vector<2x128xf32>
    %cst_56 = arith.constant 1.000000e+00 : f32
    %295 = vector.broadcast %cst_56 : f32 to vector<2x128xf32>
    %296 = arith.addf %295, %294 : vector<2x128xf32>
    %297 = arith.divf %295, %296 : vector<2x128xf32>
    %298 = arith.select %291, %292, %297 : vector<2x128xi1>, vector<2x128xf32>
    %299 = vector.extract_strided_slice %298 {offsets = [0, 0], sizes = [2, 32], strides = [1, 1]} : vector<2x128xf32> to vector<2x32xf32>
    %300 = vector.extract_strided_slice %298 {offsets = [0, 32], sizes = [2, 32], strides = [1, 1]} : vector<2x128xf32> to vector<2x32xf32>
    %301 = vector.extract_strided_slice %298 {offsets = [0, 64], sizes = [2, 32], strides = [1, 1]} : vector<2x128xf32> to vector<2x32xf32>
    %302 = vector.extract_strided_slice %298 {offsets = [0, 96], sizes = [2, 32], strides = [1, 1]} : vector<2x128xf32> to vector<2x32xf32>
    %303 = arith.mulf %300, %279 : vector<2x32xf32>
    %304 = arith.mulf %299, %301 : vector<2x32xf32>
    %305 = arith.addf %303, %304 : vector<2x32xf32>
    %306 = math.tanh %305 : vector<2x32xf32>
    %307 = arith.mulf %302, %306 : vector<2x32xf32>
    %cst_57 = arith.constant dense<0.000000e+00> : vector<2x128xf32>
    %308 = tpu.matmul %307, %252, %cst_57 {dimension_numbers = #tpu.dot_dimension_numbers<[1], [0], [0], [1], [0, 0, 1, 1], [], []>} : vector<2x32xf32>, vector<32x128xf32>, vector<2x128xf32> -> vector<2x128xf32>
    %309 = arith.addf %247, %308 : vector<2x128xf32>
    %310 = vector.broadcast %253 : vector<1x128xf32> to vector<2x128xf32>
    %311 = arith.addf %309, %310 : vector<2x128xf32>
    %312 = tpu.iota {dimensions = array<i32: 1>} : vector<2x128xi32>
    %c64_i32_58 = arith.constant 64 : i32
    %313 = vector.broadcast %c64_i32_58 : i32 to vector<2x128xi32>
    %314 = arith.cmpi sge, %312, %313 : vector<2x128xi32>
    %c96_i32_59 = arith.constant 96 : i32
    %315 = vector.broadcast %c96_i32_59 : i32 to vector<2x128xi32>
    %316 = arith.cmpi slt, %312, %315 : vector<2x128xi32>
    %317 = arith.andi %314, %316 : vector<2x128xi1>
    %318 = math.tanh %311 : vector<2x128xf32>
    %319 = arith.negf %311 : vector<2x128xf32>
    %320 = math.exp %319 : vector<2x128xf32>
    %cst_60 = arith.constant 1.000000e+00 : f32
    %321 = vector.broadcast %cst_60 : f32 to vector<2x128xf32>
    %322 = arith.addf %321, %320 : vector<2x128xf32>
    %323 = arith.divf %321, %322 : vector<2x128xf32>
    %324 = arith.select %317, %318, %323 : vector<2x128xi1>, vector<2x128xf32>
    %325 = vector.extract_strided_slice %324 {offsets = [0, 0], sizes = [2, 32], strides = [1, 1]} : vector<2x128xf32> to vector<2x32xf32>
    %326 = vector.extract_strided_slice %324 {offsets = [0, 32], sizes = [2, 32], strides = [1, 1]} : vector<2x128xf32> to vector<2x32xf32>
    %327 = vector.extract_strided_slice %324 {offsets = [0, 64], sizes = [2, 32], strides = [1, 1]} : vector<2x128xf32> to vector<2x32xf32>
    %328 = vector.extract_strided_slice %324 {offsets = [0, 96], sizes = [2, 32], strides = [1, 1]} : vector<2x128xf32> to vector<2x32xf32>
    %329 = arith.mulf %326, %305 : vector<2x32xf32>
    %330 = arith.mulf %325, %327 : vector<2x32xf32>
    %331 = arith.addf %329, %330 : vector<2x32xf32>
    %332 = math.tanh %331 : vector<2x32xf32>
    %333 = arith.mulf %328, %332 : vector<2x32xf32>
    %cst_61 = arith.constant dense<0.000000e+00> : vector<2x128xf32>
    %334 = tpu.matmul %333, %252, %cst_61 {dimension_numbers = #tpu.dot_dimension_numbers<[1], [0], [0], [1], [0, 0, 1, 1], [], []>} : vector<2x32xf32>, vector<32x128xf32>, vector<2x128xf32> -> vector<2x128xf32>
    %335 = arith.addf %245, %334 : vector<2x128xf32>
    %336 = vector.broadcast %253 : vector<1x128xf32> to vector<2x128xf32>
    %337 = arith.addf %335, %336 : vector<2x128xf32>
    %338 = tpu.iota {dimensions = array<i32: 1>} : vector<2x128xi32>
    %c64_i32_62 = arith.constant 64 : i32
    %339 = vector.broadcast %c64_i32_62 : i32 to vector<2x128xi32>
    %340 = arith.cmpi sge, %338, %339 : vector<2x128xi32>
    %c96_i32_63 = arith.constant 96 : i32
    %341 = vector.broadcast %c96_i32_63 : i32 to vector<2x128xi32>
    %342 = arith.cmpi slt, %338, %341 : vector<2x128xi32>
    %343 = arith.andi %340, %342 : vector<2x128xi1>
    %344 = math.tanh %337 : vector<2x128xf32>
    %345 = arith.negf %337 : vector<2x128xf32>
    %346 = math.exp %345 : vector<2x128xf32>
    %cst_64 = arith.constant 1.000000e+00 : f32
    %347 = vector.broadcast %cst_64 : f32 to vector<2x128xf32>
    %348 = arith.addf %347, %346 : vector<2x128xf32>
    %349 = arith.divf %347, %348 : vector<2x128xf32>
    %350 = arith.select %343, %344, %349 : vector<2x128xi1>, vector<2x128xf32>
    %351 = vector.extract_strided_slice %350 {offsets = [0, 0], sizes = [2, 32], strides = [1, 1]} : vector<2x128xf32> to vector<2x32xf32>
    %352 = vector.extract_strided_slice %350 {offsets = [0, 32], sizes = [2, 32], strides = [1, 1]} : vector<2x128xf32> to vector<2x32xf32>
    %353 = vector.extract_strided_slice %350 {offsets = [0, 64], sizes = [2, 32], strides = [1, 1]} : vector<2x128xf32> to vector<2x32xf32>
    %354 = vector.extract_strided_slice %350 {offsets = [0, 96], sizes = [2, 32], strides = [1, 1]} : vector<2x128xf32> to vector<2x32xf32>
    %355 = arith.mulf %352, %331 : vector<2x32xf32>
    %356 = arith.mulf %351, %353 : vector<2x32xf32>
    %357 = arith.addf %355, %356 : vector<2x32xf32>
    %358 = math.tanh %357 : vector<2x32xf32>
    %359 = arith.mulf %354, %358 : vector<2x32xf32>
    %cst_65 = arith.constant dense<0.000000e+00> : vector<2x128xf32>
    %360 = tpu.matmul %359, %252, %cst_65 {dimension_numbers = #tpu.dot_dimension_numbers<[1], [0], [0], [1], [0, 0, 1, 1], [], []>} : vector<2x32xf32>, vector<32x128xf32>, vector<2x128xf32> -> vector<2x128xf32>
    %361 = arith.addf %243, %360 : vector<2x128xf32>
    %362 = vector.broadcast %253 : vector<1x128xf32> to vector<2x128xf32>
    %363 = arith.addf %361, %362 : vector<2x128xf32>
    %364 = tpu.iota {dimensions = array<i32: 1>} : vector<2x128xi32>
    %c64_i32_66 = arith.constant 64 : i32
    %365 = vector.broadcast %c64_i32_66 : i32 to vector<2x128xi32>
    %366 = arith.cmpi sge, %364, %365 : vector<2x128xi32>
    %c96_i32_67 = arith.constant 96 : i32
    %367 = vector.broadcast %c96_i32_67 : i32 to vector<2x128xi32>
    %368 = arith.cmpi slt, %364, %367 : vector<2x128xi32>
    %369 = arith.andi %366, %368 : vector<2x128xi1>
    %370 = math.tanh %363 : vector<2x128xf32>
    %371 = arith.negf %363 : vector<2x128xf32>
    %372 = math.exp %371 : vector<2x128xf32>
    %cst_68 = arith.constant 1.000000e+00 : f32
    %373 = vector.broadcast %cst_68 : f32 to vector<2x128xf32>
    %374 = arith.addf %373, %372 : vector<2x128xf32>
    %375 = arith.divf %373, %374 : vector<2x128xf32>
    %376 = arith.select %369, %370, %375 : vector<2x128xi1>, vector<2x128xf32>
    %377 = vector.extract_strided_slice %376 {offsets = [0, 0], sizes = [2, 32], strides = [1, 1]} : vector<2x128xf32> to vector<2x32xf32>
    %378 = vector.extract_strided_slice %376 {offsets = [0, 32], sizes = [2, 32], strides = [1, 1]} : vector<2x128xf32> to vector<2x32xf32>
    %379 = vector.extract_strided_slice %376 {offsets = [0, 64], sizes = [2, 32], strides = [1, 1]} : vector<2x128xf32> to vector<2x32xf32>
    %380 = vector.extract_strided_slice %376 {offsets = [0, 96], sizes = [2, 32], strides = [1, 1]} : vector<2x128xf32> to vector<2x32xf32>
    %381 = arith.mulf %378, %357 : vector<2x32xf32>
    %382 = arith.mulf %377, %379 : vector<2x32xf32>
    %383 = arith.addf %381, %382 : vector<2x32xf32>
    %384 = math.tanh %383 : vector<2x32xf32>
    %385 = arith.mulf %380, %384 : vector<2x32xf32>
    %cst_69 = arith.constant dense<0.000000e+00> : vector<2x128xf32>
    %386 = tpu.matmul %385, %252, %cst_69 {dimension_numbers = #tpu.dot_dimension_numbers<[1], [0], [0], [1], [0, 0, 1, 1], [], []>} : vector<2x32xf32>, vector<32x128xf32>, vector<2x128xf32> -> vector<2x128xf32>
    %387 = arith.addf %241, %386 : vector<2x128xf32>
    %388 = vector.broadcast %253 : vector<1x128xf32> to vector<2x128xf32>
    %389 = arith.addf %387, %388 : vector<2x128xf32>
    %390 = tpu.iota {dimensions = array<i32: 1>} : vector<2x128xi32>
    %c64_i32_70 = arith.constant 64 : i32
    %391 = vector.broadcast %c64_i32_70 : i32 to vector<2x128xi32>
    %392 = arith.cmpi sge, %390, %391 : vector<2x128xi32>
    %c96_i32_71 = arith.constant 96 : i32
    %393 = vector.broadcast %c96_i32_71 : i32 to vector<2x128xi32>
    %394 = arith.cmpi slt, %390, %393 : vector<2x128xi32>
    %395 = arith.andi %392, %394 : vector<2x128xi1>
    %396 = math.tanh %389 : vector<2x128xf32>
    %397 = arith.negf %389 : vector<2x128xf32>
    %398 = math.exp %397 : vector<2x128xf32>
    %cst_72 = arith.constant 1.000000e+00 : f32
    %399 = vector.broadcast %cst_72 : f32 to vector<2x128xf32>
    %400 = arith.addf %399, %398 : vector<2x128xf32>
    %401 = arith.divf %399, %400 : vector<2x128xf32>
    %402 = arith.select %395, %396, %401 : vector<2x128xi1>, vector<2x128xf32>
    %403 = vector.extract_strided_slice %402 {offsets = [0, 0], sizes = [2, 32], strides = [1, 1]} : vector<2x128xf32> to vector<2x32xf32>
    %404 = vector.extract_strided_slice %402 {offsets = [0, 32], sizes = [2, 32], strides = [1, 1]} : vector<2x128xf32> to vector<2x32xf32>
    %405 = vector.extract_strided_slice %402 {offsets = [0, 64], sizes = [2, 32], strides = [1, 1]} : vector<2x128xf32> to vector<2x32xf32>
    %406 = vector.extract_strided_slice %402 {offsets = [0, 96], sizes = [2, 32], strides = [1, 1]} : vector<2x128xf32> to vector<2x32xf32>
    %407 = arith.mulf %404, %383 : vector<2x32xf32>
    %408 = arith.mulf %403, %405 : vector<2x32xf32>
    %409 = arith.addf %407, %408 : vector<2x32xf32>
    %410 = math.tanh %409 : vector<2x32xf32>
    %411 = arith.mulf %406, %410 : vector<2x32xf32>
    %cst_73 = arith.constant dense<0.000000e+00> : vector<2x128xf32>
    %412 = tpu.matmul %411, %252, %cst_73 {dimension_numbers = #tpu.dot_dimension_numbers<[1], [0], [0], [1], [0, 0, 1, 1], [], []>} : vector<2x32xf32>, vector<32x128xf32>, vector<2x128xf32> -> vector<2x128xf32>
    %413 = arith.addf %239, %412 : vector<2x128xf32>
    %414 = vector.broadcast %253 : vector<1x128xf32> to vector<2x128xf32>
    %415 = arith.addf %413, %414 : vector<2x128xf32>
    %416 = tpu.iota {dimensions = array<i32: 1>} : vector<2x128xi32>
    %c64_i32_74 = arith.constant 64 : i32
    %417 = vector.broadcast %c64_i32_74 : i32 to vector<2x128xi32>
    %418 = arith.cmpi sge, %416, %417 : vector<2x128xi32>
    %c96_i32_75 = arith.constant 96 : i32
    %419 = vector.broadcast %c96_i32_75 : i32 to vector<2x128xi32>
    %420 = arith.cmpi slt, %416, %419 : vector<2x128xi32>
    %421 = arith.andi %418, %420 : vector<2x128xi1>
    %422 = math.tanh %415 : vector<2x128xf32>
    %423 = arith.negf %415 : vector<2x128xf32>
    %424 = math.exp %423 : vector<2x128xf32>
    %cst_76 = arith.constant 1.000000e+00 : f32
    %425 = vector.broadcast %cst_76 : f32 to vector<2x128xf32>
    %426 = arith.addf %425, %424 : vector<2x128xf32>
    %427 = arith.divf %425, %426 : vector<2x128xf32>
    %428 = arith.select %421, %422, %427 : vector<2x128xi1>, vector<2x128xf32>
    %429 = vector.extract_strided_slice %428 {offsets = [0, 0], sizes = [2, 32], strides = [1, 1]} : vector<2x128xf32> to vector<2x32xf32>
    %430 = vector.extract_strided_slice %428 {offsets = [0, 32], sizes = [2, 32], strides = [1, 1]} : vector<2x128xf32> to vector<2x32xf32>
    %431 = vector.extract_strided_slice %428 {offsets = [0, 64], sizes = [2, 32], strides = [1, 1]} : vector<2x128xf32> to vector<2x32xf32>
    %432 = vector.extract_strided_slice %428 {offsets = [0, 96], sizes = [2, 32], strides = [1, 1]} : vector<2x128xf32> to vector<2x32xf32>
    %433 = arith.mulf %430, %409 : vector<2x32xf32>
    %434 = arith.mulf %429, %431 : vector<2x32xf32>
    %435 = arith.addf %433, %434 : vector<2x32xf32>
    %436 = math.tanh %435 : vector<2x32xf32>
    %437 = arith.mulf %432, %436 : vector<2x32xf32>
    %cst_77 = arith.constant dense<0.000000e+00> : vector<2x128xf32>
    %438 = tpu.matmul %437, %252, %cst_77 {dimension_numbers = #tpu.dot_dimension_numbers<[1], [0], [0], [1], [0, 0, 1, 1], [], []>} : vector<2x32xf32>, vector<32x128xf32>, vector<2x128xf32> -> vector<2x128xf32>
    %439 = arith.addf %237, %438 : vector<2x128xf32>
    %440 = vector.broadcast %253 : vector<1x128xf32> to vector<2x128xf32>
    %441 = arith.addf %439, %440 : vector<2x128xf32>
    %442 = tpu.iota {dimensions = array<i32: 1>} : vector<2x128xi32>
    %c64_i32_78 = arith.constant 64 : i32
    %443 = vector.broadcast %c64_i32_78 : i32 to vector<2x128xi32>
    %444 = arith.cmpi sge, %442, %443 : vector<2x128xi32>
    %c96_i32_79 = arith.constant 96 : i32
    %445 = vector.broadcast %c96_i32_79 : i32 to vector<2x128xi32>
    %446 = arith.cmpi slt, %442, %445 : vector<2x128xi32>
    %447 = arith.andi %444, %446 : vector<2x128xi1>
    %448 = math.tanh %441 : vector<2x128xf32>
    %449 = arith.negf %441 : vector<2x128xf32>
    %450 = math.exp %449 : vector<2x128xf32>
    %cst_80 = arith.constant 1.000000e+00 : f32
    %451 = vector.broadcast %cst_80 : f32 to vector<2x128xf32>
    %452 = arith.addf %451, %450 : vector<2x128xf32>
    %453 = arith.divf %451, %452 : vector<2x128xf32>
    %454 = arith.select %447, %448, %453 : vector<2x128xi1>, vector<2x128xf32>
    %455 = vector.extract_strided_slice %454 {offsets = [0, 0], sizes = [2, 32], strides = [1, 1]} : vector<2x128xf32> to vector<2x32xf32>
    %456 = vector.extract_strided_slice %454 {offsets = [0, 32], sizes = [2, 32], strides = [1, 1]} : vector<2x128xf32> to vector<2x32xf32>
    %457 = vector.extract_strided_slice %454 {offsets = [0, 64], sizes = [2, 32], strides = [1, 1]} : vector<2x128xf32> to vector<2x32xf32>
    %458 = vector.extract_strided_slice %454 {offsets = [0, 96], sizes = [2, 32], strides = [1, 1]} : vector<2x128xf32> to vector<2x32xf32>
    %459 = arith.mulf %456, %435 : vector<2x32xf32>
    %460 = arith.mulf %455, %457 : vector<2x32xf32>
    %461 = arith.addf %459, %460 : vector<2x32xf32>
    %462 = math.tanh %461 : vector<2x32xf32>
    %463 = arith.mulf %458, %462 : vector<2x32xf32>
    %464 = tpu.concatenate %53, %79, %105, %131, %157, %183, %209, %235 in 0 : vector<2x32xf32>, vector<2x32xf32>, vector<2x32xf32>, vector<2x32xf32>, vector<2x32xf32>, vector<2x32xf32>, vector<2x32xf32>, vector<2x32xf32> -> vector<16x32xf32>
    %465 = tpu.concatenate %463, %437, %411, %385, %359, %333, %307, %281 in 0 : vector<2x32xf32>, vector<2x32xf32>, vector<2x32xf32>, vector<2x32xf32>, vector<2x32xf32>, vector<2x32xf32>, vector<2x32xf32>, vector<2x32xf32> -> vector<16x32xf32>
    %c0_81 = arith.constant 0 : index
    %c0_82 = arith.constant 0 : index
    %466 = vector.load %arg7[%c0_81, %c0_82] : memref<64x128xf32, #tpu.memory_space<vmem>>, vector<64x128xf32>
    %467 = vector.extract_strided_slice %466 {offsets = [0, 0], sizes = [32, 128], strides = [1, 1]} : vector<64x128xf32> to vector<32x128xf32>
    %cst_83 = arith.constant dense<0.000000e+00> : vector<16x128xf32>
    %468 = tpu.matmul %464, %467, %cst_83 {dimension_numbers = #tpu.dot_dimension_numbers<[1], [0], [0], [1], [0, 0, 1, 1], [], []>} : vector<16x32xf32>, vector<32x128xf32>, vector<16x128xf32> -> vector<16x128xf32>
    %469 = vector.extract_strided_slice %466 {offsets = [32, 0], sizes = [32, 128], strides = [1, 1]} : vector<64x128xf32> to vector<32x128xf32>
    %cst_84 = arith.constant dense<0.000000e+00> : vector<16x128xf32>
    %470 = tpu.matmul %465, %469, %cst_84 {dimension_numbers = #tpu.dot_dimension_numbers<[1], [0], [0], [1], [0, 0, 1, 1], [], []>} : vector<16x32xf32>, vector<32x128xf32>, vector<16x128xf32> -> vector<16x128xf32>
    %471 = arith.addf %468, %470 : vector<16x128xf32>
    %472 = vector.extract_strided_slice %471 {offsets = [0, 0], sizes = [2, 128], strides = [1, 1]} : vector<16x128xf32> to vector<2x128xf32>
    %473 = vector.extract_strided_slice %471 {offsets = [2, 0], sizes = [2, 128], strides = [1, 1]} : vector<16x128xf32> to vector<2x128xf32>
    %474 = vector.extract_strided_slice %471 {offsets = [4, 0], sizes = [2, 128], strides = [1, 1]} : vector<16x128xf32> to vector<2x128xf32>
    %475 = vector.extract_strided_slice %471 {offsets = [6, 0], sizes = [2, 128], strides = [1, 1]} : vector<16x128xf32> to vector<2x128xf32>
    %476 = vector.extract_strided_slice %471 {offsets = [8, 0], sizes = [2, 128], strides = [1, 1]} : vector<16x128xf32> to vector<2x128xf32>
    %477 = vector.extract_strided_slice %471 {offsets = [10, 0], sizes = [2, 128], strides = [1, 1]} : vector<16x128xf32> to vector<2x128xf32>
    %478 = vector.extract_strided_slice %471 {offsets = [12, 0], sizes = [2, 128], strides = [1, 1]} : vector<16x128xf32> to vector<2x128xf32>
    %479 = vector.extract_strided_slice %471 {offsets = [14, 0], sizes = [2, 128], strides = [1, 1]} : vector<16x128xf32> to vector<2x128xf32>
    %c0_85 = arith.constant 0 : index
    %c0_86 = arith.constant 0 : index
    %480 = vector.load %arg8[%c0_85, %c0_86] : memref<32x128xf32, #tpu.memory_space<vmem>>, vector<32x128xf32>
    %c0_87 = arith.constant 0 : index
    %c0_88 = arith.constant 0 : index
    %481 = vector.load %arg9[%c0_87, %c0_88] : memref<1x128xf32, #tpu.memory_space<vmem>>, vector<1x128xf32>
    %cst_89 = arith.constant 0.000000e+00 : f32
    %482 = vector.broadcast %cst_89 : f32 to vector<2x32xf32>
    %cst_90 = arith.constant 0.000000e+00 : f32
    %483 = vector.broadcast %cst_90 : f32 to vector<2x32xf32>
    %cst_91 = arith.constant dense<0.000000e+00> : vector<2x128xf32>
    %484 = tpu.matmul %482, %480, %cst_91 {dimension_numbers = #tpu.dot_dimension_numbers<[1], [0], [0], [1], [0, 0, 1, 1], [], []>} : vector<2x32xf32>, vector<32x128xf32>, vector<2x128xf32> -> vector<2x128xf32>
    %485 = arith.addf %472, %484 : vector<2x128xf32>
    %486 = vector.broadcast %481 : vector<1x128xf32> to vector<2x128xf32>
    %487 = arith.addf %485, %486 : vector<2x128xf32>
    %488 = tpu.iota {dimensions = array<i32: 1>} : vector<2x128xi32>
    %c64_i32_92 = arith.constant 64 : i32
    %489 = vector.broadcast %c64_i32_92 : i32 to vector<2x128xi32>
    %490 = arith.cmpi sge, %488, %489 : vector<2x128xi32>
    %c96_i32_93 = arith.constant 96 : i32
    %491 = vector.broadcast %c96_i32_93 : i32 to vector<2x128xi32>
    %492 = arith.cmpi slt, %488, %491 : vector<2x128xi32>
    %493 = arith.andi %490, %492 : vector<2x128xi1>
    %494 = math.tanh %487 : vector<2x128xf32>
    %495 = arith.negf %487 : vector<2x128xf32>
    %496 = math.exp %495 : vector<2x128xf32>
    %cst_94 = arith.constant 1.000000e+00 : f32
    %497 = vector.broadcast %cst_94 : f32 to vector<2x128xf32>
    %498 = arith.addf %497, %496 : vector<2x128xf32>
    %499 = arith.divf %497, %498 : vector<2x128xf32>
    %500 = arith.select %493, %494, %499 : vector<2x128xi1>, vector<2x128xf32>
    %501 = vector.extract_strided_slice %500 {offsets = [0, 0], sizes = [2, 32], strides = [1, 1]} : vector<2x128xf32> to vector<2x32xf32>
    %502 = vector.extract_strided_slice %500 {offsets = [0, 32], sizes = [2, 32], strides = [1, 1]} : vector<2x128xf32> to vector<2x32xf32>
    %503 = vector.extract_strided_slice %500 {offsets = [0, 64], sizes = [2, 32], strides = [1, 1]} : vector<2x128xf32> to vector<2x32xf32>
    %504 = vector.extract_strided_slice %500 {offsets = [0, 96], sizes = [2, 32], strides = [1, 1]} : vector<2x128xf32> to vector<2x32xf32>
    %505 = arith.mulf %502, %483 : vector<2x32xf32>
    %506 = arith.mulf %501, %503 : vector<2x32xf32>
    %507 = arith.addf %505, %506 : vector<2x32xf32>
    %508 = math.tanh %507 : vector<2x32xf32>
    %509 = arith.mulf %504, %508 : vector<2x32xf32>
    %cst_95 = arith.constant dense<0.000000e+00> : vector<2x128xf32>
    %510 = tpu.matmul %509, %480, %cst_95 {dimension_numbers = #tpu.dot_dimension_numbers<[1], [0], [0], [1], [0, 0, 1, 1], [], []>} : vector<2x32xf32>, vector<32x128xf32>, vector<2x128xf32> -> vector<2x128xf32>
    %511 = arith.addf %473, %510 : vector<2x128xf32>
    %512 = vector.broadcast %481 : vector<1x128xf32> to vector<2x128xf32>
    %513 = arith.addf %511, %512 : vector<2x128xf32>
    %514 = tpu.iota {dimensions = array<i32: 1>} : vector<2x128xi32>
    %c64_i32_96 = arith.constant 64 : i32
    %515 = vector.broadcast %c64_i32_96 : i32 to vector<2x128xi32>
    %516 = arith.cmpi sge, %514, %515 : vector<2x128xi32>
    %c96_i32_97 = arith.constant 96 : i32
    %517 = vector.broadcast %c96_i32_97 : i32 to vector<2x128xi32>
    %518 = arith.cmpi slt, %514, %517 : vector<2x128xi32>
    %519 = arith.andi %516, %518 : vector<2x128xi1>
    %520 = math.tanh %513 : vector<2x128xf32>
    %521 = arith.negf %513 : vector<2x128xf32>
    %522 = math.exp %521 : vector<2x128xf32>
    %cst_98 = arith.constant 1.000000e+00 : f32
    %523 = vector.broadcast %cst_98 : f32 to vector<2x128xf32>
    %524 = arith.addf %523, %522 : vector<2x128xf32>
    %525 = arith.divf %523, %524 : vector<2x128xf32>
    %526 = arith.select %519, %520, %525 : vector<2x128xi1>, vector<2x128xf32>
    %527 = vector.extract_strided_slice %526 {offsets = [0, 0], sizes = [2, 32], strides = [1, 1]} : vector<2x128xf32> to vector<2x32xf32>
    %528 = vector.extract_strided_slice %526 {offsets = [0, 32], sizes = [2, 32], strides = [1, 1]} : vector<2x128xf32> to vector<2x32xf32>
    %529 = vector.extract_strided_slice %526 {offsets = [0, 64], sizes = [2, 32], strides = [1, 1]} : vector<2x128xf32> to vector<2x32xf32>
    %530 = vector.extract_strided_slice %526 {offsets = [0, 96], sizes = [2, 32], strides = [1, 1]} : vector<2x128xf32> to vector<2x32xf32>
    %531 = arith.mulf %528, %507 : vector<2x32xf32>
    %532 = arith.mulf %527, %529 : vector<2x32xf32>
    %533 = arith.addf %531, %532 : vector<2x32xf32>
    %534 = math.tanh %533 : vector<2x32xf32>
    %535 = arith.mulf %530, %534 : vector<2x32xf32>
    %cst_99 = arith.constant dense<0.000000e+00> : vector<2x128xf32>
    %536 = tpu.matmul %535, %480, %cst_99 {dimension_numbers = #tpu.dot_dimension_numbers<[1], [0], [0], [1], [0, 0, 1, 1], [], []>} : vector<2x32xf32>, vector<32x128xf32>, vector<2x128xf32> -> vector<2x128xf32>
    %537 = arith.addf %474, %536 : vector<2x128xf32>
    %538 = vector.broadcast %481 : vector<1x128xf32> to vector<2x128xf32>
    %539 = arith.addf %537, %538 : vector<2x128xf32>
    %540 = tpu.iota {dimensions = array<i32: 1>} : vector<2x128xi32>
    %c64_i32_100 = arith.constant 64 : i32
    %541 = vector.broadcast %c64_i32_100 : i32 to vector<2x128xi32>
    %542 = arith.cmpi sge, %540, %541 : vector<2x128xi32>
    %c96_i32_101 = arith.constant 96 : i32
    %543 = vector.broadcast %c96_i32_101 : i32 to vector<2x128xi32>
    %544 = arith.cmpi slt, %540, %543 : vector<2x128xi32>
    %545 = arith.andi %542, %544 : vector<2x128xi1>
    %546 = math.tanh %539 : vector<2x128xf32>
    %547 = arith.negf %539 : vector<2x128xf32>
    %548 = math.exp %547 : vector<2x128xf32>
    %cst_102 = arith.constant 1.000000e+00 : f32
    %549 = vector.broadcast %cst_102 : f32 to vector<2x128xf32>
    %550 = arith.addf %549, %548 : vector<2x128xf32>
    %551 = arith.divf %549, %550 : vector<2x128xf32>
    %552 = arith.select %545, %546, %551 : vector<2x128xi1>, vector<2x128xf32>
    %553 = vector.extract_strided_slice %552 {offsets = [0, 0], sizes = [2, 32], strides = [1, 1]} : vector<2x128xf32> to vector<2x32xf32>
    %554 = vector.extract_strided_slice %552 {offsets = [0, 32], sizes = [2, 32], strides = [1, 1]} : vector<2x128xf32> to vector<2x32xf32>
    %555 = vector.extract_strided_slice %552 {offsets = [0, 64], sizes = [2, 32], strides = [1, 1]} : vector<2x128xf32> to vector<2x32xf32>
    %556 = vector.extract_strided_slice %552 {offsets = [0, 96], sizes = [2, 32], strides = [1, 1]} : vector<2x128xf32> to vector<2x32xf32>
    %557 = arith.mulf %554, %533 : vector<2x32xf32>
    %558 = arith.mulf %553, %555 : vector<2x32xf32>
    %559 = arith.addf %557, %558 : vector<2x32xf32>
    %560 = math.tanh %559 : vector<2x32xf32>
    %561 = arith.mulf %556, %560 : vector<2x32xf32>
    %cst_103 = arith.constant dense<0.000000e+00> : vector<2x128xf32>
    %562 = tpu.matmul %561, %480, %cst_103 {dimension_numbers = #tpu.dot_dimension_numbers<[1], [0], [0], [1], [0, 0, 1, 1], [], []>} : vector<2x32xf32>, vector<32x128xf32>, vector<2x128xf32> -> vector<2x128xf32>
    %563 = arith.addf %475, %562 : vector<2x128xf32>
    %564 = vector.broadcast %481 : vector<1x128xf32> to vector<2x128xf32>
    %565 = arith.addf %563, %564 : vector<2x128xf32>
    %566 = tpu.iota {dimensions = array<i32: 1>} : vector<2x128xi32>
    %c64_i32_104 = arith.constant 64 : i32
    %567 = vector.broadcast %c64_i32_104 : i32 to vector<2x128xi32>
    %568 = arith.cmpi sge, %566, %567 : vector<2x128xi32>
    %c96_i32_105 = arith.constant 96 : i32
    %569 = vector.broadcast %c96_i32_105 : i32 to vector<2x128xi32>
    %570 = arith.cmpi slt, %566, %569 : vector<2x128xi32>
    %571 = arith.andi %568, %570 : vector<2x128xi1>
    %572 = math.tanh %565 : vector<2x128xf32>
    %573 = arith.negf %565 : vector<2x128xf32>
    %574 = math.exp %573 : vector<2x128xf32>
    %cst_106 = arith.constant 1.000000e+00 : f32
    %575 = vector.broadcast %cst_106 : f32 to vector<2x128xf32>
    %576 = arith.addf %575, %574 : vector<2x128xf32>
    %577 = arith.divf %575, %576 : vector<2x128xf32>
    %578 = arith.select %571, %572, %577 : vector<2x128xi1>, vector<2x128xf32>
    %579 = vector.extract_strided_slice %578 {offsets = [0, 0], sizes = [2, 32], strides = [1, 1]} : vector<2x128xf32> to vector<2x32xf32>
    %580 = vector.extract_strided_slice %578 {offsets = [0, 32], sizes = [2, 32], strides = [1, 1]} : vector<2x128xf32> to vector<2x32xf32>
    %581 = vector.extract_strided_slice %578 {offsets = [0, 64], sizes = [2, 32], strides = [1, 1]} : vector<2x128xf32> to vector<2x32xf32>
    %582 = vector.extract_strided_slice %578 {offsets = [0, 96], sizes = [2, 32], strides = [1, 1]} : vector<2x128xf32> to vector<2x32xf32>
    %583 = arith.mulf %580, %559 : vector<2x32xf32>
    %584 = arith.mulf %579, %581 : vector<2x32xf32>
    %585 = arith.addf %583, %584 : vector<2x32xf32>
    %586 = math.tanh %585 : vector<2x32xf32>
    %587 = arith.mulf %582, %586 : vector<2x32xf32>
    %cst_107 = arith.constant dense<0.000000e+00> : vector<2x128xf32>
    %588 = tpu.matmul %587, %480, %cst_107 {dimension_numbers = #tpu.dot_dimension_numbers<[1], [0], [0], [1], [0, 0, 1, 1], [], []>} : vector<2x32xf32>, vector<32x128xf32>, vector<2x128xf32> -> vector<2x128xf32>
    %589 = arith.addf %476, %588 : vector<2x128xf32>
    %590 = vector.broadcast %481 : vector<1x128xf32> to vector<2x128xf32>
    %591 = arith.addf %589, %590 : vector<2x128xf32>
    %592 = tpu.iota {dimensions = array<i32: 1>} : vector<2x128xi32>
    %c64_i32_108 = arith.constant 64 : i32
    %593 = vector.broadcast %c64_i32_108 : i32 to vector<2x128xi32>
    %594 = arith.cmpi sge, %592, %593 : vector<2x128xi32>
    %c96_i32_109 = arith.constant 96 : i32
    %595 = vector.broadcast %c96_i32_109 : i32 to vector<2x128xi32>
    %596 = arith.cmpi slt, %592, %595 : vector<2x128xi32>
    %597 = arith.andi %594, %596 : vector<2x128xi1>
    %598 = math.tanh %591 : vector<2x128xf32>
    %599 = arith.negf %591 : vector<2x128xf32>
    %600 = math.exp %599 : vector<2x128xf32>
    %cst_110 = arith.constant 1.000000e+00 : f32
    %601 = vector.broadcast %cst_110 : f32 to vector<2x128xf32>
    %602 = arith.addf %601, %600 : vector<2x128xf32>
    %603 = arith.divf %601, %602 : vector<2x128xf32>
    %604 = arith.select %597, %598, %603 : vector<2x128xi1>, vector<2x128xf32>
    %605 = vector.extract_strided_slice %604 {offsets = [0, 0], sizes = [2, 32], strides = [1, 1]} : vector<2x128xf32> to vector<2x32xf32>
    %606 = vector.extract_strided_slice %604 {offsets = [0, 32], sizes = [2, 32], strides = [1, 1]} : vector<2x128xf32> to vector<2x32xf32>
    %607 = vector.extract_strided_slice %604 {offsets = [0, 64], sizes = [2, 32], strides = [1, 1]} : vector<2x128xf32> to vector<2x32xf32>
    %608 = vector.extract_strided_slice %604 {offsets = [0, 96], sizes = [2, 32], strides = [1, 1]} : vector<2x128xf32> to vector<2x32xf32>
    %609 = arith.mulf %606, %585 : vector<2x32xf32>
    %610 = arith.mulf %605, %607 : vector<2x32xf32>
    %611 = arith.addf %609, %610 : vector<2x32xf32>
    %612 = math.tanh %611 : vector<2x32xf32>
    %613 = arith.mulf %608, %612 : vector<2x32xf32>
    %cst_111 = arith.constant dense<0.000000e+00> : vector<2x128xf32>
    %614 = tpu.matmul %613, %480, %cst_111 {dimension_numbers = #tpu.dot_dimension_numbers<[1], [0], [0], [1], [0, 0, 1, 1], [], []>} : vector<2x32xf32>, vector<32x128xf32>, vector<2x128xf32> -> vector<2x128xf32>
    %615 = arith.addf %477, %614 : vector<2x128xf32>
    %616 = vector.broadcast %481 : vector<1x128xf32> to vector<2x128xf32>
    %617 = arith.addf %615, %616 : vector<2x128xf32>
    %618 = tpu.iota {dimensions = array<i32: 1>} : vector<2x128xi32>
    %c64_i32_112 = arith.constant 64 : i32
    %619 = vector.broadcast %c64_i32_112 : i32 to vector<2x128xi32>
    %620 = arith.cmpi sge, %618, %619 : vector<2x128xi32>
    %c96_i32_113 = arith.constant 96 : i32
    %621 = vector.broadcast %c96_i32_113 : i32 to vector<2x128xi32>
    %622 = arith.cmpi slt, %618, %621 : vector<2x128xi32>
    %623 = arith.andi %620, %622 : vector<2x128xi1>
    %624 = math.tanh %617 : vector<2x128xf32>
    %625 = arith.negf %617 : vector<2x128xf32>
    %626 = math.exp %625 : vector<2x128xf32>
    %cst_114 = arith.constant 1.000000e+00 : f32
    %627 = vector.broadcast %cst_114 : f32 to vector<2x128xf32>
    %628 = arith.addf %627, %626 : vector<2x128xf32>
    %629 = arith.divf %627, %628 : vector<2x128xf32>
    %630 = arith.select %623, %624, %629 : vector<2x128xi1>, vector<2x128xf32>
    %631 = vector.extract_strided_slice %630 {offsets = [0, 0], sizes = [2, 32], strides = [1, 1]} : vector<2x128xf32> to vector<2x32xf32>
    %632 = vector.extract_strided_slice %630 {offsets = [0, 32], sizes = [2, 32], strides = [1, 1]} : vector<2x128xf32> to vector<2x32xf32>
    %633 = vector.extract_strided_slice %630 {offsets = [0, 64], sizes = [2, 32], strides = [1, 1]} : vector<2x128xf32> to vector<2x32xf32>
    %634 = vector.extract_strided_slice %630 {offsets = [0, 96], sizes = [2, 32], strides = [1, 1]} : vector<2x128xf32> to vector<2x32xf32>
    %635 = arith.mulf %632, %611 : vector<2x32xf32>
    %636 = arith.mulf %631, %633 : vector<2x32xf32>
    %637 = arith.addf %635, %636 : vector<2x32xf32>
    %638 = math.tanh %637 : vector<2x32xf32>
    %639 = arith.mulf %634, %638 : vector<2x32xf32>
    %cst_115 = arith.constant dense<0.000000e+00> : vector<2x128xf32>
    %640 = tpu.matmul %639, %480, %cst_115 {dimension_numbers = #tpu.dot_dimension_numbers<[1], [0], [0], [1], [0, 0, 1, 1], [], []>} : vector<2x32xf32>, vector<32x128xf32>, vector<2x128xf32> -> vector<2x128xf32>
    %641 = arith.addf %478, %640 : vector<2x128xf32>
    %642 = vector.broadcast %481 : vector<1x128xf32> to vector<2x128xf32>
    %643 = arith.addf %641, %642 : vector<2x128xf32>
    %644 = tpu.iota {dimensions = array<i32: 1>} : vector<2x128xi32>
    %c64_i32_116 = arith.constant 64 : i32
    %645 = vector.broadcast %c64_i32_116 : i32 to vector<2x128xi32>
    %646 = arith.cmpi sge, %644, %645 : vector<2x128xi32>
    %c96_i32_117 = arith.constant 96 : i32
    %647 = vector.broadcast %c96_i32_117 : i32 to vector<2x128xi32>
    %648 = arith.cmpi slt, %644, %647 : vector<2x128xi32>
    %649 = arith.andi %646, %648 : vector<2x128xi1>
    %650 = math.tanh %643 : vector<2x128xf32>
    %651 = arith.negf %643 : vector<2x128xf32>
    %652 = math.exp %651 : vector<2x128xf32>
    %cst_118 = arith.constant 1.000000e+00 : f32
    %653 = vector.broadcast %cst_118 : f32 to vector<2x128xf32>
    %654 = arith.addf %653, %652 : vector<2x128xf32>
    %655 = arith.divf %653, %654 : vector<2x128xf32>
    %656 = arith.select %649, %650, %655 : vector<2x128xi1>, vector<2x128xf32>
    %657 = vector.extract_strided_slice %656 {offsets = [0, 0], sizes = [2, 32], strides = [1, 1]} : vector<2x128xf32> to vector<2x32xf32>
    %658 = vector.extract_strided_slice %656 {offsets = [0, 32], sizes = [2, 32], strides = [1, 1]} : vector<2x128xf32> to vector<2x32xf32>
    %659 = vector.extract_strided_slice %656 {offsets = [0, 64], sizes = [2, 32], strides = [1, 1]} : vector<2x128xf32> to vector<2x32xf32>
    %660 = vector.extract_strided_slice %656 {offsets = [0, 96], sizes = [2, 32], strides = [1, 1]} : vector<2x128xf32> to vector<2x32xf32>
    %661 = arith.mulf %658, %637 : vector<2x32xf32>
    %662 = arith.mulf %657, %659 : vector<2x32xf32>
    %663 = arith.addf %661, %662 : vector<2x32xf32>
    %664 = math.tanh %663 : vector<2x32xf32>
    %665 = arith.mulf %660, %664 : vector<2x32xf32>
    %cst_119 = arith.constant dense<0.000000e+00> : vector<2x128xf32>
    %666 = tpu.matmul %665, %480, %cst_119 {dimension_numbers = #tpu.dot_dimension_numbers<[1], [0], [0], [1], [0, 0, 1, 1], [], []>} : vector<2x32xf32>, vector<32x128xf32>, vector<2x128xf32> -> vector<2x128xf32>
    %667 = arith.addf %479, %666 : vector<2x128xf32>
    %668 = vector.broadcast %481 : vector<1x128xf32> to vector<2x128xf32>
    %669 = arith.addf %667, %668 : vector<2x128xf32>
    %670 = tpu.iota {dimensions = array<i32: 1>} : vector<2x128xi32>
    %c64_i32_120 = arith.constant 64 : i32
    %671 = vector.broadcast %c64_i32_120 : i32 to vector<2x128xi32>
    %672 = arith.cmpi sge, %670, %671 : vector<2x128xi32>
    %c96_i32_121 = arith.constant 96 : i32
    %673 = vector.broadcast %c96_i32_121 : i32 to vector<2x128xi32>
    %674 = arith.cmpi slt, %670, %673 : vector<2x128xi32>
    %675 = arith.andi %672, %674 : vector<2x128xi1>
    %676 = math.tanh %669 : vector<2x128xf32>
    %677 = arith.negf %669 : vector<2x128xf32>
    %678 = math.exp %677 : vector<2x128xf32>
    %cst_122 = arith.constant 1.000000e+00 : f32
    %679 = vector.broadcast %cst_122 : f32 to vector<2x128xf32>
    %680 = arith.addf %679, %678 : vector<2x128xf32>
    %681 = arith.divf %679, %680 : vector<2x128xf32>
    %682 = arith.select %675, %676, %681 : vector<2x128xi1>, vector<2x128xf32>
    %683 = vector.extract_strided_slice %682 {offsets = [0, 0], sizes = [2, 32], strides = [1, 1]} : vector<2x128xf32> to vector<2x32xf32>
    %684 = vector.extract_strided_slice %682 {offsets = [0, 32], sizes = [2, 32], strides = [1, 1]} : vector<2x128xf32> to vector<2x32xf32>
    %685 = vector.extract_strided_slice %682 {offsets = [0, 64], sizes = [2, 32], strides = [1, 1]} : vector<2x128xf32> to vector<2x32xf32>
    %686 = vector.extract_strided_slice %682 {offsets = [0, 96], sizes = [2, 32], strides = [1, 1]} : vector<2x128xf32> to vector<2x32xf32>
    %687 = arith.mulf %684, %663 : vector<2x32xf32>
    %688 = arith.mulf %683, %685 : vector<2x32xf32>
    %689 = arith.addf %687, %688 : vector<2x32xf32>
    %690 = math.tanh %689 : vector<2x32xf32>
    %691 = arith.mulf %686, %690 : vector<2x32xf32>
    %c0_123 = arith.constant 0 : index
    %c0_124 = arith.constant 0 : index
    %692 = vector.load %arg10[%c0_123, %c0_124] : memref<64x128xf32, #tpu.memory_space<vmem>>, vector<64x128xf32>
    %693 = vector.extract_strided_slice %692 {offsets = [0, 0], sizes = [32, 128], strides = [1, 1]} : vector<64x128xf32> to vector<32x128xf32>
    %cst_125 = arith.constant dense<0.000000e+00> : vector<2x128xf32>
    %694 = tpu.matmul %235, %693, %cst_125 {dimension_numbers = #tpu.dot_dimension_numbers<[1], [0], [0], [1], [0, 0, 1, 1], [], []>} : vector<2x32xf32>, vector<32x128xf32>, vector<2x128xf32> -> vector<2x128xf32>
    %695 = vector.extract_strided_slice %692 {offsets = [32, 0], sizes = [32, 128], strides = [1, 1]} : vector<64x128xf32> to vector<32x128xf32>
    %cst_126 = arith.constant dense<0.000000e+00> : vector<2x128xf32>
    %696 = tpu.matmul %281, %695, %cst_126 {dimension_numbers = #tpu.dot_dimension_numbers<[1], [0], [0], [1], [0, 0, 1, 1], [], []>} : vector<2x32xf32>, vector<32x128xf32>, vector<2x128xf32> -> vector<2x128xf32>
    %697 = arith.addf %694, %696 : vector<2x128xf32>
    %c0_127 = arith.constant 0 : index
    %c0_128 = arith.constant 0 : index
    %698 = vector.load %arg11[%c0_127, %c0_128] : memref<1x128xf32, #tpu.memory_space<vmem>>, vector<1x128xf32>
    %699 = vector.broadcast %698 : vector<1x128xf32> to vector<2x128xf32>
    %700 = arith.addf %697, %699 : vector<2x128xf32>
    %cst_129 = arith.constant 0.000000e+00 : f32
    %701 = vector.broadcast %cst_129 : f32 to vector<2x32xf32>
    %702 = tpu.iota {dimensions = array<i32: 1>} : vector<2x128xi32>
    %c64_i32_130 = arith.constant 64 : i32
    %703 = vector.broadcast %c64_i32_130 : i32 to vector<2x128xi32>
    %704 = arith.cmpi sge, %702, %703 : vector<2x128xi32>
    %c96_i32_131 = arith.constant 96 : i32
    %705 = vector.broadcast %c96_i32_131 : i32 to vector<2x128xi32>
    %706 = arith.cmpi slt, %702, %705 : vector<2x128xi32>
    %707 = arith.andi %704, %706 : vector<2x128xi1>
    %708 = math.tanh %700 : vector<2x128xf32>
    %709 = arith.negf %700 : vector<2x128xf32>
    %710 = math.exp %709 : vector<2x128xf32>
    %cst_132 = arith.constant 1.000000e+00 : f32
    %711 = vector.broadcast %cst_132 : f32 to vector<2x128xf32>
    %712 = arith.addf %711, %710 : vector<2x128xf32>
    %713 = arith.divf %711, %712 : vector<2x128xf32>
    %714 = arith.select %707, %708, %713 : vector<2x128xi1>, vector<2x128xf32>
    %715 = vector.extract_strided_slice %714 {offsets = [0, 0], sizes = [2, 32], strides = [1, 1]} : vector<2x128xf32> to vector<2x32xf32>
    %716 = vector.extract_strided_slice %714 {offsets = [0, 32], sizes = [2, 32], strides = [1, 1]} : vector<2x128xf32> to vector<2x32xf32>
    %717 = vector.extract_strided_slice %714 {offsets = [0, 64], sizes = [2, 32], strides = [1, 1]} : vector<2x128xf32> to vector<2x32xf32>
    %718 = vector.extract_strided_slice %714 {offsets = [0, 96], sizes = [2, 32], strides = [1, 1]} : vector<2x128xf32> to vector<2x32xf32>
    %719 = arith.mulf %716, %701 : vector<2x32xf32>
    %720 = arith.mulf %715, %717 : vector<2x32xf32>
    %721 = arith.addf %719, %720 : vector<2x32xf32>
    %722 = math.tanh %721 : vector<2x32xf32>
    %723 = arith.mulf %718, %722 : vector<2x32xf32>
    %724 = tpu.concatenate %691, %723 in 1 : vector<2x32xf32>, vector<2x32xf32> -> vector<2x64xf32>
    %c0_133 = arith.constant 0 : index
    %c0_134 = arith.constant 0 : index
    %725 = vector.load %arg12[%c0_133, %c0_134] : memref<64x256xf32, #tpu.memory_space<vmem>>, vector<64x256xf32>
    %cst_135 = arith.constant dense<0.000000e+00> : vector<2x256xf32>
    %726 = tpu.matmul %724, %725, %cst_135 {dimension_numbers = #tpu.dot_dimension_numbers<[1], [0], [0], [1], [0, 0, 1, 1], [], []>} : vector<2x64xf32>, vector<64x256xf32>, vector<2x256xf32> -> vector<2x256xf32>
    %c0_136 = arith.constant 0 : index
    %c0_137 = arith.constant 0 : index
    %727 = vector.load %arg13[%c0_136, %c0_137] : memref<1x256xf32, #tpu.memory_space<vmem>>, vector<1x256xf32>
    %728 = vector.broadcast %727 : vector<1x256xf32> to vector<2x256xf32>
    %729 = arith.addf %726, %728 : vector<2x256xf32>
    %cst_138 = arith.constant 0.000000e+00 : f32
    %730 = vector.broadcast %cst_138 : f32 to vector<2x256xf32>
    %731 = arith.maximumf %729, %730 : vector<2x256xf32>
    %c0_139 = arith.constant 0 : index
    %c0_140 = arith.constant 0 : index
    %732 = vector.load %arg14[%c0_139, %c0_140] : memref<256x8xf32, #tpu.memory_space<vmem>>, vector<256x8xf32>
    %cst_141 = arith.constant dense<0.000000e+00> : vector<2x8xf32>
    %733 = tpu.matmul %731, %732, %cst_141 {dimension_numbers = #tpu.dot_dimension_numbers<[1], [0], [0], [1], [0, 0, 1, 1], [], []>} : vector<2x256xf32>, vector<256x8xf32>, vector<2x8xf32> -> vector<2x8xf32>
    %c0_142 = arith.constant 0 : index
    %c0_143 = arith.constant 0 : index
    %734 = vector.load %arg15[%c0_142, %c0_143] : memref<1x8xf32, #tpu.memory_space<vmem>>, vector<1x8xf32>
    %735 = vector.broadcast %734 : vector<1x8xf32> to vector<2x8xf32>
    %736 = arith.addf %733, %735 : vector<2x8xf32>
    %c0_144 = arith.constant 0 : index
    %c0_145 = arith.constant 0 : index
    %737 = vector.load %arg16[%c0_144, %c0_145] : memref<2x8xf32, #tpu.memory_space<vmem>>, vector<2x8xf32>
    tpu.vector_store %arg16[%c0_144, %c0_145], %736 {strides = array<i32>} : memref<2x8xf32, #tpu.memory_space<vmem>>, vector<2x8xf32>,
    return
  }
}

</mosaic_0001>

<bundles_post_ra>
// kernel: speech_rnn_forward.1
= control target key start
LH: loop header
LB: loop body
LE: loop exit
PB: predicated region body
PF: predicated region fallthrough
CT: control target
= control target key end

     0   :  { %s6052_s0 = inlined_call_operand.hbm [shape: f32[2,8,13], index: 0, kind: input, shape index: {}]   ;;  %s6053_s1 = inlined_call_operand.hbm [shape: f32[13,128], index: 1, kind: input, shape index: {}]   ;;  %s6054_s2 = inlined_call_operand.hbm [shape: f32[32,128], index: 2, kind: input, shape index: {}]   ;;  %s6055_s3 = inlined_call_operand.hbm [shape: f32[1,128], index: 3, kind: input, shape index: {}]   ;;  %s6056_s4 = inlined_call_operand.hbm [shape: f32[13,128], index: 4, kind: input, shape index: {}]   ;;  %s6057_s5 = inlined_call_operand.hbm [shape: f32[32,128], index: 5, kind: input, shape index: {}]   ;;  %s6058_s6 = inlined_call_operand.hbm [shape: f32[1,128], index: 6, kind: input, shape index: {}]   ;;  %s6059_s7 = inlined_call_operand.vmem [shape: f32[64,128], index: 7, kind: input, shape index: {}]   ;;  %s6060_s8 = inlined_call_operand.vmem [shape: f32[32,128], index: 8, kind: input, shape index: {}]   ;;  %s6061_s9 = inlined_call_operand.vmem [shape: f32[1,128], index: 9, kind: input, shape index: {}]   ;;  %s6062_s10 = inlined_call_operand.vmem [shape: f32[64,128], index: 10, kind: input, shape index: {}]   ;;  %s6063_s11 = inlined_call_operand.vmem [shape: f32[1,128], index: 11, kind: input, shape index: {}]   ;;  %s6064_s12 = inlined_call_operand.vmem [shape: f32[64,256], index: 12, kind: input, shape index: {}]   ;;  %s6065_s13 = inlined_call_operand.vmem [shape: f32[1,256], index: 13, kind: input, shape index: {}]   ;;  %s6066_s14 = inlined_call_operand.vmem [shape: f32[256,8], index: 14, kind: input, shape index: {}]   ;;  %s6067_s15 = inlined_call_operand.hbm [shape: f32[1,8], index: 15, kind: input, shape index: {}]   ;;  %s6068_s16 = inlined_call_operand.hbm [shape: f32[2,8], index: 16, kind: output, shape index: {}]  }
   0x1   :  { %6069 = sst [smem:[#allocation23_spill]] %s6052_s0 }
   0x2   :  { %21 = vsyncpa [#allocation3], 0 }
   0x3   :  { %22 = vsyncpa [#allocation6], 0 }
   0x4   :  { %23 = vsyncpa [#allocation9], 0 }
   0x5   :  { %24 = vsyncpa [#allocation12], 0 }
   0x6   :  { %25 = vsyncpa [#allocation15], 0 }
   0x7   :  { %26 = vsyncpa [#allocation4], 0  ;;  %s4991_s21 = smov [#allocation5]   ;;  %s4992_s23 = smov [#allocation8]  }
   0x8   :  { %s44_s22 = sshll.u32 %s4991_s21, 4  ;;  %s69_s24 = sshll.u32 %s4992_s23, 4  ;;  %s45_s22 = int_to_ptr.vmem [resolvable:$true] %s44_s22  ;;  %s70_s24 = int_to_ptr.vmem [resolvable:$true] %s69_s24 }
   0x9   :  { %s4807_s25 = scalar_lea.vmem %s45_s22, 256  ;;  %p4812_p1 = scmp.lt.s32.totalorder %s45_s22, %s45_s22 }
   0xa   :  { %p4808_p0 = scmp.ne.s32.totalorder %s45_s22, %s4807_s25  ;;  %p4813_p2 = scmp.lt.s32.totalorder %s4807_s25, %s4807_s25 }
   0xc   :  { %p4814_p3 = por %p4813_p2, %p4812_p1 }
   0xe   :  { %p4815_p4 = pnand %p4814_p3, %p4808_p0 }
  0x10   :  { %4818 = shalt.err (!%p4815_p4)
}
  0x11   :  { %s4993_s26 = smov 128   ;;  %s4994_s27 = smov 8  }
  0x12   :  { %50 = dma.hbm_to_vmem [thread:$0]  %s6053_s1, 256, %s45_s22, [#allocation6], %s4993_s26, %s4993_s26, %s4994_s27  }
  0x13   :  { %s4827_s30 = scalar_lea.vmem %s70_s24, 16  ;;  %s4831_s0 = scalar_lea.vmem %s70_s24, 32 }
  0x14   :  { %p4828_p5 = scmp.ne.s32.totalorder %s70_s24, %s4827_s30  ;;  %p4832_p6 = scmp.lt.s32.totalorder %s70_s24, %s70_s24 }
  0x15   :  { %p4833_p7 = scmp.lt.s32.totalorder %s4831_s0, %s4827_s30 }
  0x17   :  { %p4834_p8 = por %p4833_p7, %p4832_p6 }
  0x19   :  { %p4835_p9 = pnand %p4834_p8, %p4828_p5 }
  0x1b   :  { %4838 = shalt.err (!%p4835_p9)
}
  0x1c   :  { %72 = dma.hbm_to_vmem [thread:$0]  %s6055_s3, 16, %s70_s24, [#allocation9]  }
  0x1d   :  { %s4995_s19 = smov [#allocation11]   ;;  %s4996_s21 = smov [#allocation2]  }
  0x1e   :  { %s90_s20 = sshll.u32 %s4995_s19, 4  ;;  %s32_s23 = sshll.u32 %s4996_s21, 4  ;;  %s91_s20 = int_to_ptr.vmem [resolvable:$true] %s90_s20  ;;  %s33_s23 = int_to_ptr.vmem [resolvable:$true] %s32_s23 }
  0x1f   :  { %s4847_s25 = scalar_lea.vmem %s91_s20, 512  ;;  %p4852_p11 = scmp.lt.s32.totalorder %s91_s20, %s91_s20 }
  0x20   :  { %p4848_p10 = scmp.ne.s32.totalorder %s91_s20, %s4847_s25  ;;  %p4853_p12 = scmp.lt.s32.totalorder %s4847_s25, %s4847_s25 }
  0x22   :  { %p4854_p13 = por %p4853_p12, %p4852_p11 }
  0x24   :  { %p4855_p0 = pnand %p4854_p13, %p4848_p10 }
  0x26   :  { %4858 = shalt.err (!%p4855_p0)
}
  0x27   :  { %96 = dma.hbm_to_vmem [thread:$0]  %s6057_s5, 512, %s91_s20, [#allocation12], %s4993_s26, %s4993_s26, %s4994_s27  }
  0x28   :  { %s4867_s3 = scalar_lea.vmem %s33_s23, 256  ;;  %p4872_p2 = scmp.lt.s32.totalorder %s33_s23, %s33_s23 }
  0x29   :  { %p4868_p1 = scmp.ne.s32.totalorder %s33_s23, %s4867_s3  ;;  %p4873_p3 = scmp.lt.s32.totalorder %s4867_s3, %s4867_s3 }
  0x2b   :  { %p4874_p4 = por %p4873_p3, %p4872_p2 }
  0x2d   :  { %p4875_p5 = pnand %p4874_p4, %p4868_p1 }
  0x2f   :  { %4878 = shalt.err (!%p4875_p5)
}
  0x30   :  { %s6070_s29 = sld [smem:[#allocation23_spill]]  ;;  %s4997_s30 = smov [#allocation7]  }
  0x31   :  { %s56_s0 = sshll.u32 %s4997_s30, 4  ;;  %s4998_s17 = smov [#allocation10]   ;;  %s57_s0 = int_to_ptr.vmem [resolvable:$true] %s56_s0 }
  0x32   :  { %s78_s18 = sshll.u32 %s4998_s17, 4  ;;  %s4887_s5 = scalar_lea.vmem %s57_s0, 512  ;;  %s79_s18 = int_to_ptr.vmem [resolvable:$true] %s78_s18 }
  0x33   :  { %p4888_p6 = scmp.ne.s32.totalorder %s57_s0, %s4887_s5  ;;  %p4892_p7 = scmp.lt.s32.totalorder %s57_s0, %s57_s0 }
  0x34   :  { %p4893_p8 = scmp.lt.s32.totalorder %s4887_s5, %s4887_s5 }
  0x36   :  { %38 = dma.hbm_to_vmem [thread:$0]  %s6070_s29, 256, %s33_s23, [#allocation3], %s4993_s26, %s4993_s26, %s4994_s27  }
  0x37   :  { %p4894_p9 = por %p4893_p8, %p4892_p7 }
  0x39   :  { %p4895_p10 = pnand %p4894_p9, %p4888_p6 }
  0x3b   :  { %4898 = shalt.err (!%p4895_p10)
}
  0x3c   :  { %62 = dma.hbm_to_vmem [thread:$0]  %s6054_s2, 512, %s57_s0, [#allocation6], %s4993_s26, %s4993_s26, %s4994_s27  }
  0x3d   :  { %s4907_s21 = scalar_lea.vmem %s79_s18, 256  ;;  %p4912_p12 = scmp.lt.s32.totalorder %s79_s18, %s79_s18 }
  0x3e   :  { %p4908_p11 = scmp.ne.s32.totalorder %s79_s18, %s4907_s21  ;;  %p4913_p13 = scmp.lt.s32.totalorder %s4907_s21, %s4907_s21 }
  0x40   :  { %p4914_p0 = por %p4913_p13, %p4912_p12 }
  0x42   :  { %p4915_p1 = pnand %p4914_p0, %p4908_p11 }
  0x44   :  { %4918 = shalt.err (!%p4915_p1)
}
  0x45   :  { %84 = dma.hbm_to_vmem [thread:$0]  %s6056_s4, 256, %s79_s18, [#allocation9], %s4993_s26, %s4993_s26, %s4994_s27  }
  0x46   :  { %s4999_s1 = smov [#allocation13]   ;;  %s5000_s3 = smov [#allocation14]  }
  0x47   :  { %s103_s22 = sshll.u32 %s4999_s1, 4  ;;  %s129_s24 = sshll.u32 %s5000_s3, 4  ;;  %s104_s22 = int_to_ptr.vmem [resolvable:$true] %s103_s22  ;;  %s130_s24 = int_to_ptr.vmem [resolvable:$true] %s129_s24 }
  0x48   :  { %s4927_s2 = scalar_lea.vmem %s104_s22, 16  ;;  %s4931_s28 = scalar_lea.vmem %s104_s22, 32 }
  0x49   :  { %p4928_p2 = scmp.ne.s32.totalorder %s104_s22, %s4927_s2  ;;  %p4932_p3 = scmp.lt.s32.totalorder %s104_s22, %s104_s22 }
  0x4a   :  { %p4933_p4 = scmp.lt.s32.totalorder %s4931_s28, %s4927_s2 }
  0x4c   :  { %p4934_p5 = por %p4933_p4, %p4932_p3 }
  0x4e   :  { %p4935_p6 = pnand %p4934_p5, %p4928_p2 }
  0x50   :  { %4938 = shalt.err (!%p4935_p6)
}
  0x51   :  { %106 = dma.hbm_to_vmem [thread:$0]  %s6058_s6, 16, %s104_s22, [#allocation12]  }
  0x52   :  { %s4947_s0 = scalar_lea.vmem %s130_s24, 16  ;;  %s4951_s4 = scalar_lea.vmem %s130_s24, 32 }
  0x53   :  { %p4948_p7 = scmp.ne.s32.totalorder %s130_s24, %s4947_s0  ;;  %p4952_p8 = scmp.lt.s32.totalorder %s130_s24, %s130_s24 }
  0x54   :  { %p4953_p9 = scmp.lt.s32.totalorder %s4951_s4, %s4947_s0 }
  0x56   :  { %p4954_p10 = por %p4953_p9, %p4952_p8 }
  0x58   :  { %p4955_p11 = pnand %p4954_p10, %p4948_p7 }
  0x5a   :  { %4958 = shalt.err (!%p4955_p11)
}
  0x5b   :  { %132 = dma.hbm_to_vmem [thread:$0]  %s6067_s15, 16, %s130_s24, [#allocation15]  }
  0x5c   :  { %4979 = dma.done.wait [#allocation3], 256  }
  0x5d   :  { %4980 = vsyncadd [#allocation3], 4294967040 }
  0x5e   :  { %4981 = dma.done.wait [#allocation6], 768  }
  0x5f   :  { %4982 = vsyncadd [#allocation6], 4294966528 }
  0x60   :  { %4983 = dma.done.wait [#allocation9], 272  }
  0x61   :  { %4984 = vsyncadd [#allocation9], 4294967024 }
  0x62   :  { %4985 = dma.done.wait [#allocation12], 528  }
  0x63   :  { %4986 = vsyncadd [#allocation12], 4294966768 }
  0x64   :  { %4987 = dma.done.wait [#allocation15], 16  }
  0x65   :  { %4988 = vsyncadd [#allocation15], 4294967280  ;;  %vm168_vm0 = vcmask 1044480   ;;  %vm161_vm1 = vcmask 105472   ;;  %v160_v0 = vld [vmem:[#allocation5 + $0x8] sm:$0x1f]  ;;  %v420_v25 = vlaneseq }
  0x66   :  { %v159_v1 = vld [vmem:[#allocation5] sm:$0xff]  ;;  %v157_v2 = vld [vmem:[#allocation2] sm:$0xff]  ;;  %4165 = vmatprep.subr.msk.mxu0 %vm168_vm0, %v160_v0  ;;  %v5133_v3 = vld [vmem:[#allocation2 + $0x8] sm:$0xff]  ;;  %v5001_v5 = vmov 0.0   ;;  %vm5002_vm2 = vmmov 0   ;;  %vm442_vm5 = vcmask 1041409  }
  0x67   :  { %4169 = vmatprep.mubr.msk.f32.mxu0 %vm161_vm1, %v157_v2  ;;  %4166 = vmatpush3.msk.msra.mxu0 %vm168_vm0, %v160_v0  ;;  %v5136_v4 = vld [vmem:[#allocation7 + $0x18] sm:$0xff]  ;;  %v5141_v6 = vld [vmem:[#allocation7 + $0x10] sm:$0xff]  ;;  %v5147_v7 = vld [vmem:[#allocation7 + $0x8] sm:$0xff]  ;;  %v421_v26 = vand.u32 127, %v420_v25  ;;  %s5003_s6 = smov 64   ;;  %s5004_s15 = smov 32  }
  0x68   :  { %4176 = vmatprep.mubr.msk.f32.mxu1 %vm161_vm1, %v157_v2  ;;  %4167 = vmatprep.subr.mxu0 %v159_v1  ;;  %v5151_v8 = vld [vmem:[#allocation7] sm:$0xff]  ;;  %vm332_vm7 = vcmask 261120   ;;  %vm2398_vm8 = vcmask 1041408   ;;  %vm2400_vm9 = vcmask 1043456   ;;  %vm2402_vm10 = vcmask 1045504  }
  0x69   :  { %4168 = vmatpush3.msra.mxu0 %v159_v1  ;;  %v5172_v11 = vld [vmem:[#allocation8] ss:$0 sm:$0xff]  ;;  %vm422_vm3 = vcmp.ge.s32.totalorder %v421_v26, 64  ;;  %vm423_vm4 = vcmp.lt.s32.totalorder %v421_v26, 96  ;;  %vm3694_vm11 = vcmask 523264   ;;  %vm3879_vm12 = vcmask 58368  }
  0x6a   :  { %4170 = vmatmul.mubr.msk.f32.vlgmr.msra.gmra.mxu0 %vm161_vm1, %v5133_v3  ;;  %4179 = vmatprep.subr.mxu0 %v5001_v5  ;;  %vm5179_vm6 = vmand %vm422_vm3, %vm423_vm4 }
  0x6b   :  { %4180 = vmatpush3.msra.mxu0 %v5136_v4  ;;  %4187 = vmatprep.mubr.msk.f32.mxu0 %vm5002_vm2, %v5001_v5 }
  0x6c   :  { %4181 = vmatprep.subr.mxu0 %v5001_v5 }
  0x6d   :  { %4182 = vmatpush3.msra.mxu0 %v5141_v6 }
  0x6e   :  { %4183 = vmatprep.subr.mxu0 %v5001_v5 }
  0x6f   :  { %4184 = vmatpush3.msra.mxu0 %v5147_v7 }
  0x70   :  { %4185 = vmatprep.subr.mxu0 %v5001_v5 }
  0x71   :  { %4186 = vmatpush3.msra.mxu0 %v5151_v8 }
  0x72   :  { %4188 = vmatmul.mubr.f32.vlgmr.msra.gmra.mxu0 %v5001_v5  ;;  %4190 = vmatprep.subr.mxu0 %v5001_v5 }
  0x73   :  { %4191 = vmatpush3.msra.mxu0 %v5136_v4  ;;  %4198 = vmatprep.mubr.msk.f32.mxu0 %vm5002_vm2, %v5001_v5 }
  0x74   :  { %4192 = vmatprep.subr.mxu0 %v5001_v5 }
  0x75   :  { %4193 = vmatpush3.msra.mxu0 %v5141_v6 }
  0x76   :  { %4194 = vmatprep.subr.mxu0 %v5001_v5 }
  0x77   :  { %4195 = vmatpush3.msra.mxu0 %v5147_v7 }
  0x78   :  { %4196 = vmatprep.subr.mxu0 %v5001_v5 }
  0x79   :  { %4197 = vmatpush3.msra.mxu0 %v5151_v8 }
  0x7a   :  { %4201 = vmatprep.subr.mxu0 %v5001_v5 }
 0x12a   :  { %v5168_v9 = vpop.f32.mrf.mxu0 }
 0x12c   :  { %v5170_v10 = vpop.f32.mrf.mxu0 }
 0x132   :  { %v402_v12 = vpop.f32.mrf.mxu0 }
 0x133   :  { %v407_v13 = vrot.slane %v402_v12, 1  ;;  %v410_v14 = vadd.f32 %v402_v12, %v5170_v10 }
 0x134   :  { %v4189_v15 = vpop.f32.mrf.mxu0 }
 0x135   :  { %v411_v16 = vadd.f32 %v5168_v9, %v407_v13  ;;  %v418_v17 = vadd.f32 %v5172_v11, %v410_v14 }
 0x137   :  { %v419_v18 = vadd.f32 %v5172_v11, %v411_v16  ;;  %v3907_v19 = vmul.f32 -1.442695, %v418_v17 }
 0x139   :  { %v3908_v20 = vmul.f32 -1.442695, %v419_v18  ;;  %4502 = vpow2.f32 %v3907_v19 }
 0x13b   :  { %4504 = vpow2.f32 %v3908_v20 }
 0x13c   :  { %4506 = vtanh.f32 %v419_v18 }
 0x146   :  { %v4503_v21 = vpop.eup %4502 }
 0x147   :  { %v433_v23 = vadd.f32 1.0, %v4503_v21 }
 0x148   :  { %v4505_v22 = vpop.eup %4504 }
 0x149   :  { %v434_v24 = vadd.f32 1.0, %v4505_v22  ;;  %v4507_v27 = vpop.eup %4506 }
 0x14a   :  { %v441_v28 = vrot.slane %v4507_v27, 7 }
 0x14b   :  { %4508 = vrcp.f32 %v434_v24 }
 0x14c   :  { %4510 = vtanh.f32 %v418_v17 }
 0x14d   :  { %4512 = vrcp.f32 %v433_v23 }
 0x158   :  { %v4509_v29 = vpop.eup %4508 }
 0x159   :  { %v4511_v30 = vpop.eup %4510  ;;  %v447_v32 = vrot.slane %v4509_v29, 7 }
 0x15a   :  { %v4513_v33 = vpop.eup %4512  ;;  %v443_v34 = vsel %vm442_vm5, %v441_v28, %v4511_v30 }
 0x15b   :  { %v448_v35 = vsel %vm442_vm5, %v447_v32, %v4513_v33 }
 0x15c   :  { %v450_v36 = vsel %vm5179_vm6, %v443_v34, %v448_v35 }
 0x15d   :  { %453 = vrot.lane.b32.xlu0 %v450_v36, %s5003_s6  ;;  %v451_v39 = vmul.f32 0.0, %v450_v36 }
 0x1cf   :  { %v454_v37 = vpop.permute.xlu0 %453 }
 0x1d0   :  { %v456_v38 = vmul.f32 %v454_v37, %v450_v36 }
 0x1d2   :  { %458 = vrot.lane.b32.xlu0 %v456_v38, %s5004_s15 }
 0x244   :  { %v459_v40 = vpop.permute.xlu0 %458 }
 0x245   :  { %v461_v41 = vadd.f32 %v459_v40, %v451_v39 }
 0x247   :  { %4514 = vtanh.f32 %v461_v41 }
 0x254   :  { %v4515_v42 = vpop.eup %4514 }
 0x255   :  { %464 = vrot.lane.b32.xlu1 %v4515_v42, %s5003_s6 }
 0x2c7   :  { %v465_v43 = vpop.permute.xlu1 %464 }
 0x2c8   :  { %v5190_v44 = vmul.f32 %v465_v43, %v450_v36 }
 0x2ca   :  { %469 = vrot.lane.b32.xlu1 %v5190_v44, %s5004_s15 }
 0x33c   :  { %v470_v45 = vpop.permute.xlu1 %469 }
 0x33d   :  { %4199 = vmatmul.mubr.msk.f32.vlgmr.msra.gmra.mxu0 %vm332_vm7, %v470_v45 }
 0x33e   :  { %4202 = vmatpush3.msra.mxu0 %v5136_v4  ;;  %4209 = vmatprep.mubr.msk.f32.mxu0 %vm5002_vm2, %v5001_v5 }
 0x33f   :  { %4203 = vmatprep.subr.mxu0 %v5001_v5 }
 0x340   :  { %4204 = vmatpush3.msra.mxu0 %v5141_v6 }
 0x341   :  { %4205 = vmatprep.subr.mxu0 %v5001_v5 }
 0x342   :  { %4206 = vmatpush3.msra.mxu0 %v5147_v7 }
 0x343   :  { %4207 = vmatprep.subr.mxu0 %v5001_v5 }
 0x344   :  { %4208 = vmatpush3.msra.mxu0 %v5151_v8 }
 0x345   :  { %4223 = vmatprep.subr.mxu0 %v5001_v5 }
 0x3fd   :  { %v539_v46 = vpop.f32.mrf.mxu0 }
 0x3fe   :  { %v544_v47 = vrot.slane %v539_v46, 7  ;;  %v548_v48 = vadd.f32 %v5168_v9, %v539_v46 }
 0x3ff   :  { %v4200_v49 = vpop.f32.mrf.mxu0 }
 0x400   :  { %v547_v50 = vadd.f32 %v544_v47, %v5170_v10  ;;  %v550_v51 = vadd.f32 %v5172_v11, %v548_v48 }
 0x402   :  { %v549_v52 = vadd.f32 %v5172_v11, %v547_v50  ;;  %v3911_v53 = vmul.f32 -1.442695, %v550_v51 }
 0x404   :  { %v3910_v54 = vmul.f32 -1.442695, %v549_v52  ;;  %4516 = vpow2.f32 %v3911_v53 }
 0x406   :  { %4518 = vpow2.f32 %v3910_v54 }
 0x407   :  { %4520 = vtanh.f32 %v549_v52 }
 0x411   :  { %v4517_v55 = vpop.eup %4516 }
 0x412   :  { %v560_v58 = vadd.f32 1.0, %v4517_v55  ;;  %v248_v55 = vld [vmem:[#allocation10 + $0x8] sm:$0x1f] }
 0x413   :  { %v4519_v56 = vpop.eup %4518  ;;  %4172 = vmatprep.subr.msk.mxu1 %vm168_vm0, %v248_v55 }
 0x414   :  { %v559_v57 = vadd.f32 1.0, %v4519_v56  ;;  %v4521_v59 = vpop.eup %4520  ;;  %v247_v56 = vld [vmem:[#allocation10] sm:$0xff]  ;;  %4173 = vmatpush3.msk.msra.mxu1 %vm168_vm0, %v248_v55 }
 0x415   :  { %v567_v60 = vrot.slane %v4521_v59, 1  ;;  %4174 = vmatprep.subr.mxu1 %v247_v56 }
 0x416   :  { %4522 = vrcp.f32 %v559_v57  ;;  %4175 = vmatpush3.msra.mxu1 %v247_v56 }
 0x417   :  { %4524 = vtanh.f32 %v550_v51  ;;  %4177 = vmatmul.mubr.msk.f32.vlgmr.msra.gmra.mxu1 %vm161_vm1, %v5133_v3  ;;  %4212 = vmatprep.subr.mxu1 %v5001_v5 }
 0x418   :  { %4526 = vrcp.f32 %v560_v58  ;;  %4213 = vmatpush3.msra.mxu1 %v5136_v4  ;;  %4220 = vmatprep.mubr.msk.f32.mxu1 %vm5002_vm2, %v5001_v5 }
 0x419   :  { %4214 = vmatprep.subr.mxu1 %v5001_v5 }
 0x41a   :  { %4215 = vmatpush3.msra.mxu1 %v5141_v6 }
 0x41b   :  { %4216 = vmatprep.subr.mxu1 %v5001_v5 }
 0x41c   :  { %4217 = vmatpush3.msra.mxu1 %v5147_v7 }
 0x41d   :  { %4218 = vmatprep.subr.mxu1 %v5001_v5 }
 0x41e   :  { %4219 = vmatpush3.msra.mxu1 %v5151_v8 }
 0x41f   :  { %4234 = vmatprep.subr.mxu1 %v5001_v5 }
 0x423   :  { %v4523_v61 = vpop.eup %4522 }
 0x424   :  { %v4525_v62 = vpop.eup %4524  ;;  %v572_v63 = vrot.slane %v4523_v61, 1 }
 0x425   :  { %v4527_v0 = vpop.eup %4526  ;;  %v568_v1 = vsel %vm442_vm5, %v4525_v62, %v567_v60 }
 0x426   :  { %v573_v2 = vsel %vm442_vm5, %v4527_v0, %v572_v63 }
 0x427   :  { %v575_v12 = vsel %vm5179_vm6, %v568_v1, %v573_v2 }
 0x428   :  { %578 = vrot.lane.b32.xlu0 %v575_v12, %s5003_s6  ;;  %v576_v15 = vmul.f32 %v575_v12, %v461_v41 }
 0x49a   :  { %v579_v13 = vpop.permute.xlu0 %578 }
 0x49b   :  { %v581_v14 = vmul.f32 %v579_v13, %v575_v12 }
 0x49d   :  { %583 = vrot.lane.b32.xlu1 %v581_v14, %s5004_s15 }
 0x50f   :  { %v584_v16 = vpop.permute.xlu1 %583 }
 0x510   :  { %v586_v17 = vadd.f32 %v584_v16, %v576_v15 }
 0x512   :  { %4528 = vtanh.f32 %v586_v17 }
 0x51f   :  { %v4529_v18 = vpop.eup %4528 }
 0x520   :  { %589 = vrot.lane.b32.xlu0 %v4529_v18, %s5003_s6 }
 0x592   :  { %v590_v19 = vpop.permute.xlu0 %589 }
 0x593   :  { %v5216_v20 = vmul.f32 %v590_v19, %v575_v12 }
 0x595   :  { %594 = vrot.lane.b32.xlu1 %v5216_v20, %s5004_s15  ;;  %v2385_v3 = vrot.slane %v5216_v20, 6 }
 0x597   :  { %v2399_v61 = vsel %vm2398_vm8, %v5190_v44, %v2385_v3  ;;  %v5276_v44 = vpop.f32.mrf.mxu1 }
 0x599   :  { %v5278_v0 = vpop.f32.mrf.mxu1 }
 0x607   :  { %v595_v21 = vpop.permute.xlu1 %594 }
 0x608   :  { %4210 = vmatmul.mubr.msk.f32.vlgmr.msra.gmra.mxu0 %vm332_vm7, %v595_v21 }
 0x609   :  { %4224 = vmatpush3.msra.mxu0 %v5136_v4  ;;  %4231 = vmatprep.mubr.msk.f32.mxu0 %vm5002_vm2, %v5001_v5 }
 0x60a   :  { %4225 = vmatprep.subr.mxu0 %v5001_v5 }
 0x60b   :  { %4226 = vmatpush3.msra.mxu0 %v5141_v6 }
 0x60c   :  { %4227 = vmatprep.subr.mxu0 %v5001_v5 }
 0x60d   :  { %4228 = vmatpush3.msra.mxu0 %v5147_v7 }
 0x60e   :  { %4229 = vmatprep.subr.mxu0 %v5001_v5 }
 0x60f   :  { %4230 = vmatpush3.msra.mxu0 %v5151_v8 }
 0x610   :  { %4245 = vmatprep.subr.mxu0 %v5001_v5 }
 0x6c8   :  { %v664_v22 = vpop.f32.mrf.mxu0 }
 0x6c9   :  { %v669_v23 = vrot.slane %v664_v22, 6  ;;  %v670_v24 = vrot.slane %v664_v22, 7 }
 0x6ca   :  { %v4211_v26 = vpop.f32.mrf.mxu0 }
 0x6cb   :  { %v673_v27 = vadd.f32 %v669_v23, %v5170_v10  ;;  %v674_v28 = vadd.f32 %v5168_v9, %v670_v24 }
 0x6cd   :  { %v675_v29 = vadd.f32 %v5172_v11, %v673_v27  ;;  %v676_v30 = vadd.f32 %v5172_v11, %v674_v28 }
 0x6cf   :  { %v3913_v32 = vmul.f32 -1.442695, %v675_v29  ;;  %v3914_v33 = vmul.f32 -1.442695, %v676_v30 }
 0x6d1   :  { %4530 = vpow2.f32 %v3913_v32 }
 0x6d2   :  { %4532 = vpow2.f32 %v3914_v33 }
 0x6d3   :  { %4534 = vtanh.f32 %v675_v29 }
 0x6d4   :  { %4536 = vtanh.f32 %v676_v30 }
 0x6de   :  { %v4531_v34 = vpop.eup %4530 }
 0x6df   :  { %v4533_v35 = vpop.eup %4532  ;;  %v685_v36 = vadd.f32 1.0, %v4531_v34 }
 0x6e0   :  { %v686_v37 = vadd.f32 1.0, %v4533_v35  ;;  %v4535_v38 = vpop.eup %4534 }
 0x6e1   :  { %4538 = vrcp.f32 %v685_v36  ;;  %v4537_v39 = vpop.eup %4536  ;;  %v693_v41 = vrot.slane %v4535_v38, 2 }
 0x6e2   :  { %4540 = vrcp.f32 %v686_v37  ;;  %v694_v42 = vrot.slane %v4537_v39, 1 }
 0x6e4   :  { %v695_v47 = vsel %vm442_vm5, %v694_v42, %v693_v41 }
 0x6ee   :  { %v4539_v40 = vpop.eup %4538 }
 0x6ef   :  { %v4541_v43 = vpop.eup %4540  ;;  %v699_v45 = vrot.slane %v4539_v40, 2 }
 0x6f0   :  { %v700_v46 = vrot.slane %v4541_v43, 1 }
 0x6f2   :  { %v701_v48 = vsel %vm442_vm5, %v700_v46, %v699_v45 }
 0x6f3   :  { %v703_v49 = vsel %vm5179_vm6, %v695_v47, %v701_v48 }
 0x6f4   :  { %706 = vrot.lane.b32.xlu0 %v703_v49, %s5003_s6  ;;  %v704_v52 = vmul.f32 %v703_v49, %v586_v17 }
 0x766   :  { %v707_v50 = vpop.permute.xlu0 %706 }
 0x767   :  { %v709_v51 = vmul.f32 %v707_v50, %v703_v49 }
 0x769   :  { %711 = vrot.lane.b32.xlu1 %v709_v51, %s5004_s15 }
 0x7db   :  { %v712_v53 = vpop.permute.xlu1 %711 }
 0x7dc   :  { %v5241_v54 = vadd.f32 %v712_v53, %v704_v52 }
 0x7de   :  { %4542 = vtanh.f32 %v5241_v54 }
 0x7eb   :  { %v4543_v57 = vpop.eup %4542 }
 0x7ec   :  { %717 = vrot.lane.b32.xlu0 %v4543_v57, %s5003_s6 }
 0x85e   :  { %v718_v58 = vpop.permute.xlu0 %717 }
 0x85f   :  { %v720_v59 = vmul.f32 %v718_v58, %v703_v49 }
 0x861   :  { %v2387_v60 = vrot.slane %v720_v59, 4  ;;  %722 = vrot.lane.b32.xlu1 %v720_v59, %s5004_s15 }
 0x863   :  { %v2401_v62 = vsel %vm2400_vm9, %v2399_v61, %v2387_v60 }
 0x8d3   :  { %v723_v63 = vpop.permute.xlu1 %722 }
 0x8d4   :  { %4221 = vmatmul.mubr.msk.f32.vlgmr.msra.gmra.mxu1 %vm332_vm7, %v723_v63 }
 0x8d5   :  { %4235 = vmatpush3.msra.mxu1 %v5136_v4  ;;  %4242 = vmatprep.mubr.msk.f32.mxu1 %vm5002_vm2, %v5001_v5 }
 0x8d6   :  { %4236 = vmatprep.subr.mxu1 %v5001_v5 }
 0x8d7   :  { %4237 = vmatpush3.msra.mxu1 %v5141_v6 }
 0x8d8   :  { %4238 = vmatprep.subr.mxu1 %v5001_v5 }
 0x8d9   :  { %4239 = vmatpush3.msra.mxu1 %v5147_v7 }
 0x8da   :  { %4240 = vmatprep.subr.mxu1 %v5001_v5 }
 0x8db   :  { %4241 = vmatpush3.msra.mxu1 %v5151_v8 }
 0x8dc   :  { %4256 = vmatprep.subr.mxu1 %v5001_v5 }
 0x994   :  { %v792_v1 = vpop.f32.mrf.mxu1 }
 0x995   :  { %v797_v2 = vrot.slane %v792_v1, 5  ;;  %v798_v12 = vrot.slane %v792_v1, 6 }
 0x996   :  { %v4222_v13 = vpop.f32.mrf.mxu1 }
 0x997   :  { %v801_v14 = vadd.f32 %v797_v2, %v5170_v10  ;;  %v802_v15 = vadd.f32 %v5168_v9, %v798_v12 }
 0x999   :  { %v803_v16 = vadd.f32 %v5172_v11, %v801_v14  ;;  %v804_v17 = vadd.f32 %v5172_v11, %v802_v15 }
 0x99b   :  { %v3916_v18 = vmul.f32 -1.442695, %v803_v16  ;;  %v3917_v19 = vmul.f32 -1.442695, %v804_v17 }
 0x99d   :  { %4544 = vpow2.f32 %v3916_v18 }
 0x99e   :  { %4546 = vpow2.f32 %v3917_v19 }
 0x99f   :  { %4548 = vtanh.f32 %v803_v16 }
 0x9a0   :  { %4550 = vtanh.f32 %v804_v17 }
 0x9aa   :  { %v4545_v20 = vpop.eup %4544 }
 0x9ab   :  { %v4547_v21 = vpop.eup %4546  ;;  %v813_v22 = vadd.f32 1.0, %v4545_v20 }
 0x9ac   :  { %v814_v23 = vadd.f32 1.0, %v4547_v21  ;;  %v4549_v24 = vpop.eup %4548 }
 0x9ad   :  { %4552 = vrcp.f32 %v813_v22  ;;  %v4551_v26 = vpop.eup %4550  ;;  %v821_v28 = vrot.slane %v4549_v24, 3 }
 0x9ae   :  { %4554 = vrcp.f32 %v814_v23  ;;  %v822_v29 = vrot.slane %v4551_v26, 2 }
 0x9b0   :  { %v823_v34 = vsel %vm442_vm5, %v822_v29, %v821_v28 }
 0x9ba   :  { %v4553_v27 = vpop.eup %4552 }
 0x9bb   :  { %v4555_v30 = vpop.eup %4554  ;;  %v827_v32 = vrot.slane %v4553_v27, 3 }
 0x9bc   :  { %v828_v33 = vrot.slane %v4555_v30, 2 }
 0x9be   :  { %v829_v35 = vsel %vm442_vm5, %v828_v33, %v827_v32 }
 0x9bf   :  { %v831_v36 = vsel %vm5179_vm6, %v823_v34, %v829_v35 }
 0x9c0   :  { %834 = vrot.lane.b32.xlu0 %v831_v36, %s5003_s6  ;;  %v832_v39 = vmul.f32 %v831_v36, %v5241_v54 }
 0xa32   :  { %v835_v37 = vpop.permute.xlu0 %834 }
 0xa33   :  { %v837_v38 = vmul.f32 %v835_v37, %v831_v36 }
 0xa35   :  { %839 = vrot.lane.b32.xlu1 %v837_v38, %s5004_s15 }
 0xaa7   :  { %v840_v40 = vpop.permute.xlu1 %839 }
 0xaa8   :  { %v842_v41 = vadd.f32 %v840_v40, %v832_v39 }
 0xaaa   :  { %4556 = vtanh.f32 %v842_v41 }
 0xab7   :  { %v4557_v42 = vpop.eup %4556 }
 0xab8   :  { %845 = vrot.lane.b32.xlu0 %v4557_v42, %s5003_s6 }
 0xb2a   :  { %v846_v43 = vpop.permute.xlu0 %845 }
 0xb2b   :  { %v848_v45 = vmul.f32 %v846_v43, %v831_v36 }
 0xb2d   :  { %v2389_v46 = vrot.slane %v848_v45, 2  ;;  %850 = vrot.lane.b32.xlu1 %v848_v45, %s5004_s15 }
 0xb2f   :  { %v5294_v47 = vsel %vm2402_vm10, %v2401_v62, %v2389_v46 }
 0xb9f   :  { %v851_v48 = vpop.permute.xlu1 %850 }
 0xba0   :  { %4232 = vmatmul.mubr.msk.f32.vlgmr.msra.gmra.mxu0 %vm332_vm7, %v851_v48 }
 0xba1   :  { %4246 = vmatpush3.msra.mxu0 %v5136_v4  ;;  %4253 = vmatprep.mubr.msk.f32.mxu0 %vm5002_vm2, %v5001_v5 }
 0xba2   :  { %4247 = vmatprep.subr.mxu0 %v5001_v5 }
 0xba3   :  { %4248 = vmatpush3.msra.mxu0 %v5141_v6 }
 0xba4   :  { %4249 = vmatprep.subr.mxu0 %v5001_v5 }
 0xba5   :  { %4250 = vmatpush3.msra.mxu0 %v5147_v7 }
 0xba6   :  { %4251 = vmatprep.subr.mxu0 %v5001_v5 }
 0xba7   :  { %4252 = vmatpush3.msra.mxu0 %v5151_v8 }
 0xba8   :  { %4267 = vmatprep.subr.mxu0 %v5001_v5 }
 0xc60   :  { %v920_v49 = vpop.f32.mrf.mxu0 }
 0xc61   :  { %v925_v50 = vrot.slane %v920_v49, 4  ;;  %v926_v51 = vrot.slane %v920_v49, 5 }
 0xc62   :  { %v4233_v52 = vpop.f32.mrf.mxu0 }
 0xc63   :  { %v929_v53 = vadd.f32 %v925_v50, %v5170_v10  ;;  %v930_v54 = vadd.f32 %v5168_v9, %v926_v51 }
 0xc65   :  { %v931_v55 = vadd.f32 %v5172_v11, %v929_v53  ;;  %v932_v56 = vadd.f32 %v5172_v11, %v930_v54 }
 0xc67   :  { %v3919_v57 = vmul.f32 -1.442695, %v931_v55  ;;  %v3920_v3 = vmul.f32 -1.442695, %v932_v56 }
 0xc69   :  { %4558 = vpow2.f32 %v3919_v57 }
 0xc6a   :  { %4560 = vpow2.f32 %v3920_v3 }
 0xc6b   :  { %4562 = vtanh.f32 %v931_v55 }
 0xc6c   :  { %4564 = vtanh.f32 %v932_v56 }
 0xc76   :  { %v4559_v58 = vpop.eup %4558 }
 0xc77   :  { %v4561_v59 = vpop.eup %4560  ;;  %v941_v60 = vadd.f32 1.0, %v4559_v58 }
 0xc78   :  { %v942_v61 = vadd.f32 1.0, %v4561_v59  ;;  %v4563_v62 = vpop.eup %4562 }
 0xc79   :  { %4566 = vrcp.f32 %v941_v60  ;;  %v4565_v63 = vpop.eup %4564  ;;  %v949_v2 = vrot.slane %v4563_v62, 4  ;;  %v5351_v60 = vld [vmem:[#allocation11 + $0x18] sm:$0xff]  ;;  %v5354_v62 = vld [vmem:[#allocation11 + $0x10] sm:$0xff] }
 0xc7a   :  { %4568 = vrcp.f32 %v942_v61  ;;  %v950_v12 = vrot.slane %v4565_v63, 3  ;;  %v5360_v63 = vld [vmem:[#allocation11 + $0x8] sm:$0xff] }
 0xc7c   :  { %v951_v16 = vsel %vm442_vm5, %v950_v12, %v949_v2 }
 0xc86   :  { %v4567_v1 = vpop.eup %4566 }
 0xc87   :  { %v4569_v13 = vpop.eup %4568  ;;  %v955_v14 = vrot.slane %v4567_v1, 4  ;;  %v5364_v1 = vld [vmem:[#allocation11] sm:$0xff] }
 0xc88   :  { %v956_v15 = vrot.slane %v4569_v13, 3 }
 0xc8a   :  { %v957_v17 = vsel %vm442_vm5, %v956_v15, %v955_v14 }
 0xc8b   :  { %v959_v18 = vsel %vm5179_vm6, %v951_v16, %v957_v17 }
 0xc8c   :  { %962 = vrot.lane.b32.xlu0 %v959_v18, %s5003_s6  ;;  %v960_v21 = vmul.f32 %v959_v18, %v842_v41 }
 0xcfe   :  { %v963_v19 = vpop.permute.xlu0 %962 }
 0xcff   :  { %v965_v20 = vmul.f32 %v963_v19, %v959_v18 }
 0xd01   :  { %967 = vrot.lane.b32.xlu1 %v965_v20, %s5004_s15 }
 0xd73   :  { %v968_v22 = vpop.permute.xlu1 %967 }
 0xd74   :  { %v970_v23 = vadd.f32 %v968_v22, %v960_v21 }
 0xd76   :  { %4570 = vtanh.f32 %v970_v23 }
 0xd83   :  { %v4571_v24 = vpop.eup %4570 }
 0xd84   :  { %973 = vrot.lane.b32.xlu0 %v4571_v24, %s5003_s6  ;;  %v5385_v24 = vld [vmem:[#allocation13] ss:$0 sm:$0xff] }
 0xdf6   :  { %v974_v26 = vpop.permute.xlu0 %973 }
 0xdf7   :  { %v5318_v27 = vmul.f32 %v974_v26, %v959_v18 }
 0xdf9   :  { %978 = vrot.lane.b32.xlu1 %v5318_v27, %s5004_s15 }
 0xe6b   :  { %v979_v28 = vpop.permute.xlu1 %978 }
 0xe6c   :  { %4243 = vmatmul.mubr.msk.f32.vlgmr.msra.gmra.mxu1 %vm332_vm7, %v979_v28 }
 0xe6d   :  { %4257 = vmatpush3.msra.mxu1 %v5136_v4  ;;  %4264 = vmatprep.mubr.msk.f32.mxu1 %vm5002_vm2, %v5001_v5 }
 0xe6e   :  { %4258 = vmatprep.subr.mxu1 %v5001_v5 }
 0xe6f   :  { %4259 = vmatpush3.msra.mxu1 %v5141_v6 }
 0xe70   :  { %4260 = vmatprep.subr.mxu1 %v5001_v5 }
 0xe71   :  { %4261 = vmatpush3.msra.mxu1 %v5147_v7 }
 0xe72   :  { %4262 = vmatprep.subr.mxu1 %v5001_v5 }
 0xe73   :  { %4263 = vmatpush3.msra.mxu1 %v5151_v8 }
 0xe74   :  { %4278 = vmatprep.subr.mxu1 %v5001_v5 }
 0xf2c   :  { %v1048_v29 = vpop.f32.mrf.mxu1 }
 0xf2d   :  { %v1053_v30 = vrot.slane %v1048_v29, 3  ;;  %v1054_v4 = vrot.slane %v1048_v29, 4 }
 0xf2e   :  { %v4244_v32 = vpop.f32.mrf.mxu1 }
 0xf2f   :  { %v1057_v33 = vadd.f32 %v1053_v30, %v5170_v10  ;;  %v1058_v34 = vadd.f32 %v5168_v9, %v1054_v4 }
 0xf31   :  { %v1059_v6 = vadd.f32 %v5172_v11, %v1057_v33  ;;  %v1060_v35 = vadd.f32 %v5172_v11, %v1058_v34 }
 0xf33   :  { %v3922_v36 = vmul.f32 -1.442695, %v1059_v6  ;;  %v3923_v7 = vmul.f32 -1.442695, %v1060_v35 }
 0xf35   :  { %4572 = vpow2.f32 %v3922_v36 }
 0xf36   :  { %4574 = vpow2.f32 %v3923_v7 }
 0xf37   :  { %4576 = vtanh.f32 %v1059_v6 }
 0xf38   :  { %4578 = vtanh.f32 %v1060_v35 }
 0xf42   :  { %v4573_v8 = vpop.eup %4572 }
 0xf43   :  { %v4575_v37 = vpop.eup %4574  ;;  %v1069_v38 = vadd.f32 1.0, %v4573_v8 }
 0xf44   :  { %v1070_v39 = vadd.f32 1.0, %v4575_v37  ;;  %v4577_v40 = vpop.eup %4576 }
 0xf45   :  { %4580 = vrcp.f32 %v1069_v38  ;;  %v4579_v41 = vpop.eup %4578  ;;  %v1077_v43 = vrot.slane %v4577_v40, 5 }
 0xf46   :  { %4582 = vrcp.f32 %v1070_v39  ;;  %v1078_v45 = vrot.slane %v4579_v41, 4 }
 0xf48   :  { %v1079_v50 = vsel %vm442_vm5, %v1078_v45, %v1077_v43 }
 0xf52   :  { %v4581_v42 = vpop.eup %4580 }
 0xf53   :  { %v4583_v46 = vpop.eup %4582  ;;  %v1083_v48 = vrot.slane %v4581_v42, 5 }
 0xf54   :  { %v1084_v49 = vrot.slane %v4583_v46, 4 }
 0xf56   :  { %v1085_v51 = vsel %vm442_vm5, %v1084_v49, %v1083_v48 }
 0xf57   :  { %v1087_v52 = vsel %vm5179_vm6, %v1079_v50, %v1085_v51 }
 0xf58   :  { %1090 = vrot.lane.b32.xlu0 %v1087_v52, %s5003_s6  ;;  %v1088_v55 = vmul.f32 %v1087_v52, %v970_v23 }
 0xfca   :  { %v1091_v53 = vpop.permute.xlu0 %1090 }
 0xfcb   :  { %v1093_v54 = vmul.f32 %v1091_v53, %v1087_v52 }
 0xfcd   :  { %1095 = vrot.lane.b32.xlu1 %v1093_v54, %s5004_s15 }
0x103f   :  { %v1096_v56 = vpop.permute.xlu1 %1095 }
0x1040   :  { %v5343_v57 = vadd.f32 %v1096_v56, %v1088_v55 }
0x1042   :  { %4584 = vtanh.f32 %v5343_v57 }
0x104f   :  { %v4585_v3 = vpop.eup %4584 }
0x1050   :  { %1101 = vrot.lane.b32.xlu0 %v4585_v3, %s5003_s6 }
0x10c2   :  { %v1102_v58 = vpop.permute.xlu0 %1101 }
0x10c3   :  { %v5347_v59 = vmul.f32 %v1102_v58, %v1087_v52 }
0x10c5   :  { %1106 = vrot.lane.b32.xlu1 %v5347_v59, %s5004_s15 }
0x1137   :  { %v1107_v61 = vpop.permute.xlu1 %1106 }
0x1138   :  { %4254 = vmatmul.mubr.msk.f32.vlgmr.msra.gmra.mxu0 %vm332_vm7, %v1107_v61 }
0x1139   :  { %4268 = vmatpush3.msra.mxu0 %v5351_v60  ;;  %4275 = vmatprep.mubr.msk.f32.mxu0 %vm5002_vm2, %v5001_v5 }
0x113a   :  { %4269 = vmatprep.subr.mxu0 %v5001_v5 }
0x113b   :  { %4270 = vmatpush3.msra.mxu0 %v5354_v62 }
0x113c   :  { %4271 = vmatprep.subr.mxu0 %v5001_v5 }
0x113d   :  { %4272 = vmatpush3.msra.mxu0 %v5360_v63 }
0x113e   :  { %4273 = vmatprep.subr.mxu0 %v5001_v5 }
0x113f   :  { %4274 = vmatpush3.msra.mxu0 %v5364_v1 }
0x1140   :  { %4276 = vmatmul.mubr.f32.vlgmr.msra.gmra.mxu0 %v5001_v5  ;;  %4289 = vmatprep.subr.mxu0 %v5001_v5 }
0x1141   :  { %4290 = vmatpush3.msra.mxu0 %v5351_v60  ;;  %4297 = vmatprep.mubr.msk.f32.mxu0 %vm5002_vm2, %v5001_v5 }
0x1142   :  { %4291 = vmatprep.subr.mxu0 %v5001_v5 }
0x1143   :  { %4292 = vmatpush3.msra.mxu0 %v5354_v62 }
0x1144   :  { %4293 = vmatprep.subr.mxu0 %v5001_v5 }
0x1145   :  { %4294 = vmatpush3.msra.mxu0 %v5360_v63 }
0x1146   :  { %4295 = vmatprep.subr.mxu0 %v5001_v5 }
0x1147   :  { %4296 = vmatpush3.msra.mxu0 %v5364_v1 }
0x1148   :  { %4311 = vmatprep.subr.mxu0 %v5001_v5 }
0x11f8   :  { %v1176_v2 = vpop.f32.mrf.mxu0 }
0x11f9   :  { %v1181_v12 = vrot.slane %v1176_v2, 2  ;;  %v1182_v13 = vrot.slane %v1176_v2, 3 }
0x11fa   :  { %v4255_v14 = vpop.f32.mrf.mxu0 }
0x11fb   :  { %v1185_v15 = vadd.f32 %v1181_v12, %v5170_v10  ;;  %v1186_v16 = vadd.f32 %v5168_v9, %v1182_v13 }
0x11fd   :  { %v1187_v17 = vadd.f32 %v5172_v11, %v1185_v15  ;;  %v1188_v18 = vadd.f32 %v5172_v11, %v1186_v16 }
0x11ff   :  { %v3925_v19 = vmul.f32 -1.442695, %v1187_v17  ;;  %v3926_v20 = vmul.f32 -1.442695, %v1188_v18 }
0x1200   :  { %v1432_v21 = vpop.f32.mrf.mxu0 }
0x1201   :  { %4586 = vpow2.f32 %v3925_v19  ;;  %v1437_v22 = vrot.slane %v1432_v21, 1  ;;  %v1438_v23 = vrot.slane %v1432_v21, 2 }
0x1202   :  { %4588 = vpow2.f32 %v3926_v20  ;;  %v4277_v26 = vpop.f32.mrf.mxu0 }
0x1203   :  { %v1441_v28 = vadd.f32 %v1437_v22, %v5278_v0  ;;  %v1442_v29 = vadd.f32 %v5276_v44, %v1438_v23 }
0x1205   :  { %v1449_v30 = vadd.f32 %v5385_v24, %v1441_v28  ;;  %v1450_v4 = vadd.f32 %v5385_v24, %v1442_v29  ;;  %v2391_v28 = vrot.slane %v5347_v59, 6 }
0x1207   :  { %v3931_v32 = vmul.f32 -1.442695, %v1449_v30  ;;  %v3932_v11 = vmul.f32 -1.442695, %v1450_v4 }
0x1209   :  { %4590 = vpow2.f32 %v3931_v32 }
0x120a   :  { %4592 = vpow2.f32 %v3932_v11 }
0x120b   :  { %4594 = vtanh.f32 %v1187_v17 }
0x120c   :  { %4596 = vtanh.f32 %v1188_v18 }
0x120e   :  { %v4587_v33 = vpop.eup %4586 }
0x120f   :  { %v4589_v34 = vpop.eup %4588  ;;  %v1197_v6 = vadd.f32 1.0, %v4587_v33 }
0x1210   :  { %v1198_v35 = vadd.f32 1.0, %v4589_v34 }
0x1211   :  { %4598 = vrcp.f32 %v1197_v6 }
0x1212   :  { %4600 = vrcp.f32 %v1198_v35 }
0x1213   :  { %4602 = vtanh.f32 %v1449_v30 }
0x1214   :  { %4604 = vtanh.f32 %v1450_v4  ;;  %v2404_v4 = vsel %vm2398_vm8, %v5318_v27, %v2391_v28 }
0x1216   :  { %v4591_v36 = vpop.eup %4590 }
0x1217   :  { %v4593_v7 = vpop.eup %4592  ;;  %v1459_v8 = vadd.f32 1.0, %v4591_v36 }
0x1218   :  { %v1460_v37 = vadd.f32 1.0, %v4593_v7  ;;  %v4595_v38 = vpop.eup %4594 }
0x1219   :  { %4606 = vrcp.f32 %v1459_v8  ;;  %v4597_v39 = vpop.eup %4596  ;;  %v1205_v41 = vrot.slane %v4595_v38, 6 }
0x121a   :  { %4608 = vrcp.f32 %v1460_v37  ;;  %v1206_v42 = vrot.slane %v4597_v39, 5 }
0x121c   :  { %v1207_v49 = vsel %vm442_vm5, %v1206_v42, %v1205_v41 }
0x121e   :  { %v4599_v40 = vpop.eup %4598 }
0x121f   :  { %v4601_v43 = vpop.eup %4600  ;;  %v1211_v45 = vrot.slane %v4599_v40, 6 }
0x1220   :  { %v1212_v46 = vrot.slane %v4601_v43, 5  ;;  %v4603_v48 = vpop.eup %4602 }
0x1221   :  { %v4605_v51 = vpop.eup %4604  ;;  %v1467_v54 = vrot.slane %v4603_v48, 7 }
0x1222   :  { %v1213_v50 = vsel %vm442_vm5, %v1212_v46, %v1211_v45  ;;  %v1468_v55 = vrot.slane %v4605_v51, 6 }
0x1223   :  { %v1215_v52 = vsel %vm5179_vm6, %v1207_v49, %v1213_v50 }
0x1224   :  { %1218 = vrot.lane.b32.xlu0 %v1215_v52, %s5003_s6  ;;  %v1469_v61 = vsel %vm442_vm5, %v1468_v55, %v1467_v54  ;;  %v1216_v17 = vmul.f32 %v1215_v52, %v5343_v57 }
0x1226   :  { %v4607_v53 = vpop.eup %4606 }
0x1227   :  { %v4609_v56 = vpop.eup %4608  ;;  %v1473_v3 = vrot.slane %v4607_v53, 7 }
0x1228   :  { %v1474_v58 = vrot.slane %v4609_v56, 6 }
0x122a   :  { %v1475_v2 = vsel %vm442_vm5, %v1474_v58, %v1473_v3 }
0x122b   :  { %v1477_v12 = vsel %vm5179_vm6, %v1469_v61, %v1475_v2 }
0x122c   :  { %1480 = vrot.lane.b32.xlu1 %v1477_v12, %s5003_s6  ;;  %v1478_v20 = vmul.f32 0.0, %v1477_v12 }
0x1296   :  { %v1219_v13 = vpop.permute.xlu0 %1218 }
0x1297   :  { %v1221_v14 = vmul.f32 %v1219_v13, %v1215_v52 }
0x1299   :  { %1223 = vrot.lane.b32.xlu0 %v1221_v14, %s5004_s15 }
0x129e   :  { %v1481_v15 = vpop.permute.xlu1 %1480 }
0x129f   :  { %v1483_v16 = vmul.f32 %v1481_v15, %v1477_v12 }
0x12a1   :  { %1485 = vrot.lane.b32.xlu1 %v1483_v16, %s5004_s15 }
0x130b   :  { %v1224_v18 = vpop.permute.xlu0 %1223 }
0x130c   :  { %v5404_v19 = vadd.f32 %v1224_v18, %v1216_v17 }
0x130e   :  { %4610 = vtanh.f32 %v5404_v19 }
0x1313   :  { %v1486_v21 = vpop.permute.xlu1 %1485 }
0x1314   :  { %v5407_v22 = vadd.f32 %v1486_v21, %v1478_v20 }
0x1316   :  { %4612 = vtanh.f32 %v5407_v22 }
0x131b   :  { %v4611_v23 = vpop.eup %4610 }
0x131c   :  { %1229 = vrot.lane.b32.xlu0 %v4611_v23, %s5003_s6 }
0x1323   :  { %v4613_v26 = vpop.eup %4612 }
0x1324   :  { %1491 = vrot.lane.b32.xlu1 %v4613_v26, %s5003_s6 }
0x138e   :  { %v1230_v57 = vpop.permute.xlu0 %1229 }
0x138f   :  { %v1232_v29 = vmul.f32 %v1230_v57, %v1215_v52 }
0x1391   :  { %v2393_v30 = vrot.slane %v1232_v29, 4  ;;  %1234 = vrot.lane.b32.xlu0 %v1232_v29, %s5004_s15 }
0x1393   :  { %v5417_v32 = vsel %vm2400_vm9, %v2404_v4, %v2393_v30 }
0x1396   :  { %v1492_v11 = vpop.permute.xlu1 %1491 }
0x1397   :  { %v5419_v33 = vmul.f32 %v1492_v11, %v1477_v12 }
0x1399   :  { %1496 = vrot.lane.b32.xlu1 %v5419_v33, %s5004_s15 }
0x1403   :  { %v1235_v34 = vpop.permute.xlu0 %1234 }
0x1404   :  { %4265 = vmatmul.mubr.msk.f32.vlgmr.msra.gmra.mxu1 %vm332_vm7, %v1235_v34 }
0x1405   :  { %4279 = vmatpush3.msra.mxu1 %v5351_v60  ;;  %4286 = vmatprep.mubr.msk.f32.mxu1 %vm5002_vm2, %v5001_v5 }
0x1406   :  { %4280 = vmatprep.subr.mxu1 %v5001_v5 }
0x1407   :  { %4281 = vmatpush3.msra.mxu1 %v5354_v62 }
0x1408   :  { %4282 = vmatprep.subr.mxu1 %v5001_v5 }
0x1409   :  { %4283 = vmatpush3.msra.mxu1 %v5360_v63 }
0x140a   :  { %4284 = vmatprep.subr.mxu1 %v5001_v5 }
0x140b   :  { %4285 = vmatpush3.msra.mxu1 %v5364_v1  ;;  %v5433_v27 = vpop.permute.xlu1 %1496 }
0x140c   :  { %4287 = vmatmul.mubr.msk.f32.vlgmr.msra.gmra.mxu1 %vm332_vm7, %v5433_v27  ;;  %4300 = vmatprep.subr.mxu1 %v5001_v5 }
0x140d   :  { %4301 = vmatpush3.msra.mxu1 %v5351_v60  ;;  %4308 = vmatprep.mubr.msk.f32.mxu1 %vm5002_vm2, %v5001_v5 }
0x140e   :  { %4302 = vmatprep.subr.mxu1 %v5001_v5 }
0x140f   :  { %4303 = vmatpush3.msra.mxu1 %v5354_v62 }
0x1410   :  { %4304 = vmatprep.subr.mxu1 %v5001_v5 }
0x1411   :  { %4305 = vmatpush3.msra.mxu1 %v5360_v63 }
0x1412   :  { %4306 = vmatprep.subr.mxu1 %v5001_v5 }
0x1413   :  { %4307 = vmatpush3.msra.mxu1 %v5364_v1 }
0x1414   :  { %4322 = vmatprep.subr.mxu1 %v5001_v5 }
0x14c4   :  { %v5448_v59 = vpop.f32.mrf.mxu1 }
0x14c6   :  { %v4266_v6 = vpop.f32.mrf.mxu1 }
0x14cc   :  { %v1566_v35 = vpop.f32.mrf.mxu1 }
0x14cd   :  { %v1571_v36 = vrot.slane %v1566_v35, 2  ;;  %v1572_v7 = vrot.slane %v1566_v35, 3 }
0x14ce   :  { %v4288_v8 = vpop.f32.mrf.mxu1 }
0x14cf   :  { %v1575_v37 = vadd.f32 %v1571_v36, %v5278_v0  ;;  %v1576_v38 = vadd.f32 %v5276_v44, %v1572_v7 }
0x14d1   :  { %v1577_v39 = vadd.f32 %v5385_v24, %v1575_v37  ;;  %v1578_v40 = vadd.f32 %v5385_v24, %v1576_v38 }
0x14d3   :  { %v3934_v41 = vmul.f32 -1.442695, %v1577_v39  ;;  %v3935_v42 = vmul.f32 -1.442695, %v1578_v40 }
0x14d5   :  { %4614 = vpow2.f32 %v3934_v41 }
0x14d6   :  { %4616 = vpow2.f32 %v3935_v42 }
0x14d7   :  { %4618 = vtanh.f32 %v1577_v39 }
0x14d8   :  { %4620 = vtanh.f32 %v1578_v40 }
0x14e2   :  { %v4615_v43 = vpop.eup %4614 }
0x14e3   :  { %v4617_v45 = vpop.eup %4616  ;;  %v1587_v46 = vadd.f32 1.0, %v4615_v43 }
0x14e4   :  { %v1588_v48 = vadd.f32 1.0, %v4617_v45  ;;  %v4619_v49 = vpop.eup %4618 }
0x14e5   :  { %4622 = vrcp.f32 %v1587_v46  ;;  %v4621_v50 = vpop.eup %4620  ;;  %v1595_v52 = vrot.slane %v4619_v49, 6 }
0x14e6   :  { %4624 = vrcp.f32 %v1588_v48  ;;  %v1596_v53 = vrot.slane %v4621_v50, 5 }
0x14e8   :  { %v1597_v3 = vsel %vm442_vm5, %v1596_v53, %v1595_v52 }
0x14f2   :  { %v4623_v51 = vpop.eup %4622 }
0x14f3   :  { %v4625_v54 = vpop.eup %4624  ;;  %v1601_v55 = vrot.slane %v4623_v51, 6 }
0x14f4   :  { %v1602_v56 = vrot.slane %v4625_v54, 5 }
0x14f6   :  { %v1603_v58 = vsel %vm442_vm5, %v1602_v56, %v1601_v55 }
0x14f7   :  { %v1605_v61 = vsel %vm5179_vm6, %v1597_v3, %v1603_v58 }
0x14f8   :  { %1608 = vrot.lane.b32.xlu0 %v1605_v61, %s5003_s6  ;;  %v1606_v13 = vmul.f32 %v1605_v61, %v5407_v22 }
0x156a   :  { %v1609_v2 = vpop.permute.xlu0 %1608 }
0x156b   :  { %v1611_v12 = vmul.f32 %v1609_v2, %v1605_v61 }
0x156d   :  { %1613 = vrot.lane.b32.xlu1 %v1611_v12, %s5004_s15 }
0x15df   :  { %v1614_v14 = vpop.permute.xlu1 %1613 }
0x15e0   :  { %v1616_v15 = vadd.f32 %v1614_v14, %v1606_v13 }
0x15e2   :  { %4626 = vtanh.f32 %v1616_v15 }
0x15ef   :  { %v4627_v16 = vpop.eup %4626 }
0x15f0   :  { %1619 = vrot.lane.b32.xlu0 %v4627_v16, %s5003_s6 }
0x1662   :  { %v1620_v17 = vpop.permute.xlu0 %1619 }
0x1663   :  { %v5462_v18 = vmul.f32 %v1620_v17, %v1605_v61 }
0x1665   :  { %1624 = vrot.lane.b32.xlu1 %v5462_v18, %s5004_s15 }
0x16d7   :  { %v1625_v20 = vpop.permute.xlu1 %1624 }
0x16d8   :  { %4298 = vmatmul.mubr.msk.f32.vlgmr.msra.gmra.mxu0 %vm332_vm7, %v1625_v20 }
0x16d9   :  { %4312 = vmatpush3.msra.mxu0 %v5351_v60  ;;  %4319 = vmatprep.mubr.msk.f32.mxu0 %vm5002_vm2, %v5001_v5 }
0x16da   :  { %4313 = vmatprep.subr.mxu0 %v5001_v5 }
0x16db   :  { %4314 = vmatpush3.msra.mxu0 %v5354_v62 }
0x16dc   :  { %4315 = vmatprep.subr.mxu0 %v5001_v5 }
0x16dd   :  { %4316 = vmatpush3.msra.mxu0 %v5360_v63 }
0x16de   :  { %4317 = vmatprep.subr.mxu0 %v5001_v5 }
0x16df   :  { %4318 = vmatpush3.msra.mxu0 %v5364_v1 }
0x16e0   :  { %4333 = vmatprep.subr.mxu0 %v5001_v5 }
0x1798   :  { %v1694_v21 = vpop.f32.mrf.mxu0 }
0x1799   :  { %v1699_v22 = vrot.slane %v1694_v21, 3  ;;  %v1700_v23 = vrot.slane %v1694_v21, 4 }
0x179a   :  { %v4299_v26 = vpop.f32.mrf.mxu0 }
0x179b   :  { %v1703_v28 = vadd.f32 %v1699_v22, %v5278_v0  ;;  %v1704_v57 = vadd.f32 %v5276_v44, %v1700_v23 }
0x179d   :  { %v1705_v29 = vadd.f32 %v5385_v24, %v1703_v28  ;;  %v1706_v30 = vadd.f32 %v5385_v24, %v1704_v57 }
0x179f   :  { %v3937_v4 = vmul.f32 -1.442695, %v1705_v29  ;;  %v3938_v11 = vmul.f32 -1.442695, %v1706_v30 }
0x17a1   :  { %4628 = vpow2.f32 %v3937_v4 }
0x17a2   :  { %4630 = vpow2.f32 %v3938_v11 }
0x17a3   :  { %4632 = vtanh.f32 %v1705_v29 }
0x17a4   :  { %4634 = vtanh.f32 %v1706_v30 }
0x17ae   :  { %v4629_v34 = vpop.eup %4628 }
0x17af   :  { %v4631_v6 = vpop.eup %4630  ;;  %v1715_v35 = vadd.f32 1.0, %v4629_v34 }
0x17b0   :  { %v1716_v36 = vadd.f32 1.0, %v4631_v6  ;;  %v4633_v7 = vpop.eup %4632 }
0x17b1   :  { %4636 = vrcp.f32 %v1715_v35  ;;  %v4635_v8 = vpop.eup %4634  ;;  %v1723_v38 = vrot.slane %v4633_v7, 5 }
0x17b2   :  { %4638 = vrcp.f32 %v1716_v36  ;;  %v1724_v39 = vrot.slane %v4635_v8, 4 }
0x17b4   :  { %v1725_v43 = vsel %vm442_vm5, %v1724_v39, %v1723_v38 }
0x17be   :  { %v4637_v37 = vpop.eup %4636 }
0x17bf   :  { %v4639_v40 = vpop.eup %4638  ;;  %v1729_v41 = vrot.slane %v4637_v37, 5 }
0x17c0   :  { %v1730_v42 = vrot.slane %v4639_v40, 4 }
0x17c2   :  { %v1731_v45 = vsel %vm442_vm5, %v1730_v42, %v1729_v41 }
0x17c3   :  { %v1733_v46 = vsel %vm5179_vm6, %v1725_v43, %v1731_v45  ;;  %v2415_v45 = vrot.slane %v5462_v18, 4 }
0x17c4   :  { %1736 = vrot.lane.b32.xlu0 %v1733_v46, %s5003_s6  ;;  %v1734_v50 = vmul.f32 %v1733_v46, %v1616_v15 }
0x1836   :  { %v1737_v48 = vpop.permute.xlu0 %1736 }
0x1837   :  { %v1739_v49 = vmul.f32 %v1737_v48, %v1733_v46 }
0x1839   :  { %1741 = vrot.lane.b32.xlu1 %v1739_v49, %s5004_s15 }
0x18ab   :  { %v1742_v51 = vpop.permute.xlu1 %1741 }
0x18ac   :  { %v1744_v52 = vadd.f32 %v1742_v51, %v1734_v50 }
0x18ae   :  { %4640 = vtanh.f32 %v1744_v52 }
0x18bb   :  { %v4641_v53 = vpop.eup %4640 }
0x18bc   :  { %1747 = vrot.lane.b32.xlu0 %v4641_v53, %s5003_s6 }
0x192e   :  { %v1748_v54 = vpop.permute.xlu0 %1747 }
0x192f   :  { %v1750_v55 = vmul.f32 %v1748_v54, %v1733_v46  ;;  %v2417_v46 = vrot.slane %v5419_v33, 2 }
0x1931   :  { %1752 = vrot.lane.b32.xlu1 %v1750_v55, %s5004_s15  ;;  %v2413_v42 = vrot.slane %v1750_v55, 6 }
0x19a3   :  { %v1753_v56 = vpop.permute.xlu1 %1752 }
0x19a4   :  { %4309 = vmatmul.mubr.msk.f32.vlgmr.msra.gmra.mxu1 %vm332_vm7, %v1753_v56 }
0x19a5   :  { %4323 = vmatpush3.msra.mxu1 %v5351_v60  ;;  %4330 = vmatprep.mubr.msk.f32.mxu1 %vm5002_vm2, %v5001_v5 }
0x19a6   :  { %4324 = vmatprep.subr.mxu1 %v5001_v5 }
0x19a7   :  { %4325 = vmatpush3.msra.mxu1 %v5354_v62 }
0x19a8   :  { %4326 = vmatprep.subr.mxu1 %v5001_v5 }
0x19a9   :  { %4327 = vmatpush3.msra.mxu1 %v5360_v63 }
0x19aa   :  { %4328 = vmatprep.subr.mxu1 %v5001_v5 }
0x19ab   :  { %4329 = vmatpush3.msra.mxu1 %v5364_v1 }
0x19ac   :  { %4344 = vmatprep.subr.mxu1 %v5001_v5 }
0x1a64   :  { %v1822_v3 = vpop.f32.mrf.mxu1 }
0x1a65   :  { %v1827_v58 = vrot.slane %v1822_v3, 4  ;;  %v1828_v61 = vrot.slane %v1822_v3, 5 }
0x1a66   :  { %v4310_v2 = vpop.f32.mrf.mxu1 }
0x1a67   :  { %v1831_v12 = vadd.f32 %v1827_v58, %v5278_v0  ;;  %v1832_v13 = vadd.f32 %v5276_v44, %v1828_v61 }
0x1a69   :  { %v1833_v14 = vadd.f32 %v5385_v24, %v1831_v12  ;;  %v1834_v15 = vadd.f32 %v5385_v24, %v1832_v13 }
0x1a6b   :  { %v3940_v16 = vmul.f32 -1.442695, %v1833_v14  ;;  %v3941_v17 = vmul.f32 -1.442695, %v1834_v15 }
0x1a6d   :  { %4642 = vpow2.f32 %v3940_v16 }
0x1a6e   :  { %4644 = vpow2.f32 %v3941_v17 }
0x1a6f   :  { %4646 = vtanh.f32 %v1833_v14 }
0x1a70   :  { %4648 = vtanh.f32 %v1834_v15 }
0x1a7a   :  { %v4643_v20 = vpop.eup %4642 }
0x1a7b   :  { %v4645_v21 = vpop.eup %4644  ;;  %v1843_v22 = vadd.f32 1.0, %v4643_v20 }
0x1a7c   :  { %v1844_v23 = vadd.f32 1.0, %v4645_v21  ;;  %v4647_v26 = vpop.eup %4646 }
0x1a7d   :  { %4650 = vrcp.f32 %v1843_v22  ;;  %v4649_v28 = vpop.eup %4648  ;;  %v1851_v29 = vrot.slane %v4647_v26, 4 }
0x1a7e   :  { %4652 = vrcp.f32 %v1844_v23  ;;  %v1852_v30 = vrot.slane %v4649_v28, 3 }
0x1a80   :  { %v1853_v6 = vsel %vm442_vm5, %v1852_v30, %v1851_v29 }
0x1a8a   :  { %v4651_v57 = vpop.eup %4650 }
0x1a8b   :  { %v4653_v4 = vpop.eup %4652  ;;  %v1857_v11 = vrot.slane %v4651_v57, 4 }
0x1a8c   :  { %v1858_v34 = vrot.slane %v4653_v4, 3 }
0x1a8e   :  { %v1859_v35 = vsel %vm442_vm5, %v1858_v34, %v1857_v11 }
0x1a8f   :  { %v1861_v36 = vsel %vm5179_vm6, %v1853_v6, %v1859_v35 }
0x1a90   :  { %1864 = vrot.lane.b32.xlu0 %v1861_v36, %s5003_s6  ;;  %v1862_v37 = vmul.f32 %v1861_v36, %v1744_v52 }
0x1b02   :  { %v1865_v7 = vpop.permute.xlu0 %1864 }
0x1b03   :  { %v1867_v8 = vmul.f32 %v1865_v7, %v1861_v36 }
0x1b05   :  { %1869 = vrot.lane.b32.xlu1 %v1867_v8, %s5004_s15 }
0x1b77   :  { %v1870_v38 = vpop.permute.xlu1 %1869 }
0x1b78   :  { %v1872_v39 = vadd.f32 %v1870_v38, %v1862_v37 }
0x1b7a   :  { %4654 = vtanh.f32 %v1872_v39 }
0x1b87   :  { %v4655_v40 = vpop.eup %4654 }
0x1b88   :  { %1875 = vrot.lane.b32.xlu0 %v4655_v40, %s5003_s6 }
0x1bfa   :  { %v1876_v41 = vpop.permute.xlu0 %1875 }
0x1bfb   :  { %v1878_v43 = vmul.f32 %v1876_v41, %v1861_v36 }
0x1bfd   :  { %v2422_v48 = vsel %vm2398_vm8, %v1878_v43, %v2413_v42  ;;  %1880 = vrot.lane.b32.xlu1 %v1878_v43, %s5004_s15 }
0x1bfe   :  { %v2423_v49 = vsel %vm2400_vm9, %v2422_v48, %v2415_v45 }
0x1bff   :  { %v5517_v50 = vsel %vm2402_vm10, %v2423_v49, %v2417_v46 }
0x1c6f   :  { %v1881_v51 = vpop.permute.xlu1 %1880 }
0x1c70   :  { %4320 = vmatmul.mubr.msk.f32.vlgmr.msra.gmra.mxu0 %vm332_vm7, %v1881_v51 }
0x1c71   :  { %4334 = vmatpush3.msra.mxu0 %v5351_v60  ;;  %4341 = vmatprep.mubr.msk.f32.mxu0 %vm5002_vm2, %v5001_v5 }
0x1c72   :  { %4335 = vmatprep.subr.mxu0 %v5001_v5 }
0x1c73   :  { %4336 = vmatpush3.msra.mxu0 %v5354_v62 }
0x1c74   :  { %4337 = vmatprep.subr.mxu0 %v5001_v5 }
0x1c75   :  { %4338 = vmatpush3.msra.mxu0 %v5360_v63 }
0x1c76   :  { %4339 = vmatprep.subr.mxu0 %v5001_v5 }
0x1c77   :  { %4340 = vmatpush3.msra.mxu0 %v5364_v1 }
0x1d30   :  { %v1950_v33 = vpop.f32.mrf.mxu0 }
0x1d31   :  { %v1955_v18 = vrot.slane %v1950_v33, 5  ;;  %v1956_v52 = vrot.slane %v1950_v33, 6 }
0x1d32   :  { %v4321_v53 = vpop.f32.mrf.mxu0 }
0x1d33   :  { %v1959_v54 = vadd.f32 %v1955_v18, %v5278_v0  ;;  %v1960_v55 = vadd.f32 %v5276_v44, %v1956_v52 }
0x1d35   :  { %v1961_v56 = vadd.f32 %v5385_v24, %v1959_v54  ;;  %v1962_v3 = vadd.f32 %v5385_v24, %v1960_v55 }
0x1d37   :  { %v3943_v58 = vmul.f32 -1.442695, %v1961_v56  ;;  %v3944_v61 = vmul.f32 -1.442695, %v1962_v3 }
0x1d39   :  { %4656 = vpow2.f32 %v3943_v58 }
0x1d3a   :  { %4658 = vpow2.f32 %v3944_v61 }
0x1d3b   :  { %4660 = vtanh.f32 %v1961_v56 }
0x1d3c   :  { %4662 = vtanh.f32 %v1962_v3 }
0x1d46   :  { %v4657_v2 = vpop.eup %4656 }
0x1d47   :  { %v4659_v12 = vpop.eup %4658  ;;  %v1971_v13 = vadd.f32 1.0, %v4657_v2 }
0x1d48   :  { %v1972_v14 = vadd.f32 1.0, %v4659_v12  ;;  %v4661_v15 = vpop.eup %4660 }
0x1d49   :  { %4664 = vrcp.f32 %v1971_v13  ;;  %v4663_v16 = vpop.eup %4662  ;;  %v1979_v20 = vrot.slane %v4661_v15, 3 }
0x1d4a   :  { %4666 = vrcp.f32 %v1972_v14  ;;  %v1980_v21 = vrot.slane %v4663_v16, 2 }
0x1d4c   :  { %v1981_v28 = vsel %vm442_vm5, %v1980_v21, %v1979_v20 }
0x1d56   :  { %v4665_v17 = vpop.eup %4664 }
0x1d57   :  { %v4667_v22 = vpop.eup %4666  ;;  %v1985_v23 = vrot.slane %v4665_v17, 3 }
0x1d58   :  { %v1986_v26 = vrot.slane %v4667_v22, 2 }
0x1d5a   :  { %v1987_v57 = vsel %vm442_vm5, %v1986_v26, %v1985_v23 }
0x1d5b   :  { %v1989_v29 = vsel %vm5179_vm6, %v1981_v28, %v1987_v57 }
0x1d5c   :  { %1992 = vrot.lane.b32.xlu0 %v1989_v29, %s5003_s6  ;;  %v1990_v11 = vmul.f32 %v1989_v29, %v1872_v39 }
0x1dce   :  { %v1993_v30 = vpop.permute.xlu0 %1992 }
0x1dcf   :  { %v1995_v4 = vmul.f32 %v1993_v30, %v1989_v29 }
0x1dd1   :  { %1997 = vrot.lane.b32.xlu1 %v1995_v4, %s5004_s15 }
0x1e43   :  { %v1998_v34 = vpop.permute.xlu1 %1997 }
0x1e44   :  { %v2000_v6 = vadd.f32 %v1998_v34, %v1990_v11 }
0x1e46   :  { %4668 = vtanh.f32 %v2000_v6 }
0x1e53   :  { %v4669_v35 = vpop.eup %4668 }
0x1e54   :  { %2003 = vrot.lane.b32.xlu0 %v4669_v35, %s5003_s6 }
0x1ec6   :  { %v2004_v36 = vpop.permute.xlu0 %2003 }
0x1ec7   :  { %v5540_v7 = vmul.f32 %v2004_v36, %v1989_v29 }
0x1ec9   :  { %2008 = vrot.lane.b32.xlu1 %v5540_v7, %s5004_s15 }
0x1f3b   :  { %v2009_v8 = vpop.permute.xlu1 %2008 }
0x1f3c   :  { %4331 = vmatmul.mubr.msk.f32.vlgmr.msra.gmra.mxu1 %vm332_vm7, %v2009_v8 }
0x1f3d   :  { %4345 = vmatpush3.msra.mxu1 %v5351_v60  ;;  %4352 = vmatprep.mubr.msk.f32.mxu1 %vm5002_vm2, %v5001_v5 }
0x1f3e   :  { %4346 = vmatprep.subr.mxu1 %v5001_v5 }
0x1f3f   :  { %4347 = vmatpush3.msra.mxu1 %v5354_v62 }
0x1f40   :  { %4348 = vmatprep.subr.mxu1 %v5001_v5 }
0x1f41   :  { %4349 = vmatpush3.msra.mxu1 %v5360_v63 }
0x1f42   :  { %4350 = vmatprep.subr.mxu1 %v5001_v5 }
0x1f43   :  { %4351 = vmatpush3.msra.mxu1 %v5364_v1 }
0x1ffc   :  { %v2078_v37 = vpop.f32.mrf.mxu1 }
0x1ffd   :  { %v2083_v38 = vrot.slane %v2078_v37, 6  ;;  %v2084_v39 = vrot.slane %v2078_v37, 7 }
0x1ffe   :  { %v4332_v40 = vpop.f32.mrf.mxu1 }
0x1fff   :  { %v2087_v60 = vadd.f32 %v2083_v38, %v5278_v0  ;;  %v2088_v41 = vadd.f32 %v5276_v44, %v2084_v39 }
0x2001   :  { %v2089_v42 = vadd.f32 %v5385_v24, %v2087_v60  ;;  %v2090_v62 = vadd.f32 %v5385_v24, %v2088_v41 }
0x2003   :  { %v3946_v43 = vmul.f32 -1.442695, %v2089_v42  ;;  %v3947_v45 = vmul.f32 -1.442695, %v2090_v62 }
0x2005   :  { %4670 = vpow2.f32 %v3946_v43 }
0x2006   :  { %4672 = vpow2.f32 %v3947_v45 }
0x2007   :  { %4674 = vtanh.f32 %v2089_v42 }
0x2008   :  { %4676 = vtanh.f32 %v2090_v62 }
0x2012   :  { %v4671_v63 = vpop.eup %4670 }
0x2013   :  { %v4673_v1 = vpop.eup %4672  ;;  %v2099_v46 = vadd.f32 1.0, %v4671_v63 }
0x2014   :  { %v2100_v48 = vadd.f32 1.0, %v4673_v1  ;;  %v4675_v49 = vpop.eup %4674 }
0x2015   :  { %4678 = vrcp.f32 %v2099_v46  ;;  %v4677_v51 = vpop.eup %4676  ;;  %v2107_v18 = vrot.slane %v4675_v49, 2  ;;  %v1310_v49 = vrot.slane %v5448_v59, 2 }
0x2016   :  { %4680 = vrcp.f32 %v2100_v48  ;;  %v2108_v52 = vrot.slane %v4677_v51, 1  ;;  %v1309_v48 = vrot.slane %v5448_v59, 1 }
0x2018   :  { %v2109_v56 = vsel %vm442_vm5, %v2108_v52, %v2107_v18  ;;  %v1313_v51 = vadd.f32 %v1309_v48, %v5170_v10  ;;  %v4798_v18 = vld [vmem:[#allocation8] ss:$0 sm:$0xff] }
0x201a   :  { %v1315_v52 = vadd.f32 %v4798_v18, %v1313_v51 }
0x2022   :  { %v4679_v33 = vpop.eup %4678 }
0x2023   :  { %v4681_v53 = vpop.eup %4680  ;;  %v2113_v54 = vrot.slane %v4679_v33, 2  ;;  %v1314_v33 = vadd.f32 %v5168_v9, %v1310_v49 }
0x2024   :  { %v2114_v55 = vrot.slane %v4681_v53, 1 }
0x2025   :  { %v1316_v53 = vadd.f32 %v4798_v18, %v1314_v33 }
0x2026   :  { %v2115_v3 = vsel %vm442_vm5, %v2114_v55, %v2113_v54  ;;  %v3928_v54 = vmul.f32 -1.442695, %v1315_v52 }
0x2027   :  { %v2117_v58 = vsel %vm5179_vm6, %v2109_v56, %v2115_v3  ;;  %v3929_v55 = vmul.f32 -1.442695, %v1316_v53 }
0x2028   :  { %2120 = vrot.lane.b32.xlu0 %v2117_v58, %s5003_s6  ;;  %v2118_v12 = vmul.f32 %v2117_v58, %v2000_v6 }
0x209a   :  { %v2121_v61 = vpop.permute.xlu0 %2120 }
0x209b   :  { %v2123_v2 = vmul.f32 %v2121_v61, %v2117_v58 }
0x209d   :  { %2125 = vrot.lane.b32.xlu1 %v2123_v2, %s5004_s15 }
0x210f   :  { %v2126_v13 = vpop.permute.xlu1 %2125 }
0x2110   :  { %v2128_v14 = vadd.f32 %v2126_v13, %v2118_v12 }
0x2112   :  { %4682 = vtanh.f32 %v2128_v14 }
0x211f   :  { %v4683_v15 = vpop.eup %4682 }
0x2120   :  { %2131 = vrot.lane.b32.xlu0 %v4683_v15, %s5003_s6 }
0x2192   :  { %v2132_v16 = vpop.permute.xlu0 %2131 }
0x2193   :  { %v5565_v17 = vmul.f32 %v2132_v16, %v2117_v58 }
0x2195   :  { %2136 = vrot.lane.b32.xlu1 %v5565_v17, %s5004_s15 }
0x2207   :  { %v2137_v20 = vpop.permute.xlu1 %2136 }
0x2208   :  { %4342 = vmatmul.mubr.msk.f32.vlgmr.msra.gmra.mxu0 %vm332_vm7, %v2137_v20 }
0x22c8   :  { %v2206_v21 = vpop.f32.mrf.mxu0 }
0x22c9   :  { %v2211_v22 = vrot.slane %v2206_v21, 7  ;;  %v2215_v23 = vadd.f32 %v5276_v44, %v2206_v21 }
0x22ca   :  { %v4343_v26 = vpop.f32.mrf.mxu0 }
0x22cb   :  { %v2214_v28 = vadd.f32 %v2211_v22, %v5278_v0  ;;  %v2217_v57 = vadd.f32 %v5385_v24, %v2215_v23 }
0x22cd   :  { %v2216_v29 = vadd.f32 %v5385_v24, %v2214_v28  ;;  %v3950_v30 = vmul.f32 -1.442695, %v2217_v57 }
0x22cf   :  { %v3949_v4 = vmul.f32 -1.442695, %v2216_v29  ;;  %4684 = vpow2.f32 %v3950_v30 }
0x22d1   :  { %4686 = vpow2.f32 %v3949_v4 }
0x22d2   :  { %4688 = vtanh.f32 %v2216_v29 }
0x22dc   :  { %v4685_v11 = vpop.eup %4684 }
0x22dd   :  { %v2227_v35 = vadd.f32 1.0, %v4685_v11 }
0x22de   :  { %v4687_v34 = vpop.eup %4686 }
0x22df   :  { %v2226_v6 = vadd.f32 1.0, %v4687_v34  ;;  %v4689_v36 = vpop.eup %4688 }
0x22e0   :  { %v2234_v8 = vrot.slane %v4689_v36, 1 }
0x22e1   :  { %4690 = vrcp.f32 %v2226_v6 }
0x22e2   :  { %4692 = vtanh.f32 %v2217_v57 }
0x22e3   :  { %4694 = vrcp.f32 %v2227_v35 }
0x22ee   :  { %v4691_v37 = vpop.eup %4690 }
0x22ef   :  { %v4693_v38 = vpop.eup %4692  ;;  %v2239_v39 = vrot.slane %v4691_v37, 1 }
0x22f0   :  { %v4695_v40 = vpop.eup %4694  ;;  %v2235_v60 = vsel %vm442_vm5, %v4693_v38, %v2234_v8 }
0x22f1   :  { %v2240_v41 = vsel %vm442_vm5, %v4695_v40, %v2239_v39 }
0x22f2   :  { %v2242_v42 = vsel %vm5179_vm6, %v2235_v60, %v2240_v41 }
0x22f3   :  { %2245 = vrot.lane.b32.xlu0 %v2242_v42, %s5003_s6  ;;  %v2243_v45 = vmul.f32 %v2242_v42, %v2128_v14 }
0x2365   :  { %v2246_v62 = vpop.permute.xlu0 %2245 }
0x2366   :  { %v2248_v43 = vmul.f32 %v2246_v62, %v2242_v42 }
0x2368   :  { %2250 = vrot.lane.b32.xlu1 %v2248_v43, %s5004_s15 }
0x23da   :  { %v2251_v63 = vpop.permute.xlu1 %2250 }
0x23db   :  { %v5580_v1 = vadd.f32 %v2251_v63, %v2243_v45 }
0x23dd   :  { %4696 = vtanh.f32 %v5580_v1 }
0x23de   :  { %4698 = vpow2.f32 %v3928_v54 }
0x23df   :  { %4700 = vpow2.f32 %v3929_v55 }
0x23ea   :  { %v4697_v46 = vpop.eup %4696 }
0x23eb   :  { %2256 = vrot.lane.b32.xlu0 %v4697_v46, %s5003_s6  ;;  %v4699_v56 = vpop.eup %4698 }
0x23ec   :  { %v4701_v3 = vpop.eup %4700  ;;  %v1325_v58 = vadd.f32 1.0, %v4699_v56  ;;  %v2432_v56 = vld [vmem:[%s6059_s7 + $0x38] sm:$0xff] }
0x23ed   :  { %v1326_v61 = vadd.f32 1.0, %v4701_v3  ;;  %v2431_v3 = vld [vmem:[%s6059_s7 + $0x30] sm:$0xff]  ;;  %4355 = vmatprep.subr.mxu0 %v2432_v56 }
0x23ee   :  { %4702 = vrcp.f32 %v1325_v58  ;;  %4356 = vmatpush3.msra.mxu0 %v2432_v56  ;;  %v2427_v58 = vld [vmem:[%s6059_s7 + $0x10] sm:$0xff] }
0x23ef   :  { %4704 = vrcp.f32 %v1326_v61  ;;  %4357 = vmatprep.subr.mxu0 %v2431_v3 }
0x23f0   :  { %4706 = vtanh.f32 %v1315_v52  ;;  %4358 = vmatpush3.msra.mxu0 %v2431_v3 }
0x23f1   :  { %4708 = vtanh.f32 %v1316_v53 }
0x23fb   :  { %v4703_v59 = vpop.eup %4702 }
0x23fc   :  { %v4705_v2 = vpop.eup %4704  ;;  %v1339_v9 = vrot.slane %v4703_v59, 7  ;;  %v2429_v59 = vld [vmem:[%s6059_s7 + $0x20] sm:$0xff] }
0x23fd   :  { %v4707_v10 = vpop.eup %4706  ;;  %v1340_v13 = vrot.slane %v4705_v2, 6  ;;  %v2426_v2 = vld [vmem:[%s6059_s7 + $0x8] sm:$0xff] }
0x23fe   :  { %v4709_v12 = vpop.eup %4708  ;;  %v1333_v16 = vrot.slane %v4707_v10, 7  ;;  %v2425_v10 = vld [vmem:[%s6059_s7] sm:$0xff] }
0x23ff   :  { %v1334_v20 = vrot.slane %v4709_v12, 6  ;;  %v1341_v21 = vsel %vm442_vm5, %v1340_v13, %v1339_v9 }
0x2401   :  { %v1335_v22 = vsel %vm442_vm5, %v1334_v20, %v1333_v16  ;;  %v2411_v16 = vrot.slane %v5540_v7, 2  ;;  %v5666_v7 = vld [vmem:[%s6060_s8 + $0x10] sm:$0xff] }
0x2402   :  { %v1343_v23 = vsel %vm5179_vm6, %v1335_v22, %v1341_v21 }
0x2403   :  { %v1344_v29 = vmul.f32 %v1343_v23, %v5404_v19 }
0x245d   :  { %v2257_v14 = vpop.permute.xlu0 %2256 }
0x245e   :  { %v5588_v15 = vmul.f32 %v2257_v14, %v2242_v42  ;;  %v2409_v14 = vrot.slane %v5565_v17, 4 }
0x2460   :  { %2261 = vrot.lane.b32.xlu1 %v5588_v15, %s5004_s15  ;;  %v2407_v9 = vrot.slane %v5588_v15, 6  ;;  %v5659_v15 = vld [vmem:[%s6060_s8 + $0x18] sm:$0xff] }
0x2464   :  { %1346 = vrot.lane.b32.xlu1 %v1343_v23, %s5003_s6 }
0x24d2   :  { %v2262_v26 = vpop.permute.xlu1 %2261 }
0x24d3   :  { %4353 = vmatmul.mubr.msk.f32.vlgmr.msra.gmra.mxu1 %vm332_vm7, %v2262_v26  ;;  %v5675_v26 = vld [vmem:[%s6060_s8 + $0x8] sm:$0xff] }
0x24d6   :  { %v1347_v28 = vpop.permute.xlu1 %1346 }
0x24d7   :  { %v1349_v57 = vmul.f32 %v1347_v28, %v1343_v23 }
0x24d9   :  { %1351 = vrot.lane.b32.xlu1 %v1349_v57, %s5004_s15  ;;  %v5684_v57 = vld [vmem:[%s6060_s8] sm:$0xff] }
0x254b   :  { %v1352_v30 = vpop.permute.xlu1 %1351 }
0x254c   :  { %v1354_v4 = vadd.f32 %v1352_v30, %v1344_v29 }
0x254e   :  { %4710 = vtanh.f32 %v1354_v4 }
0x255b   :  { %v4711_v11 = vpop.eup %4710 }
0x255c   :  { %1357 = vrot.lane.b32.xlu1 %v4711_v11, %s5003_s6 }
0x2560   :  { %2437 = vrot.lane.b32.xlu1 %v5517_v50, %s5004_s15 }
0x2593   :  { %v2331_v34 = vpop.f32.mrf.mxu1 }
0x2594   :  { %v2336_v6 = vrot.slane %v2331_v34, 1  ;;  %v2339_v35 = vadd.f32 %v2331_v34, %v5278_v0 }
0x2595   :  { %v4354_v36 = vpop.f32.mrf.mxu1 }
0x2596   :  { %v2340_v8 = vadd.f32 %v5276_v44, %v2336_v6  ;;  %v2341_v37 = vadd.f32 %v5385_v24, %v2339_v35  ;;  %v5718_v35 = vld [vmem:[%s6061_s9] ss:$0 sm:$0xff] }
0x2598   :  { %v2342_v19 = vadd.f32 %v5385_v24, %v2340_v8  ;;  %v3952_v38 = vmul.f32 -1.442695, %v2341_v37 }
0x259a   :  { %v3953_v39 = vmul.f32 -1.442695, %v2342_v19  ;;  %4712 = vpow2.f32 %v3952_v38 }
0x259c   :  { %4714 = vpow2.f32 %v3953_v39 }
0x259d   :  { %4716 = vtanh.f32 %v2342_v19 }
0x25a7   :  { %v4713_v40 = vpop.eup %4712 }
0x25a8   :  { %v2351_v41 = vadd.f32 1.0, %v4713_v40 }
0x25a9   :  { %v4715_v60 = vpop.eup %4714 }
0x25aa   :  { %v2352_v50 = vadd.f32 1.0, %v4715_v60  ;;  %v4717_v0 = vpop.eup %4716 }
0x25ab   :  { %v2359_v42 = vrot.slane %v4717_v0, 7 }
0x25ac   :  { %4718 = vrcp.f32 %v2352_v50 }
0x25ad   :  { %4720 = vtanh.f32 %v2341_v37 }
0x25ae   :  { %4722 = vrcp.f32 %v2351_v41 }
0x25b9   :  { %v4719_v62 = vpop.eup %4718 }
0x25ba   :  { %v4721_v44 = vpop.eup %4720  ;;  %v2364_v43 = vrot.slane %v4719_v62, 7 }
0x25bb   :  { %v4723_v45 = vpop.eup %4722  ;;  %v2360_v24 = vsel %vm442_vm5, %v2359_v42, %v4721_v44 }
0x25bc   :  { %v2365_v63 = vsel %vm442_vm5, %v2364_v43, %v4723_v45 }
0x25bd   :  { %v2367_v46 = vsel %vm5179_vm6, %v2360_v24, %v2365_v63 }
0x25be   :  { %2370 = vrot.lane.b32.xlu0 %v2367_v46, %s5003_s6  ;;  %v2368_v53 = vmul.f32 %v2367_v46, %v5580_v1  ;;  %v2430_v1 = vld [vmem:[%s6059_s7 + $0x28] sm:$0xff] }
0x25bf   :  { %4359 = vmatprep.subr.mxu0 %v2430_v1 }
0x25c0   :  { %4360 = vmatpush3.msra.mxu0 %v2430_v1 }
0x25c1   :  { %4361 = vmatprep.subr.mxu0 %v2429_v59 }
0x25c2   :  { %4362 = vmatpush3.msra.mxu0 %v2429_v59 }
0x25c3   :  { %4377 = vmatprep.subr.mxu0 %v5001_v5 }
0x25ce   :  { %v1358_v48 = vpop.permute.xlu1 %1357 }
0x25cf   :  { %v5612_v49 = vmul.f32 %v1358_v48, %v1343_v23 }
0x25d1   :  { %v2396_v51 = vrot.slane %v5612_v49, 2 }
0x25d2   :  { %v2438_v17 = vpop.permute.xlu1 %2437 }
0x25d3   :  { %v2406_v33 = vsel %vm2402_vm10, %v5417_v32, %v2396_v51  ;;  %v2428_v32 = vld [vmem:[%s6059_s7 + $0x18] sm:$0xff] }
0x25d4   :  { %2522 = vrot.lane.b32.xlu1 %v2406_v33, %s5004_s15  ;;  %4366 = vmatprep.subr.mxu1 %v2428_v32 }
0x25d5   :  { %4367 = vmatpush3.msra.mxu1 %v2428_v32 }
0x25d6   :  { %4368 = vmatprep.subr.mxu1 %v2427_v58 }
0x25d7   :  { %4369 = vmatpush3.msra.mxu1 %v2427_v58 }
0x25d8   :  { %4370 = vmatprep.subr.mxu1 %v2426_v2 }
0x25d9   :  { %4371 = vmatpush3.msra.mxu1 %v2426_v2 }
0x25da   :  { %4372 = vmatprep.subr.mxu1 %v2425_v10 }
0x25db   :  { %4373 = vmatpush3.msra.mxu1 %v2425_v10 }
0x25dc   :  { %4388 = vmatprep.subr.mxu1 %v5001_v5 }
0x2630   :  { %v2371_v18 = vpop.permute.xlu0 %2370 }
0x2631   :  { %v2373_v52 = vmul.f32 %v2371_v18, %v2367_v46 }
0x2633   :  { %2375 = vrot.lane.b32.xlu0 %v2373_v52, %s5004_s15 }
0x2646   :  { %v2523_v28 = vpop.permute.xlu1 %2522 }
0x26a5   :  { %v2376_v54 = vpop.permute.xlu0 %2375 }
0x26a6   :  { %v2378_v55 = vadd.f32 %v2376_v54, %v2368_v53 }
0x26a8   :  { %4724 = vtanh.f32 %v2378_v55 }
0x26b5   :  { %v4725_v61 = vpop.eup %4724 }
0x26b6   :  { %2381 = vrot.lane.b32.xlu0 %v4725_v61, %s5003_s6 }
0x2728   :  { %v2382_v12 = vpop.permute.xlu0 %2381 }
0x2729   :  { %v2384_v13 = vmul.f32 %v2382_v12, %v2367_v46 }
0x272b   :  { %v2419_v20 = vsel %vm2398_vm8, %v2384_v13, %v2407_v9 }
0x272c   :  { %v2420_v21 = vsel %vm2400_vm9, %v2419_v20, %v2409_v14 }
0x272d   :  { %v2421_v22 = vsel %vm2402_vm10, %v2420_v21, %v2411_v16 }
0x272e   :  { %2435 = vrot.lane.b32.xlu0 %v2421_v22, %s5004_s15 }
0x2732   :  { %2520 = vrot.lane.b32.xlu0 %v5294_v47, %s5004_s15 }
0x27a0   :  { %v2436_v23 = vpop.permute.xlu0 %2435 }
0x27a1   :  { %4363 = vmatprep.mubr.msk.f32.mxu0 %vm332_vm7, %v2436_v23 }
0x27a2   :  { %4364 = vmatmul.mubr.msk.f32.vlgmr.msra.gmra.mxu0 %vm332_vm7, %v2438_v17 }
0x27a3   :  { %4378 = vmatpush3.msra.mxu0 %v5659_v15  ;;  %4385 = vmatprep.mubr.msk.f32.mxu0 %vm5002_vm2, %v5001_v5 }
0x27a4   :  { %4379 = vmatprep.subr.mxu0 %v5001_v5  ;;  %v2521_v47 = vpop.permute.xlu0 %2520 }
0x27a5   :  { %4380 = vmatpush3.msra.mxu0 %v5666_v7  ;;  %4374 = vmatprep.mubr.msk.f32.mxu1 %vm332_vm7, %v2521_v47 }
0x27a6   :  { %4381 = vmatprep.subr.mxu0 %v5001_v5  ;;  %4375 = vmatmul.mubr.msk.f32.vlgmr.msra.gmra.mxu1 %vm332_vm7, %v2523_v28 }
0x27a7   :  { %4382 = vmatpush3.msra.mxu0 %v5675_v26  ;;  %4389 = vmatpush3.msra.mxu1 %v5659_v15 }
0x27a8   :  { %4383 = vmatprep.subr.mxu0 %v5001_v5  ;;  %4390 = vmatprep.subr.mxu1 %v5001_v5 }
0x27a9   :  { %4384 = vmatpush3.msra.mxu0 %v5684_v57  ;;  %4391 = vmatpush3.msra.mxu1 %v5666_v7 }
0x27aa   :  { %4386 = vmatmul.mubr.f32.vlgmr.msra.gmra.mxu0 %v5001_v5  ;;  %4392 = vmatprep.subr.mxu1 %v5001_v5 }
0x27ab   :  { %4393 = vmatpush3.msra.mxu1 %v5675_v26  ;;  %4396 = vmatprep.mubr.msk.f32.mxu1 %vm5002_vm2, %v5001_v5 }
0x27ac   :  { %4394 = vmatprep.subr.mxu1 %v5001_v5  ;;  %4399 = vmatprep.subr.mxu0 %v5001_v5 }
0x27ad   :  { %4395 = vmatpush3.msra.mxu1 %v5684_v57  ;;  %4400 = vmatpush3.msra.mxu0 %v5659_v15 }
0x27ae   :  { %4401 = vmatprep.subr.mxu0 %v5001_v5  ;;  %4407 = vmatprep.mubr.msk.f32.mxu0 %vm5002_vm2, %v5001_v5 }
0x27af   :  { %4402 = vmatpush3.msra.mxu0 %v5666_v7  ;;  %4410 = vmatprep.subr.mxu1 %v5001_v5 }
0x27b0   :  { %4403 = vmatprep.subr.mxu0 %v5001_v5 }
0x27b1   :  { %4404 = vmatpush3.msra.mxu0 %v5675_v26 }
0x27b2   :  { %4405 = vmatprep.subr.mxu0 %v5001_v5 }
0x27b3   :  { %4406 = vmatpush3.msra.mxu0 %v5684_v57 }
0x27b4   :  { %4421 = vmatprep.subr.mxu0 %v5001_v5 }
0x2862   :  { %v4365_v29 = vpop.f32.mrf.mxu0 }
0x2864   :  { %v2509_v11 = vpop.f32.mrf.mxu0 }
0x2866   :  { %v4376_v30 = vpop.f32.mrf.mxu1 }
0x2867   :  { %v5711_v4 = vadd.f32 %v4376_v30, %v4365_v29 }
0x2868   :  { %v2594_v34 = vpop.f32.mrf.mxu1 }
0x2869   :  { %v5713_v6 = vadd.f32 %v2594_v34, %v2509_v11 }
0x286a   :  { %v2674_v36 = vpop.f32.mrf.mxu0 }
0x286b   :  { %v2678_v8 = vadd.f32 %v2674_v36, %v5713_v6 }
0x286c   :  { %v4387_v37 = vpop.f32.mrf.mxu0 }
0x286d   :  { %v2685_v19 = vadd.f32 %v5718_v35, %v2678_v8 }
0x286f   :  { %v3959_v38 = vmul.f32 -1.442695, %v2685_v19 }
0x2871   :  { %4726 = vpow2.f32 %v3959_v38 }
0x2872   :  { %4728 = vtanh.f32 %v2685_v19 }
0x287e   :  { %v4727_v39 = vpop.eup %4726 }
0x287f   :  { %v2690_v40 = vadd.f32 1.0, %v4727_v39  ;;  %v4729_v60 = vpop.eup %4728 }
0x2881   :  { %4730 = vrcp.f32 %v2690_v40 }
0x288e   :  { %v4731_v41 = vpop.eup %4730 }
0x288f   :  { %v2693_v50 = vsel %vm5179_vm6, %v4729_v60, %v4731_v41 }
0x2890   :  { %2696 = vrot.lane.b32.xlu0 %v2693_v50, %s5003_s6  ;;  %v2694_v62 = vmul.f32 0.0, %v2693_v50 }
0x2902   :  { %v2697_v0 = vpop.permute.xlu0 %2696 }
0x2903   :  { %v2699_v42 = vmul.f32 %v2697_v0, %v2693_v50 }
0x2905   :  { %2701 = vrot.lane.b32.xlu1 %v2699_v42, %s5004_s15 }
0x2977   :  { %v2702_v44 = vpop.permute.xlu1 %2701 }
0x2978   :  { %v2704_v43 = vadd.f32 %v2702_v44, %v2694_v62 }
0x297a   :  { %4732 = vtanh.f32 %v2704_v43  ;;  %v2800_v61 = vrot.slane %v2704_v43, 6 }
0x2987   :  { %v4733_v45 = vpop.eup %4732 }
0x2988   :  { %2707 = vrot.lane.b32.xlu0 %v4733_v45, %s5003_s6 }
0x29fa   :  { %v2708_v24 = vpop.permute.xlu0 %2707 }
0x29fb   :  { %v2710_v63 = vmul.f32 %v2708_v24, %v2693_v50 }
0x29fd   :  { %2712 = vrot.lane.b32.xlu1 %v2710_v63, %s5004_s15 }
0x2a6f   :  { %v2713_v46 = vpop.permute.xlu1 %2712 }
0x2a70   :  { %4397 = vmatmul.mubr.msk.f32.vlgmr.msra.gmra.mxu1 %vm332_vm7, %v2713_v46 }
0x2a71   :  { %4411 = vmatpush3.msra.mxu1 %v5659_v15  ;;  %4418 = vmatprep.mubr.msk.f32.mxu1 %vm5002_vm2, %v5001_v5 }
0x2a72   :  { %4412 = vmatprep.subr.mxu1 %v5001_v5 }
0x2a73   :  { %4413 = vmatpush3.msra.mxu1 %v5666_v7 }
0x2a74   :  { %4414 = vmatprep.subr.mxu1 %v5001_v5 }
0x2a75   :  { %4415 = vmatpush3.msra.mxu1 %v5675_v26 }
0x2a76   :  { %4416 = vmatprep.subr.mxu1 %v5001_v5 }
0x2a77   :  { %4417 = vmatpush3.msra.mxu1 %v5684_v57 }
0x2a78   :  { %4432 = vmatprep.subr.mxu1 %v5001_v5 }
0x2b30   :  { %v2782_v48 = vpop.f32.mrf.mxu1 }
0x2b31   :  { %v2787_v51 = vrot.slane %v2782_v48, 6 }
0x2b32   :  { %v4398_v33 = vpop.f32.mrf.mxu1 }
0x2b33   :  { %v2789_v18 = vadd.f32 %v2787_v51, %v5713_v6 }
0x2b35   :  { %v2790_v52 = vadd.f32 %v5718_v35, %v2789_v18 }
0x2b37   :  { %v3961_v53 = vmul.f32 -1.442695, %v2790_v52 }
0x2b39   :  { %4734 = vpow2.f32 %v3961_v53 }
0x2b3a   :  { %4736 = vtanh.f32 %v2790_v52 }
0x2b46   :  { %v4735_v54 = vpop.eup %4734 }
0x2b47   :  { %v2795_v55 = vadd.f32 1.0, %v4735_v54  ;;  %v4737_v56 = vpop.eup %4736 }
0x2b49   :  { %4738 = vrcp.f32 %v2795_v55 }
0x2b56   :  { %v4739_v3 = vpop.eup %4738 }
0x2b57   :  { %v2798_v32 = vsel %vm5179_vm6, %v4737_v56, %v4739_v3 }
0x2b58   :  { %2804 = vrot.lane.b32.xlu0 %v2798_v32, %s5003_s6  ;;  %v2802_v59 = vmul.f32 %v2800_v61, %v2798_v32 }
0x2bca   :  { %v2805_v1 = vpop.permute.xlu0 %2804 }
0x2bcb   :  { %v2807_v58 = vmul.f32 %v2805_v1, %v2798_v32 }
0x2bcd   :  { %2809 = vrot.lane.b32.xlu1 %v2807_v58, %s5004_s15 }
0x2c3f   :  { %v2810_v2 = vpop.permute.xlu1 %2809 }
0x2c40   :  { %v2812_v10 = vadd.f32 %v2810_v2, %v2802_v59 }
0x2c42   :  { %4740 = vtanh.f32 %v2812_v10  ;;  %v2909_v37 = vrot.slane %v2812_v10, 6 }
0x2c4f   :  { %v4741_v12 = vpop.eup %4740 }
0x2c50   :  { %2815 = vrot.lane.b32.xlu0 %v4741_v12, %s5003_s6 }
0x2cc2   :  { %v2816_v9 = vpop.permute.xlu0 %2815 }
0x2cc3   :  { %v2818_v13 = vmul.f32 %v2816_v9, %v2798_v32 }
0x2cc5   :  { %v2820_v14 = vrot.slane %v2818_v13, 2 }
0x2cc7   :  { %2821 = vrot.lane.b32.xlu1 %v2820_v14, %s5004_s15 }
0x2d39   :  { %v2822_v16 = vpop.permute.xlu1 %2821 }
0x2d3a   :  { %4408 = vmatmul.mubr.msk.f32.vlgmr.msra.gmra.mxu0 %vm332_vm7, %v2822_v16 }
0x2d3b   :  { %4422 = vmatpush3.msra.mxu0 %v5659_v15  ;;  %4429 = vmatprep.mubr.msk.f32.mxu0 %vm5002_vm2, %v5001_v5 }
0x2d3c   :  { %4423 = vmatprep.subr.mxu0 %v5001_v5 }
0x2d3d   :  { %4424 = vmatpush3.msra.mxu0 %v5666_v7 }
0x2d3e   :  { %4425 = vmatprep.subr.mxu0 %v5001_v5 }
0x2d3f   :  { %4426 = vmatpush3.msra.mxu0 %v5675_v26 }
0x2d40   :  { %4427 = vmatprep.subr.mxu0 %v5001_v5 }
0x2d41   :  { %4428 = vmatpush3.msra.mxu0 %v5684_v57 }
0x2d42   :  { %4443 = vmatprep.subr.mxu0 %v5001_v5 }
0x2dfa   :  { %v2891_v20 = vpop.f32.mrf.mxu0 }
0x2dfb   :  { %v2896_v21 = vrot.slane %v2891_v20, 4 }
0x2dfc   :  { %v4409_v22 = vpop.f32.mrf.mxu0 }
0x2dfd   :  { %v2898_v23 = vadd.f32 %v2896_v21, %v5713_v6 }
0x2dff   :  { %v2899_v17 = vadd.f32 %v5718_v35, %v2898_v23 }
0x2e01   :  { %v3963_v47 = vmul.f32 -1.442695, %v2899_v17 }
0x2e03   :  { %4742 = vpow2.f32 %v3963_v47 }
0x2e04   :  { %4744 = vtanh.f32 %v2899_v17 }
0x2e10   :  { %v4743_v28 = vpop.eup %4742 }
0x2e11   :  { %v2904_v29 = vadd.f32 1.0, %v4743_v28  ;;  %v4745_v30 = vpop.eup %4744 }
0x2e13   :  { %4746 = vrcp.f32 %v2904_v29 }
0x2e20   :  { %v4747_v11 = vpop.eup %4746 }
0x2e21   :  { %v2907_v34 = vsel %vm5179_vm6, %v4745_v30, %v4747_v11 }
0x2e22   :  { %2913 = vrot.lane.b32.xlu0 %v2907_v34, %s5003_s6  ;;  %v2911_v19 = vmul.f32 %v2909_v37, %v2907_v34 }
0x2e94   :  { %v2914_v36 = vpop.permute.xlu0 %2913 }
0x2e95   :  { %v2916_v8 = vmul.f32 %v2914_v36, %v2907_v34 }
0x2e97   :  { %2918 = vrot.lane.b32.xlu1 %v2916_v8, %s5004_s15 }
0x2f09   :  { %v2919_v38 = vpop.permute.xlu1 %2918 }
0x2f0a   :  { %v2921_v39 = vadd.f32 %v2919_v38, %v2911_v19 }
0x2f0c   :  { %4748 = vtanh.f32 %v2921_v39 }
0x2f19   :  { %v4749_v40 = vpop.eup %4748 }
0x2f1a   :  { %2924 = vrot.lane.b32.xlu0 %v4749_v40, %s5003_s6 }
0x2f8c   :  { %v2925_v60 = vpop.permute.xlu0 %2924 }
0x2f8d   :  { %v2927_v41 = vmul.f32 %v2925_v60, %v2907_v34 }
0x2f8f   :  { %v2929_v50 = vrot.slane %v2927_v41, 4 }
0x2f91   :  { %2930 = vrot.lane.b32.xlu1 %v2929_v50, %s5004_s15 }
0x3003   :  { %v2931_v0 = vpop.permute.xlu1 %2930 }
0x3004   :  { %4419 = vmatmul.mubr.msk.f32.vlgmr.msra.gmra.mxu1 %vm332_vm7, %v2931_v0 }
0x3005   :  { %4433 = vmatpush3.msra.mxu1 %v5659_v15  ;;  %4440 = vmatprep.mubr.msk.f32.mxu1 %vm5002_vm2, %v5001_v5 }
0x3006   :  { %4434 = vmatprep.subr.mxu1 %v5001_v5 }
0x3007   :  { %4435 = vmatpush3.msra.mxu1 %v5666_v7 }
0x3008   :  { %4436 = vmatprep.subr.mxu1 %v5001_v5 }
0x3009   :  { %4437 = vmatpush3.msra.mxu1 %v5675_v26 }
0x300a   :  { %4438 = vmatprep.subr.mxu1 %v5001_v5 }
0x300b   :  { %4439 = vmatpush3.msra.mxu1 %v5684_v57 }
0x300c   :  { %4454 = vmatprep.subr.mxu1 %v5001_v5 }
0x30c4   :  { %v3000_v42 = vpop.f32.mrf.mxu1 }
0x30c5   :  { %v3005_v62 = vrot.slane %v3000_v42, 2 }
0x30c6   :  { %v4420_v44 = vpop.f32.mrf.mxu1 }
0x30c7   :  { %v3007_v43 = vadd.f32 %v3005_v62, %v5713_v6  ;;  %v3018_v6 = vrot.slane %v2921_v39, 6 }
0x30c9   :  { %v3008_v45 = vadd.f32 %v5718_v35, %v3007_v43 }
0x30cb   :  { %v3965_v24 = vmul.f32 -1.442695, %v3008_v45 }
0x30cd   :  { %4750 = vpow2.f32 %v3965_v24 }
0x30ce   :  { %4752 = vtanh.f32 %v3008_v45 }
0x30da   :  { %v4751_v63 = vpop.eup %4750 }
0x30db   :  { %v3013_v46 = vadd.f32 1.0, %v4751_v63  ;;  %v4753_v48 = vpop.eup %4752  ;;  %v3476_v63 = vld [vmem:[%s6062_s10 + $0x38] sm:$0xff] }
0x30dd   :  { %4754 = vrcp.f32 %v3013_v46 }
0x30ea   :  { %v4755_v51 = vpop.eup %4754 }
0x30eb   :  { %v3016_v33 = vsel %vm5179_vm6, %v4753_v48, %v4755_v51  ;;  %v3475_v48 = vld [vmem:[%s6062_s10 + $0x30] sm:$0xff]  ;;  %v3474_v51 = vld [vmem:[%s6062_s10 + $0x28] sm:$0xff] }
0x30ec   :  { %3022 = vrot.lane.b32.xlu0 %v3016_v33, %s5003_s6  ;;  %v3020_v53 = vmul.f32 %v3018_v6, %v3016_v33 }
0x315e   :  { %v3023_v18 = vpop.permute.xlu0 %3022 }
0x315f   :  { %v3025_v52 = vmul.f32 %v3023_v18, %v3016_v33 }
0x3161   :  { %3027 = vrot.lane.b32.xlu1 %v3025_v52, %s5004_s15 }
0x31d3   :  { %v3028_v54 = vpop.permute.xlu1 %3027 }
0x31d4   :  { %v3030_v55 = vadd.f32 %v3028_v54, %v3020_v53 }
0x31d6   :  { %4756 = vtanh.f32 %v3030_v55  ;;  %v3124_v23 = vrot.slane %v3030_v55, 6 }
0x31e3   :  { %v4757_v56 = vpop.eup %4756 }
0x31e4   :  { %3033 = vrot.lane.b32.xlu0 %v4757_v56, %s5003_s6 }
0x3256   :  { %v3034_v3 = vpop.permute.xlu0 %3033 }
0x3257   :  { %v3036_v32 = vmul.f32 %v3034_v3, %v3016_v33  ;;  %v3473_v33 = vld [vmem:[%s6062_s10 + $0x20] sm:$0xff] }
0x3259   :  { %v3038_v1 = vrot.slane %v3036_v32, 6 }
0x325b   :  { %3039 = vrot.lane.b32.xlu1 %v3038_v1, %s5004_s15 }
0x32cd   :  { %v3040_v58 = vpop.permute.xlu1 %3039 }
0x32ce   :  { %4430 = vmatmul.mubr.msk.f32.vlgmr.msra.gmra.mxu0 %vm332_vm7, %v3040_v58 }
0x32cf   :  { %4444 = vmatpush3.msra.mxu0 %v5659_v15  ;;  %4451 = vmatprep.mubr.msk.f32.mxu0 %vm5002_vm2, %v5001_v5 }
0x32d0   :  { %4445 = vmatprep.subr.mxu0 %v5001_v5 }
0x32d1   :  { %4446 = vmatpush3.msra.mxu0 %v5666_v7 }
0x32d2   :  { %4447 = vmatprep.subr.mxu0 %v5001_v5 }
0x32d3   :  { %4448 = vmatpush3.msra.mxu0 %v5675_v26 }
0x32d4   :  { %4449 = vmatprep.subr.mxu0 %v5001_v5 }
0x32d5   :  { %4450 = vmatpush3.msra.mxu0 %v5684_v57 }
0x32d6   :  { %4465 = vmatprep.subr.mxu0 %v5001_v5 }
0x338e   :  { %v3109_v61 = vpop.f32.mrf.mxu0 }
0x338f   :  { %v3113_v59 = vadd.f32 %v3109_v61, %v5711_v4 }
0x3390   :  { %v4431_v2 = vpop.f32.mrf.mxu0 }
0x3391   :  { %v3114_v10 = vadd.f32 %v5718_v35, %v3113_v59 }
0x3393   :  { %v3967_v12 = vmul.f32 -1.442695, %v3114_v10 }
0x3395   :  { %4758 = vpow2.f32 %v3967_v12 }
0x3396   :  { %4760 = vtanh.f32 %v3114_v10 }
0x33a2   :  { %v4759_v9 = vpop.eup %4758 }
0x33a3   :  { %v3119_v13 = vadd.f32 1.0, %v4759_v9  ;;  %v4761_v14 = vpop.eup %4760 }
0x33a5   :  { %4762 = vrcp.f32 %v3119_v13 }
0x33b2   :  { %v4763_v16 = vpop.eup %4762 }
0x33b3   :  { %v3122_v20 = vsel %vm5179_vm6, %v4761_v14, %v4763_v16 }
0x33b4   :  { %3128 = vrot.lane.b32.xlu0 %v3122_v20, %s5003_s6  ;;  %v3126_v17 = vmul.f32 %v3124_v23, %v3122_v20 }
0x3426   :  { %v3129_v21 = vpop.permute.xlu0 %3128 }
0x3427   :  { %v3131_v22 = vmul.f32 %v3129_v21, %v3122_v20 }
0x3429   :  { %3133 = vrot.lane.b32.xlu1 %v3131_v22, %s5004_s15  ;;  %v3472_v22 = vld [vmem:[%s6062_s10 + $0x18] sm:$0xff] }
0x349b   :  { %v3134_v47 = vpop.permute.xlu1 %3133 }
0x349c   :  { %v3136_v28 = vadd.f32 %v3134_v47, %v3126_v17  ;;  %v3471_v17 = vld [vmem:[%s6062_s10 + $0x10] sm:$0xff]  ;;  %v3469_v47 = vld [vmem:[%s6062_s10] sm:$0xff] }
0x349e   :  { %4764 = vtanh.f32 %v3136_v28  ;;  %v3232_v50 = vrot.slane %v3136_v28, 6 }
0x34ab   :  { %v4765_v29 = vpop.eup %4764 }
0x34ac   :  { %3139 = vrot.lane.b32.xlu0 %v4765_v29, %s5003_s6 }
0x351e   :  { %v3140_v30 = vpop.permute.xlu0 %3139 }
0x351f   :  { %v3142_v11 = vmul.f32 %v3140_v30, %v3122_v20 }
0x3521   :  { %3144 = vrot.lane.b32.xlu1 %v3142_v11, %s5004_s15 }
0x3593   :  { %v3145_v34 = vpop.permute.xlu1 %3144 }
0x3594   :  { %4441 = vmatmul.mubr.msk.f32.vlgmr.msra.gmra.mxu1 %vm332_vm7, %v3145_v34 }
0x3595   :  { %4455 = vmatpush3.msra.mxu1 %v5659_v15  ;;  %4462 = vmatprep.mubr.msk.f32.mxu1 %vm5002_vm2, %v5001_v5 }
0x3596   :  { %4456 = vmatprep.subr.mxu1 %v5001_v5 }
0x3597   :  { %4457 = vmatpush3.msra.mxu1 %v5666_v7 }
0x3598   :  { %4458 = vmatprep.subr.mxu1 %v5001_v5 }
0x3599   :  { %4459 = vmatpush3.msra.mxu1 %v5675_v26 }
0x359a   :  { %4460 = vmatprep.subr.mxu1 %v5001_v5 }
0x359b   :  { %4461 = vmatpush3.msra.mxu1 %v5684_v57 }
0x359c   :  { %4476 = vmatprep.subr.mxu1 %v5001_v5 }
0x3654   :  { %v3214_v36 = vpop.f32.mrf.mxu1 }
0x3655   :  { %v3219_v8 = vrot.slane %v3214_v36, 6 }
0x3656   :  { %v4442_v15 = vpop.f32.mrf.mxu1 }
0x3657   :  { %v3221_v37 = vadd.f32 %v3219_v8, %v5711_v4 }
0x3659   :  { %v3222_v19 = vadd.f32 %v5718_v35, %v3221_v37  ;;  %v3976_v37 = vld [vmem:[%s6063_s11] ss:$0 sm:$0xff] }
0x365b   :  { %v3969_v38 = vmul.f32 -1.442695, %v3222_v19 }
0x365d   :  { %4766 = vpow2.f32 %v3969_v38 }
0x365e   :  { %4768 = vtanh.f32 %v3222_v19 }
0x366a   :  { %v4767_v7 = vpop.eup %4766 }
0x366b   :  { %v3227_v39 = vadd.f32 1.0, %v4767_v7  ;;  %v4769_v26 = vpop.eup %4768 }
0x366d   :  { %4770 = vrcp.f32 %v3227_v39 }
0x367a   :  { %v4771_v40 = vpop.eup %4770 }
0x367b   :  { %v3230_v57 = vsel %vm5179_vm6, %v4769_v26, %v4771_v40 }
0x367c   :  { %3236 = vrot.lane.b32.xlu0 %v3230_v57, %s5003_s6  ;;  %v3234_v0 = vmul.f32 %v3232_v50, %v3230_v57 }
0x36ee   :  { %v3237_v60 = vpop.permute.xlu0 %3236 }
0x36ef   :  { %v3239_v41 = vmul.f32 %v3237_v60, %v3230_v57 }
0x36f1   :  { %3241 = vrot.lane.b32.xlu1 %v3239_v41, %s5004_s15 }
0x3763   :  { %v3242_v42 = vpop.permute.xlu1 %3241 }
0x3764   :  { %v3244_v62 = vadd.f32 %v3242_v42, %v3234_v0 }
0x3766   :  { %4772 = vtanh.f32 %v3244_v62  ;;  %v3341_v10 = vrot.slane %v3244_v62, 6 }
0x3773   :  { %v4773_v44 = vpop.eup %4772 }
0x3774   :  { %3247 = vrot.lane.b32.xlu0 %v4773_v44, %s5003_s6 }
0x37e6   :  { %v3248_v43 = vpop.permute.xlu0 %3247 }
0x37e7   :  { %v3250_v45 = vmul.f32 %v3248_v43, %v3230_v57 }
0x37e9   :  { %v3252_v24 = vrot.slane %v3250_v45, 2 }
0x37eb   :  { %3253 = vrot.lane.b32.xlu1 %v3252_v24, %s5004_s15 }
0x385d   :  { %v3254_v46 = vpop.permute.xlu1 %3253 }
0x385e   :  { %4452 = vmatmul.mubr.msk.f32.vlgmr.msra.gmra.mxu0 %vm332_vm7, %v3254_v46 }
0x385f   :  { %4466 = vmatpush3.msra.mxu0 %v3476_v63  ;;  %4473 = vmatprep.mubr.msk.f32.mxu0 %vm5002_vm2, %v5001_v5 }
0x3860   :  { %4467 = vmatprep.subr.mxu0 %v5001_v5 }
0x3861   :  { %4468 = vmatpush3.msra.mxu0 %v3475_v48 }
0x3862   :  { %4469 = vmatprep.subr.mxu0 %v5001_v5 }
0x3863   :  { %4470 = vmatpush3.msra.mxu0 %v3474_v51 }
0x3864   :  { %4471 = vmatprep.subr.mxu0 %v5001_v5 }
0x3865   :  { %4472 = vmatpush3.msra.mxu0 %v3473_v33  ;;  %v3679_v33 = vld [vmem:[%s6064_s12 + $0x78] sm:$0xff] }
0x3866   :  { %4474 = vmatmul.mubr.msk.f32.vlgmr.msra.gmra.mxu0 %vm332_vm7, %v5433_v27  ;;  %3713 = vmatprep.subr.mxu0 %v3679_v33 }
0x3867   :  { %3761 = vmatprep.mubr.f32.mxu0 %v5001_v5 }
0x391e   :  { %v3323_v18 = vpop.f32.mrf.mxu0 }
0x391f   :  { %v3328_v52 = vrot.slane %v3323_v18, 4  ;;  %v3678_v18 = vld [vmem:[%s6064_s12 + $0x70] sm:$0xff] }
0x3920   :  { %v4453_v6 = vpop.f32.mrf.mxu0  ;;  %3714 = vmatpush1.msra.mxu0 %v3678_v18 }
0x3921   :  { %v3330_v53 = vadd.f32 %v3328_v52, %v5711_v4  ;;  %v3677_v52 = vld [vmem:[%s6064_s12 + $0x68] sm:$0xff]  ;;  %v3676_v6 = vld [vmem:[%s6064_s12 + $0x60] sm:$0xff] }
0x3922   :  { %3715 = vmatprep.subr.mxu0 %v3677_v52 }
0x3923   :  { %v3331_v54 = vadd.f32 %v5718_v35, %v3330_v53  ;;  %3716 = vmatpush1.msra.mxu0 %v3676_v6 }
0x3925   :  { %v3971_v55 = vmul.f32 -1.442695, %v3331_v54 }
0x3926   :  { %v3543_v56 = vpop.f32.mrf.mxu0 }
0x3927   :  { %4774 = vpow2.f32 %v3971_v55  ;;  %v3674_v55 = vld [vmem:[%s6064_s12 + $0x50] sm:$0xff] }
0x3928   :  { %v4475_v3 = vpop.f32.mrf.mxu0  ;;  %4776 = vtanh.f32 %v3331_v54  ;;  %v3675_v54 = vld [vmem:[%s6064_s12 + $0x58] sm:$0xff] }
0x3929   :  { %3717 = vmatprep.subr.mxu0 %v3675_v54  ;;  %v3673_v3 = vld [vmem:[%s6064_s12 + $0x48] sm:$0xff] }
0x392a   :  { %3718 = vmatpush1.msra.mxu0 %v3674_v55 }
0x392b   :  { %3719 = vmatprep.subr.mxu0 %v3673_v3 }
0x3934   :  { %v4775_v32 = vpop.eup %4774 }
0x3935   :  { %v3336_v1 = vadd.f32 1.0, %v4775_v32  ;;  %v4777_v58 = vpop.eup %4776  ;;  %v3672_v32 = vld [vmem:[%s6064_s12 + $0x40] sm:$0xff] }
0x3936   :  { %3720 = vmatpush1.msra.mxu0 %v3672_v32  ;;  %v3979_v32 = vld [vmem:[#allocation14] ss:$0 sm:$0xff] }
0x3937   :  { %4778 = vrcp.f32 %v3336_v1  ;;  %v3671_v1 = vld [vmem:[%s6064_s12 + $0x38] sm:$0xff] }
0x3938   :  { %3721 = vmatprep.subr.mxu0 %v3671_v1 }
0x3944   :  { %v4779_v61 = vpop.eup %4778 }
0x3945   :  { %v3339_v27 = vsel %vm5179_vm6, %v4777_v58, %v4779_v61  ;;  %v3670_v58 = vld [vmem:[%s6064_s12 + $0x30] sm:$0xff]  ;;  %v3669_v61 = vld [vmem:[%s6064_s12 + $0x28] sm:$0xff] }
0x3946   :  { %3345 = vrot.lane.b32.xlu0 %v3339_v27, %s5003_s6  ;;  %v3343_v12 = vmul.f32 %v3341_v10, %v3339_v27  ;;  %3722 = vmatpush1.msra.mxu0 %v3670_v58  ;;  %v3665_v10 = vld [vmem:[%s6064_s12 + $0x8] sm:$0xff] }
0x3947   :  { %3723 = vmatprep.subr.mxu0 %v3669_v61 }
0x39b8   :  { %v3346_v59 = vpop.permute.xlu0 %3345 }
0x39b9   :  { %v3348_v2 = vmul.f32 %v3346_v59, %v3339_v27  ;;  %v3667_v59 = vld [vmem:[%s6064_s12 + $0x18] sm:$0xff] }
0x39bb   :  { %3350 = vrot.lane.b32.xlu1 %v3348_v2, %s5004_s15  ;;  %v3666_v2 = vld [vmem:[%s6064_s12 + $0x10] sm:$0xff] }
0x3a2d   :  { %v3351_v9 = vpop.permute.xlu1 %3350 }
0x3a2e   :  { %v5850_v13 = vadd.f32 %v3351_v9, %v3343_v12  ;;  %v3664_v12 = vld [vmem:[%s6064_s12] sm:$0xff] }
0x3a30   :  { %4780 = vtanh.f32 %v5850_v13  ;;  %v3450_v45 = vrot.slane %v5850_v13, 6 }
0x3a3d   :  { %v4781_v14 = vpop.eup %4780 }
0x3a3e   :  { %3356 = vrot.lane.b32.xlu0 %v4781_v14, %s5003_s6  ;;  %v3801_v14 = vld [vmem:[%s6066_s14 + $0xf8] sm:$0xff] }
0x3a42   :  { %3547 = vrot.lane.b32.xlu0 %v5612_v49, %s5004_s15  ;;  %v3470_v49 = vld [vmem:[%s6062_s10 + $0x8] sm:$0xff] }
0x3ab0   :  { %v3357_v16 = vpop.permute.xlu0 %3356 }
0x3ab1   :  { %v3359_v20 = vmul.f32 %v3357_v16, %v3339_v27  ;;  %v3668_v27 = vld [vmem:[%s6064_s12 + $0x20] sm:$0xff]  ;;  %v3785_v16 = vld [vmem:[%s6066_s14 + $0x78] sm:$0xff] }
0x3ab2   :  { %3724 = vmatpush1.msra.mxu0 %v3668_v27 }
0x3ab3   :  { %v3361_v21 = vrot.slane %v3359_v20, 4  ;;  %3725 = vmatprep.subr.mxu0 %v3667_v59  ;;  %v3800_v20 = vld [vmem:[%s6066_s14 + $0xf0] sm:$0xff] }
0x3ab4   :  { %v3548_v28 = vpop.permute.xlu0 %3547  ;;  %3726 = vmatpush1.msra.mxu0 %v3666_v2 }
0x3ab5   :  { %3362 = vrot.lane.b32.xlu1 %v3361_v21, %s5004_s15  ;;  %3727 = vmatprep.subr.mxu0 %v3665_v10  ;;  %v3784_v21 = vld [vmem:[%s6066_s14 + $0x70] sm:$0xff] }
0x3ab6   :  { %3728 = vmatpush1.msra.mxu0 %v3664_v12 }
0x3b27   :  { %v3363_v23 = vpop.permute.xlu1 %3362 }
0x3b28   :  { %4463 = vmatmul.mubr.msk.f32.vlgmr.msra.gmra.mxu1 %vm332_vm7, %v3363_v23  ;;  %v3783_v23 = vld [vmem:[%s6066_s14 + $0x68] sm:$0xff] }
0x3b29   :  { %4477 = vmatpush3.msra.mxu1 %v3472_v22  ;;  %4484 = vmatprep.mubr.msk.f32.mxu1 %vm5002_vm2, %v5001_v5  ;;  %v3799_v22 = vld [vmem:[%s6066_s14 + $0xe8] sm:$0xff] }
0x3b2a   :  { %4478 = vmatprep.subr.mxu1 %v5001_v5 }
0x3b2b   :  { %4479 = vmatpush3.msra.mxu1 %v3471_v17  ;;  %v3798_v17 = vld [vmem:[%s6066_s14 + $0xe0] sm:$0xff] }
0x3b2c   :  { %4480 = vmatprep.subr.mxu1 %v5001_v5 }
0x3b2d   :  { %4481 = vmatpush3.msra.mxu1 %v3470_v49 }
0x3b2e   :  { %4482 = vmatprep.subr.mxu1 %v5001_v5 }
0x3b2f   :  { %4483 = vmatpush3.msra.mxu1 %v3469_v47  ;;  %v3782_v47 = vld [vmem:[%s6066_s14 + $0x60] sm:$0xff] }
0x3b30   :  { %4485 = vmatmul.mubr.msk.f32.vlgmr.msra.gmra.mxu1 %vm332_vm7, %v3548_v28  ;;  %4130 = vmatprep.subr.mxu1 %v3801_v14 }
0x3b31   :  { %4131 = vmatpush3.msra.mxu1 %v3785_v16 }
0x3b32   :  { %4132 = vmatprep.subr.mxu1 %v3800_v20 }
0x3b33   :  { %4133 = vmatpush3.msra.mxu1 %v3784_v21 }
0x3b34   :  { %4134 = vmatprep.subr.mxu1 %v3799_v22 }
0x3b35   :  { %4135 = vmatpush3.msra.mxu1 %v3783_v23 }
0x3b36   :  { %4136 = vmatprep.subr.mxu1 %v3798_v17 }
0x3b37   :  { %4137 = vmatpush3.msra.mxu1 %v3782_v47 }
0x3be8   :  { %v3432_v29 = vpop.f32.mrf.mxu1 }
0x3be9   :  { %v3437_v30 = vrot.slane %v3432_v29, 2  ;;  %v3797_v29 = vld [vmem:[%s6066_s14 + $0xd8] sm:$0xff] }
0x3bea   :  { %v4464_v11 = vpop.f32.mrf.mxu1  ;;  %4138 = vmatprep.subr.mxu1 %v3797_v29 }
0x3beb   :  { %v3439_v34 = vadd.f32 %v3437_v30, %v5711_v4  ;;  %v3781_v30 = vld [vmem:[%s6066_s14 + $0x58] sm:$0xff] }
0x3bec   :  { %4139 = vmatpush3.msra.mxu1 %v3781_v30 }
0x3bed   :  { %v3440_v36 = vadd.f32 %v5718_v35, %v3439_v34  ;;  %v3796_v34 = vld [vmem:[%s6066_s14 + $0xd0] sm:$0xff] }
0x3bee   :  { %4140 = vmatprep.subr.mxu1 %v3796_v34 }
0x3bef   :  { %v3973_v8 = vmul.f32 -1.442695, %v3440_v36 }
0x3bf0   :  { %v3617_v15 = vpop.f32.mrf.mxu1 }
0x3bf1   :  { %4782 = vpow2.f32 %v3973_v8  ;;  %v3618_v19 = vadd.f32 %v3617_v15, %v3543_v56  ;;  %v3795_v8 = vld [vmem:[%s6066_s14 + $0xc8] sm:$0xff] }
0x3bf2   :  { %v4486_v5 = vpop.f32.mrf.mxu1  ;;  %v3779_v15 = vld [vmem:[%s6066_s14 + $0x48] sm:$0xff] }
0x3bf3   :  { %v3628_v38 = vadd.f32 %v3976_v37, %v3618_v19  ;;  %v3794_v37 = vld [vmem:[%s6066_s14 + $0xc0] sm:$0xff]  ;;  %v3793_v5 = vld [vmem:[%s6066_s14 + $0xb8] sm:$0xff] }
0x3bf4   :  { %v3778_v19 = vld [vmem:[%s6066_s14 + $0x40] sm:$0xff] }
0x3bf5   :  { %v3977_v7 = vmul.f32 -1.442695, %v3628_v38 }
0x3bf7   :  { %4784 = vpow2.f32 %v3977_v7  ;;  %v3792_v7 = vld [vmem:[%s6066_s14 + $0xb0] sm:$0xff] }
0x3bf8   :  { %4786 = vtanh.f32 %v3440_v36  ;;  %v3780_v36 = vld [vmem:[%s6066_s14 + $0x50] sm:$0xff] }
0x3bf9   :  { %4141 = vmatpush3.msra.mxu1 %v3780_v36 }
0x3bfa   :  { %4142 = vmatprep.subr.mxu1 %v3795_v8 }
0x3bfb   :  { %4143 = vmatpush3.msra.mxu1 %v3779_v15 }
0x3bfc   :  { %4144 = vmatprep.subr.mxu1 %v3794_v37 }
0x3bfd   :  { %4145 = vmatpush3.msra.mxu1 %v3778_v19 }
0x3bfe   :  { %v4783_v39 = vpop.eup %4782  ;;  %4146 = vmatprep.subr.mxu1 %v3793_v5 }
0x3bff   :  { %v3445_v26 = vadd.f32 1.0, %v4783_v39  ;;  %v3776_v39 = vld [vmem:[%s6066_s14 + $0x30] sm:$0xff] }
0x3c01   :  { %4788 = vrcp.f32 %v3445_v26  ;;  %v3791_v26 = vld [vmem:[%s6066_s14 + $0xa8] sm:$0xff] }
0x3c02   :  { %4790 = vtanh.f32 %v3628_v38  ;;  %v3777_v38 = vld [vmem:[%s6066_s14 + $0x38] sm:$0xff] }
0x3c03   :  { %4147 = vmatpush3.msra.mxu1 %v3777_v38 }
0x3c04   :  { %v4785_v40 = vpop.eup %4784  ;;  %4148 = vmatprep.subr.mxu1 %v3792_v7 }
0x3c05   :  { %v3633_v4 = vadd.f32 1.0, %v4785_v40  ;;  %v4787_v35 = vpop.eup %4786  ;;  %v3775_v40 = vld [vmem:[%s6066_s14 + $0x28] sm:$0xff]  ;;  %4149 = vmatpush3.msra.mxu1 %v3776_v39 }
0x3c06   :  { %4150 = vmatprep.subr.mxu1 %v3791_v26 }
0x3c07   :  { %4792 = vrcp.f32 %v3633_v4  ;;  %v3790_v4 = vld [vmem:[%s6066_s14 + $0xa0] sm:$0xff]  ;;  %4151 = vmatpush3.msra.mxu1 %v3775_v40 }
0x3c08   :  { %4152 = vmatprep.subr.mxu1 %v3790_v4 }
0x3c0e   :  { %v4789_v57 = vpop.eup %4788 }
0x3c0f   :  { %v3448_v60 = vsel %vm5179_vm6, %v4787_v35, %v4789_v57  ;;  %v4791_v41 = vpop.eup %4790  ;;  %v3774_v35 = vld [vmem:[%s6066_s14 + $0x20] sm:$0xff] }
0x3c10   :  { %3454 = vrot.lane.b32.xlu0 %v3448_v60, %s5003_s6  ;;  %v3452_v24 = vmul.f32 %v3450_v45, %v3448_v60  ;;  %4153 = vmatpush3.msra.mxu1 %v3774_v35  ;;  %v3771_v45 = vld [vmem:[%s6066_s14 + $0x8] sm:$0xff] }
0x3c14   :  { %v4793_v50 = vpop.eup %4792 }
0x3c15   :  { %v5886_v0 = vsel %vm5179_vm6, %v4791_v41, %v4793_v50 }
0x3c16   :  { %3639 = vrot.lane.b32.xlu1 %v5886_v0, %s5003_s6  ;;  %v3637_v31 = vmul.f32 0.0, %v5886_v0 }
0x3c82   :  { %v3455_v42 = vpop.permute.xlu0 %3454 }
0x3c83   :  { %v3457_v62 = vmul.f32 %v3455_v42, %v3448_v60  ;;  %v3773_v42 = vld [vmem:[%s6066_s14 + $0x18] sm:$0xff] }
0x3c85   :  { %3459 = vrot.lane.b32.xlu0 %v3457_v62, %s5004_s15  ;;  %v3788_v62 = vld [vmem:[%s6066_s14 + $0x90] sm:$0xff] }
0x3c88   :  { %v3640_v44 = vpop.permute.xlu1 %3639 }
0x3c89   :  { %v3642_v43 = vmul.f32 %v3640_v44, %v5886_v0  ;;  %v3772_v44 = vld [vmem:[%s6066_s14 + $0x10] sm:$0xff] }
0x3c8b   :  { %3644 = vrot.lane.b32.xlu1 %v3642_v43, %s5004_s15  ;;  %v3787_v43 = vld [vmem:[%s6066_s14 + $0x88] sm:$0xff] }
0x3cf7   :  { %v3460_v63 = vpop.permute.xlu0 %3459 }
0x3cf8   :  { %v3462_v46 = vadd.f32 %v3460_v63, %v3452_v24  ;;  %v3786_v24 = vld [vmem:[%s6066_s14 + $0x80] sm:$0xff] }
0x3cf9   :  { %v3770_v63 = vld [vmem:[%s6066_s14] sm:$0xff] }
0x3cfa   :  { %4794 = vtanh.f32 %v3462_v46  ;;  %v3683_v46 = vshrl.u32 %v420_v25, 7 }
0x3cfd   :  { %v3645_v48 = vpop.permute.xlu1 %3644 }
0x3cfe   :  { %v3647_v51 = vadd.f32 %v3645_v48, %v3637_v31  ;;  %v3684_v31 = vsub.s32 0, %v3683_v46  ;;  %v3680_v48 = vld [vmem:[%s6065_s13] sm:$0x3] }
0x3d00   :  { %4796 = vtanh.f32 %v3647_v51  ;;  %v3688_v51 = vsub.s32 1, %v3683_v46  ;;  %v3685_v33 = vrot.slane %v3680_v48, %v3684_v31 }
0x3d02   :  { %v3689_v18 = vrot.slane %v3680_v48, %v3688_v51 }
0x3d07   :  { %v4795_v53 = vpop.eup %4794 }
0x3d08   :  { %3465 = vrot.lane.b32.xlu0 %v4795_v53, %s5003_s6 }
0x3d0d   :  { %v4797_v56 = vpop.eup %4796 }
0x3d0e   :  { %3650 = vrot.lane.b32.xlu1 %v4797_v56, %s5003_s6 }
0x3d7a   :  { %v3466_v9 = vpop.permute.xlu0 %3465 }
0x3d7b   :  { %v3468_v13 = vmul.f32 %v3466_v9, %v3448_v60 }
0x3d7d   :  { %3655 = vrot.lane.b32.xlu1 %v3468_v13, %s5004_s15 }
0x3d80   :  { %v3651_v49 = vpop.permute.xlu1 %3650 }
0x3d81   :  { %v3653_v28 = vmul.f32 %v3651_v49, %v5886_v0  ;;  %v3789_v0 = vld [vmem:[%s6066_s14 + $0x98] sm:$0xff]  ;;  %s5005_s14 = smov [#allocation16]  }
0x3d82   :  { %4154 = vmatprep.subr.mxu1 %v3789_v0  ;;  %s3887_s2 = sshll.u32 %s5005_s14, 4  ;;  %s3888_s2 = int_to_ptr.vmem [resolvable:$true] %s3887_s2 }
0x3d83   :  { %v3659_v11 = vrot.slane %v3653_v28, 2  ;;  %4155 = vmatpush3.msra.mxu1 %v3773_v42  ;;  %s4959_s13 = scalar_lea.vmem %s3888_s2, 32  ;;  %p4964_p13 = scmp.lt.s32.totalorder %s3888_s2, %s3888_s2 }
0x3d84   :  { %4156 = vmatprep.subr.mxu1 %v3788_v62  ;;  %p4960_p12 = scmp.ne.s32.totalorder %s3888_s2, %s4959_s13  ;;  %p4965_p0 = scmp.lt.s32.totalorder %s4959_s13, %s4959_s13 }
0x3d85   :  { %3660 = vrot.lane.b32.xlu0 %v3659_v11, %s5003_s6  ;;  %4157 = vmatpush3.msra.mxu1 %v3772_v44 }
0x3d86   :  { %4158 = vmatprep.subr.mxu1 %v3787_v43  ;;  %p4966_p1 = por %p4965_p0, %p4964_p13 }
0x3d87   :  { %4159 = vmatpush3.msra.mxu1 %v3771_v45 }
0x3d88   :  { %4160 = vmatprep.subr.mxu1 %v3786_v24  ;;  %p4967_p2 = pnand %p4966_p1, %p4960_p12 }
0x3d89   :  { %4161 = vmatpush3.msra.mxu1 %v3770_v63 }
0x3def   :  { %v3656_v57 = vpop.permute.xlu1 %3655 }
0x3df7   :  { %v3661_v60 = vpop.permute.xlu0 %3660 }
0x3df8   :  { %v3663_v41 = vsel %vm332_vm7, %v3656_v57, %v3661_v60 }
0x3df9   :  { %v3693_v50 = vrot.slane %v3663_v41, 6 }
0x3dfb   :  { %3978 = vmatmul.mubr.msk.f32.vlgmr.msra.gmra.mxu0 %vm3694_vm11, %v3693_v50 }
0x3ebb   :  { %v3763_v52 = vpop.f32.mrf.mxu0 }
0x3ebc   :  { %v3764_v6 = vadd.f32 %v3763_v52, %v3685_v33 }
0x3ebd   :  { %v3765_v53 = vpop.f32.mrf.mxu0 }
0x3ebe   :  { %v3766_v54 = vadd.f32 %v3765_v53, %v3689_v18  ;;  %v3768_v56 = vmax.f32 %v3764_v6, 0.0 }
0x3ec0   :  { %v3769_v55 = vmax.f32 %v3766_v54, 0.0 }
0x3ec2   :  { %3873 = vmatprep.mubr.f32.mxu1 %v3769_v55 }
0x3ec3   :  { %3874 = vmatmul.mubr.f32.vlgmr.msra.gmra.mxu1 %v3768_v56 }
0x3f83   :  { %v4162_v3 = vpop.f32.mrf.mxu1 }
0x3f85   :  { %v4163_v1 = vpop.f32.mrf.mxu1 }
0x3f86   :  { %v4164_v25 = vadd.f32 %v4163_v1, %v4162_v3 }
0x3f88   :  { %v3876_v58 = vadd.f32 %v4164_v25, %v3979_v32 }
0x3f8a   :  { %3880 = vst.msk [vmem:[#allocation16] sm:$0x3] %vm3879_vm12, %v3876_v58 }
0x3f8b   :  { %4970 = shalt.err (!%p4967_p2)
}
0x3f8c   :  { %3890 = dma.vmem_to_hbm [thread:$0]  %s3888_s2, 32, %s6068_s16, [#allocation4]  }
0x3f8d   :  { %4989 = dma.done.wait [#allocation4], 32  }
0x3f8e   :  { %4990 = vsyncadd [#allocation4], 4294967264 }
0x3f8f   :  { %3894 = vsyncpa [#allocation3], 1 }
0x3f90   :  { %3895 = vsyncpa [#allocation6], 1 }
0x3f91   :  { %3896 = vsyncpa [#allocation9], 1 }
0x3f92   :  { %3897 = vsyncpa [#allocation12], 1 }
0x3f93   :  { %3898 = vsyncpa [#allocation15], 1 }
0x3f94   :  { %3899 = vsyncpa [#allocation4], 1 }

</bundles_post_ra>
